<compile_context>
chip_gen: v7x
topology: tpu7x:2x2x1
jax: 0.10.0
libtpu: 0.0.40
codegen_flags: <defaults>
</compile_context>

<pallas_src>
import functools

import jax
import jax.numpy as jnp
from jax.experimental import pallas as pl
from jax.experimental.pallas import tpu as pltpu

EPS = 1e-5
IN_FEATS = 384
OUT_FEATS = 1536
TM = 256  # row tile (multiple of 8; fills the 256-wide MXU M dim on v6e/v7x)


def _ln_linear_kernel(x_ref, w_ref, b_ref, o_ref):
    # x_ref: (TM, 384) activations          (f32)
    # w_ref: (384, 1536) folded weight      (bf16, gamma pre-multiplied)
    # b_ref: (1, 1536)  folded bias         (f32, beta @ W + b)
    # o_ref: (TM, 1536) output              (f32)
    x = x_ref[...].astype(jnp.float32)

    inv_k = jnp.float32(1.0 / IN_FEATS)
    s = jnp.sum(x, axis=-1, keepdims=True)
    sq = jnp.sum(x * x, axis=-1, keepdims=True)
    mean = s * inv_k
    var = jnp.maximum(sq * inv_k - mean * mean, 0.0)
    inv = jax.lax.rsqrt(var + EPS)
    xn = (x - mean) * inv

    y = jnp.dot(xn.astype(w_ref.dtype), w_ref[...],
                preferred_element_type=jnp.float32)
    o_ref[...] = (y + b_ref[...]).astype(o_ref.dtype)


@functools.partial(jax.jit, static_argnames=("weight_dtype",))
def layernorm_linear(x, gamma, beta, w, b, *, weight_dtype=jnp.bfloat16):
    """x: (..., 384) f32; w: (384, 1536) (torch weight pre-transposed).

    Returns (..., 1536) f32, matching LayerNorm(384) -> Linear(384, 1536).
    """
    lead_shape = x.shape[:-1]
    rows = 1
    for d in lead_shape:
        rows *= d
    x2 = x.reshape(rows, IN_FEATS)

    # Fold the LayerNorm affine into the linear layer (exact algebra):
    #   (xn * gamma + beta) @ W + b == xn @ (gamma[:, None] * W) + (beta @ W + b)
    w_folded = (gamma.astype(jnp.float32)[:, None] * w.astype(jnp.float32))
    b_folded = (beta.astype(jnp.float32) @ w.astype(jnp.float32)
                + b.astype(jnp.float32)).reshape(1, OUT_FEATS)
    w_folded = w_folded.astype(weight_dtype)

    # Pad rows to a multiple of TM -> aligned sublanes, full MXU M tiles.
    rows_p = ((rows + TM - 1) // TM) * TM
    if rows_p != rows:
        x2 = jnp.pad(x2, ((0, rows_p - rows), (0, 0)))

    grid = (rows_p // TM,)
    w_bytes = IN_FEATS * OUT_FEATS * jnp.dtype(weight_dtype).itemsize
    cost = pl.CostEstimate(
        flops=2 * rows_p * IN_FEATS * OUT_FEATS,
        transcendentals=rows_p,  # one rsqrt per row
        bytes_accessed=rows_p * IN_FEATS * 4 + w_bytes + OUT_FEATS * 4
        + rows_p * OUT_FEATS * 4,
    )

    out = pl.pallas_call(
        _ln_linear_kernel,
        out_shape=jax.ShapeDtypeStruct((rows_p, OUT_FEATS), x.dtype),
        grid_spec=pltpu.PrefetchScalarGridSpec(
            num_scalar_prefetch=0,
            grid=grid,
            in_specs=[
                pl.BlockSpec((TM, IN_FEATS), lambda i: (i, 0)),
                # Weight / bias: same block every step -> resident in VMEM.
                pl.BlockSpec((IN_FEATS, OUT_FEATS), lambda i: (0, 0)),
                pl.BlockSpec((1, OUT_FEATS), lambda i: (0, 0)),
            ],
            out_specs=pl.BlockSpec((TM, OUT_FEATS), lambda i: (i, 0)),
        ),
        compiler_params=pltpu.CompilerParams(
            dimension_semantics=("parallel",),
        ),
        cost_estimate=cost,
    )(x2, w_folded, b_folded)

    out = out[:rows]
    return out.reshape(*lead_shape, OUT_FEATS)


def _reference(x, gamma, beta, w, b):
    # Pure f32 reference matching the PyTorch module semantics.
    mean = jnp.mean(x, axis=-1, keepdims=True)
    var = jnp.mean((x - mean) ** 2, axis=-1, keepdims=True)
    xn = (x - mean) * jax.lax.rsqrt(var + EPS) * gamma + beta
    return jnp.einsum("...i,io->...o", xn, w) + b


if __name__ == "__main__":
    key = jax.random.PRNGKey(0)
    k_x, k_g, k_be, k_w, k_b = jax.random.split(key, 5)

    # Input matching the module's forward: (1, 14, 14, 384)
    x = jax.random.normal(k_x, (1, 14, 14, 384), dtype=jnp.float32)

    # Deterministic synthetic parameters (module __init__ shapes).
    gamma = 1.0 + 0.02 * jax.random.normal(k_g, (IN_FEATS,), dtype=jnp.float32)
    beta = 0.02 * jax.random.normal(k_be, (IN_FEATS,), dtype=jnp.float32)
    # torch Linear weight is (out, in); we pass it pre-transposed as (in, out).
    w = jax.random.normal(k_w, (IN_FEATS, OUT_FEATS), dtype=jnp.float32) * (
        1.0 / jnp.sqrt(IN_FEATS)
    )
    b = 0.01 * jax.random.normal(k_b, (OUT_FEATS,), dtype=jnp.float32)

    out = layernorm_linear(x, gamma, beta, w, b)
    out = jax.block_until_ready(out)

    ref = _reference(x, gamma, beta, w, b)
    assert out.shape == (1, 14, 14, OUT_FEATS), out.shape
    # bf16 weights / activations with f32 accumulation -> widened tolerance
    # vs the pure-f32 reference (observed max abs err ~1e-2 for O(1) outputs).
    assert jnp.allclose(out, ref, atol=2e-2, rtol=2e-2), (
        "mismatch vs reference; max abs err = "
        f"{float(jnp.max(jnp.abs(out - ref)))}"
    )

    print("KERNEL_OK")
</pallas_src>

<mosaic_0001>
module attributes {stable_mosaic.version = 11 : i64} {
  func.func @_ln_linear_kernel(%arg0: i32, %arg1: memref<256x384xf32, #tpu.memory_space<vmem>>, %arg2: memref<384x1536xbf16, #tpu.memory_space<vmem>>, %arg3: memref<1x1536xf32, #tpu.memory_space<vmem>>, %arg4: memref<256x1536xf32, #tpu.memory_space<vmem>>) attributes {dimension_semantics = [#tpu.dimension_semantics<parallel>], iteration_bounds = array<i64: 1>, scalar_prefetch = 0 : i64, scratch_operands = 0 : i64, tpu.core_type = #tpu.core_type<tc>, window_params = [{transform_indices = @transform_0, window_bounds = array<i64: 256, 384>}, {pipeline_mode = #tpu.pipeline_mode<synchronous>, transform_indices = @transform_1, window_bounds = array<i64: 384, 1536>}, {pipeline_mode = #tpu.pipeline_mode<synchronous>, transform_indices = @transform_2, window_bounds = array<i64: 1, 1536>}, {transform_indices = @transform_3, window_bounds = array<i64: 256, 1536>}]} {
    %c0 = arith.constant 0 : index
    %c0_0 = arith.constant 0 : index
    %0 = vector.load %arg1[%c0, %c0_0] : memref<256x384xf32, #tpu.memory_space<vmem>>, vector<256x384xf32>
    %cst = arith.constant dense<0.000000e+00> : vector<256xf32>
    %1 = vector.multi_reduction <add>, %0, %cst [1] : vector<256x384xf32> to vector<256xf32>
    %2 = vector.shape_cast %1 : vector<256xf32> to vector<256x1xf32>
    %3 = arith.mulf %0, %0 : vector<256x384xf32>
    %cst_1 = arith.constant dense<0.000000e+00> : vector<256xf32>
    %4 = vector.multi_reduction <add>, %3, %cst_1 [1] : vector<256x384xf32> to vector<256xf32>
    %5 = vector.shape_cast %4 : vector<256xf32> to vector<256x1xf32>
    %cst_2 = arith.constant 0.00260416674 : f32
    %6 = vector.broadcast %cst_2 : f32 to vector<256x1xf32>
    %7 = arith.mulf %2, %6 : vector<256x1xf32>
    %cst_3 = arith.constant 0.00260416674 : f32
    %8 = vector.broadcast %cst_3 : f32 to vector<256x1xf32>
    %9 = arith.mulf %5, %8 : vector<256x1xf32>
    %10 = arith.mulf %7, %7 : vector<256x1xf32>
    %11 = arith.subf %9, %10 : vector<256x1xf32>
    %cst_4 = arith.constant 0.000000e+00 : f32
    %12 = vector.broadcast %cst_4 : f32 to vector<256x1xf32>
    %13 = arith.maximumf %11, %12 : vector<256x1xf32>
    %cst_5 = arith.constant 9.99999974E-6 : f32
    %14 = vector.broadcast %cst_5 : f32 to vector<256x1xf32>
    %15 = arith.addf %13, %14 : vector<256x1xf32>
    %16 = math.rsqrt %15 : vector<256x1xf32>
    %17 = vector.broadcast %7 : vector<256x1xf32> to vector<256x384xf32>
    %18 = arith.subf %0, %17 : vector<256x384xf32>
    %19 = vector.broadcast %16 : vector<256x1xf32> to vector<256x384xf32>
    %20 = arith.mulf %18, %19 : vector<256x384xf32>
    %21 = arith.truncf %20 : vector<256x384xf32> to vector<256x384xbf16>
    %c0_6 = arith.constant 0 : index
    %c0_7 = arith.constant 0 : index
    %22 = vector.load %arg2[%c0_6, %c0_7] : memref<384x1536xbf16, #tpu.memory_space<vmem>>, vector<384x1536xbf16>
    %cst_8 = arith.constant dense<0.000000e+00> : vector<256x1536xf32>
    %23 = tpu.matmul %21, %22, %cst_8 {dimension_numbers = #tpu.dot_dimension_numbers<[1], [0], [0], [1], [0, 0, 1, 1], [], []>} : vector<256x384xbf16>, vector<384x1536xbf16>, vector<256x1536xf32> -> vector<256x1536xf32>
    %c0_9 = arith.constant 0 : index
    %c0_10 = arith.constant 0 : index
    %24 = vector.load %arg3[%c0_9, %c0_10] : memref<1x1536xf32, #tpu.memory_space<vmem>>, vector<1x1536xf32>
    %25 = vector.broadcast %24 : vector<1x1536xf32> to vector<256x1536xf32>
    %26 = arith.addf %23, %25 : vector<256x1536xf32>
    %c0_11 = arith.constant 0 : index
    %c0_12 = arith.constant 0 : index
    %27 = vector.load %arg4[%c0_11, %c0_12] : memref<256x1536xf32, #tpu.memory_space<vmem>>, vector<256x1536xf32>
    tpu.vector_store %arg4[%c0_11, %c0_12], %26 {strides = array<i32>} : memref<256x1536xf32, #tpu.memory_space<vmem>>, vector<256x1536xf32>,
    return
  }
  func.func @transform_0(%arg0: i32) -> (i32, i32) {
    %c0_i32 = arith.constant 0 : i32
    %c0_i32_0 = arith.constant 0 : i32
    return %arg0, %c0_i32 : i32, i32
  }
  func.func @transform_1(%arg0: i32) -> (i32, i32) {
    %c0_i32 = arith.constant 0 : i32
    %c0_i32_0 = arith.constant 0 : i32
    %c0_i32_1 = arith.constant 0 : i32
    return %c0_i32, %c0_i32_0 : i32, i32
  }
  func.func @transform_2(%arg0: i32) -> (i32, i32) {
    %c0_i32 = arith.constant 0 : i32
    %c0_i32_0 = arith.constant 0 : i32
    %c0_i32_1 = arith.constant 0 : i32
    return %c0_i32, %c0_i32_0 : i32, i32
  }
  func.func @transform_3(%arg0: i32) -> (i32, i32) {
    %c0_i32 = arith.constant 0 : i32
    %c0_i32_0 = arith.constant 0 : i32
    return %arg0, %c0_i32 : i32, i32
  }
}

</mosaic_0001>

<bundles_post_ra>
// kernel: layernorm_linear.1
= control target key start
LH: loop header
LB: loop body
LE: loop exit
PB: predicated region body
PF: predicated region fallthrough
CT: control target
= control target key end

     0   :  { %s10863_s0 = inlined_call_operand.vmem [shape: f32[256,384], index: 0, kind: input, shape index: {}]   ;;  %s10864_s1 = inlined_call_operand.vmem [shape: bf16[384,1536], index: 1, kind: input, shape index: {}]   ;;  %s10865_s2 = inlined_call_operand.vmem [shape: f32[1,1536], index: 2, kind: input, shape index: {}]   ;;  %s10866_s3 = inlined_call_operand.vmem [shape: f32[256,1536], index: 3, kind: output, shape index: {}]  }
   0x1   :  { %v15_v0 = vld [vmem:[%s10863_s0] sm:$0xff]  ;;  %v16_v1 = vld [vmem:[%s10863_s0 + $0x8] sm:$0xff]  ;;  %v17_v2 = vld [vmem:[%s10863_s0 + $0x10] sm:$0xff] }
   0x2   :  { %v111_v3 = vadd.f32 %v16_v1, %v15_v0  ;;  %v239_v4 = vmul.f32 %v15_v0, %v15_v0  ;;  %v240_v5 = vmul.f32 %v16_v1, %v16_v1  ;;  %v241_v6 = vmul.f32 %v17_v2, %v17_v2  ;;  %v18_v7 = vld [vmem:[%s10863_s0 + $0x18] sm:$0xff]  ;;  %v19_v8 = vld [vmem:[%s10863_s0 + $0x20] sm:$0xff]  ;;  %v20_v9 = vld [vmem:[%s10863_s0 + $0x28] sm:$0xff] }
   0x3   :  { %v115_v10 = vadd.f32 %v19_v8, %v18_v7  ;;  %v242_v11 = vmul.f32 %v18_v7, %v18_v7  ;;  %v243_v12 = vmul.f32 %v19_v8, %v19_v8  ;;  %v21_v13 = vld [vmem:[%s10863_s0 + $0x30] sm:$0xff]  ;;  %v22_v14 = vld [vmem:[%s10863_s0 + $0x38] sm:$0xff]  ;;  %v244_v17 = vmul.f32 %v20_v9, %v20_v9  ;;  %v24_v20 = vld [vmem:[%s10863_s0 + $0x48] sm:$0xff] }
   0x4   :  { %v112_v15 = vadd.f32 %v111_v3, %v17_v2  ;;  %v335_v16 = vadd.f32 %v240_v5, %v239_v4  ;;  %v119_v19 = vadd.f32 %v22_v14, %v21_v13  ;;  %v25_v21 = vld [vmem:[%s10863_s0 + $0x50] sm:$0xff]  ;;  %v245_v24 = vmul.f32 %v21_v13, %v21_v13  ;;  %v23_v26 = vld [vmem:[%s10863_s0 + $0x40] sm:$0xff]  ;;  %v26_v31 = vld [vmem:[%s10863_s0 + $0x58] sm:$0xff] }
   0x5   :  { %v339_v18 = vadd.f32 %v243_v12, %v242_v11  ;;  %v116_v23 = vadd.f32 %v115_v10, %v20_v9  ;;  %v246_v25 = vmul.f32 %v22_v14, %v22_v14  ;;  %v123_v28 = vadd.f32 %v25_v21, %v24_v20  ;;  %v27_v35 = vld [vmem:[%s10863_s0 + $0x60] sm:$0xff]  ;;  %v28_v36 = vld [vmem:[%s10863_s0 + $0x68] sm:$0xff]  ;;  %v30_v40 = vld [vmem:[%s10863_s0 + $0x78] sm:$0xff] }
   0x6   :  { %113 = vadd.xlane.f32.xlu0 %v112_v15  ;;  %v336_v22 = vadd.f32 %v335_v16, %v241_v6  ;;  %v248_v29 = vmul.f32 %v24_v20, %v24_v20  ;;  %v249_v30 = vmul.f32 %v25_v21, %v25_v21  ;;  %v120_v32 = vadd.f32 %v119_v19, %v23_v26  ;;  %v31_v41 = vld [vmem:[%s10863_s0 + $0x80] sm:$0xff]  ;;  %v29_v46 = vld [vmem:[%s10863_s0 + $0x70] sm:$0xff]  ;;  %v32_v51 = vld [vmem:[%s10863_s0 + $0x88] sm:$0xff] }
   0x7   :  { %v340_v27 = vadd.f32 %v339_v18, %v244_v17  ;;  %v247_v33 = vmul.f32 %v23_v26, %v23_v26  ;;  %v343_v34 = vadd.f32 %v246_v25, %v245_v24  ;;  %v124_v37 = vadd.f32 %v123_v28, %v26_v31  ;;  %v33_v55 = vld [vmem:[%s10863_s0 + $0x90] sm:$0xff]  ;;  %v34_v56 = vld [vmem:[%s10863_s0 + $0x98] sm:$0xff]  ;;  %v36_v60 = vld [vmem:[%s10863_s0 + $0xa8] sm:$0xff] }
   0x8   :  { %337 = vadd.xlane.f32.xlu1 %v336_v22  ;;  %v250_v38 = vmul.f32 %v26_v31, %v26_v31  ;;  %v347_v39 = vadd.f32 %v249_v30, %v248_v29  ;;  %v127_v43 = vadd.f32 %v28_v36, %v27_v35  ;;  %v251_v44 = vmul.f32 %v27_v35, %v27_v35  ;;  %v37_v61 = vld [vmem:[%s10863_s0 + $0xb0] sm:$0xff]  ;;  %v35_v2 = vld [vmem:[%s10863_s0 + $0xa0] sm:$0xff]  ;;  %v38_v7 = vld [vmem:[%s10863_s0 + $0xb8] sm:$0xff] }
   0x9   :  { %v344_v42 = vadd.f32 %v343_v34, %v247_v33  ;;  %v252_v45 = vmul.f32 %v28_v36, %v28_v36  ;;  %v131_v48 = vadd.f32 %v31_v41, %v30_v40  ;;  %v254_v49 = vmul.f32 %v30_v40, %v30_v40  ;;  %v39_v11 = vld [vmem:[%s10863_s0 + $0xc0] sm:$0xff]  ;;  %v40_v12 = vld [vmem:[%s10863_s0 + $0xc8] sm:$0xff]  ;;  %v42_v16 = vld [vmem:[%s10863_s0 + $0xd8] sm:$0xff] }
   0xa   :  { %117 = vadd.xlane.f32.xlu0 %v116_v23  ;;  %v348_v47 = vadd.f32 %v347_v39, %v250_v38  ;;  %v255_v50 = vmul.f32 %v31_v41, %v31_v41  ;;  %v128_v52 = vadd.f32 %v127_v43, %v29_v46  ;;  %v253_v53 = vmul.f32 %v29_v46, %v29_v46  ;;  %v43_v17 = vld [vmem:[%s10863_s0 + $0xe0] sm:$0xff]  ;;  %v6482_v23 = vld [vmem:[%s10864_s1 + $0xc] ss:$48 sps:$4 sm:$0xff]   ;;  %v41_v24 = vld [vmem:[%s10863_s0 + $0xd0] sm:$0xff] }
   0xb   :  { %v351_v54 = vadd.f32 %v252_v45, %v251_v44  ;;  %v132_v57 = vadd.f32 %v131_v48, %v32_v51  ;;  %v256_v58 = vmul.f32 %v32_v51, %v32_v51  ;;  %v135_v63 = vadd.f32 %v34_v56, %v33_v55  ;;  %v6480_v18 = vld [vmem:[%s10864_s1 + $0x4] ss:$48 sps:$4 sm:$0xff]   ;;  %v6484_v25 = vld [vmem:[%s10864_s1] ss:$48 sps:$4 sm:$0xff]   ;;  %v44_v30 = vld [vmem:[%s10863_s0 + $0xe8] sm:$0xff]  ;;  %3105 = vmatprep.subr.bf16.mxu1 %v6482_v23 }
   0xc   :  { %341 = vadd.xlane.f32.xlu1 %v340_v27  ;;  %v355_v59 = vadd.f32 %v255_v50, %v254_v49  ;;  %v257_v0 = vmul.f32 %v33_v55, %v33_v55  ;;  %v258_v1 = vmul.f32 %v34_v56, %v34_v56  ;;  %v139_v4 = vadd.f32 %v37_v61, %v36_v60  ;;  %v6485_v31 = vld [vmem:[%s10864_s1 + $0x8] ss:$48 sps:$4 sm:$0xff]   ;;  %v45_v35 = vld [vmem:[%s10863_s0 + $0xf0] sm:$0xff]  ;;  %v6488_v43 = vld [vmem:[%s10864_s1 + $0x6c] ss:$48 sps:$4 sm:$0xff]  }
   0xd   :  { %v352_v62 = vadd.f32 %v351_v54, %v253_v53  ;;  %v260_v5 = vmul.f32 %v36_v60, %v36_v60  ;;  %v261_v6 = vmul.f32 %v37_v61, %v37_v61  ;;  %v136_v8 = vadd.f32 %v135_v63, %v35_v2  ;;  %2719 = vmatprep.subr.bf16.mxu0 %v6480_v18  ;;  %v46_v36 = vld [vmem:[%s10863_s0 + $0xf8] sm:$0xff]  ;;  %v6486_v38 = vld [vmem:[%s10864_s1 + $0x64] ss:$48 sps:$4 sm:$0xff]   ;;  %v6490_v49 = vld [vmem:[%s10864_s1 + $0x60] ss:$48 sps:$4 sm:$0xff]  }
   0xe   :  { %121 = vadd.xlane.f32.xlu0 %v120_v32  ;;  %v356_v3 = vadd.f32 %v355_v59, %v256_v58  ;;  %v259_v9 = vmul.f32 %v35_v2, %v35_v2  ;;  %v359_v10 = vadd.f32 %v258_v1, %v257_v0  ;;  %v140_v13 = vadd.f32 %v139_v4, %v38_v7  ;;  %v47_v45 = vld [vmem:[%s10863_s0 + $0x100] sm:$0xff]  ;;  %v50_v54 = vld [vmem:[%s10863_s0 + $0x118] sm:$0xff]  ;;  %v52_v60 = vld [vmem:[%s10863_s0 + $0x128] sm:$0xff] }
   0xf   :  { %v262_v14 = vmul.f32 %v38_v7, %v38_v7  ;;  %v363_v15 = vadd.f32 %v261_v6, %v260_v5  ;;  %v143_v20 = vadd.f32 %v40_v12, %v39_v11  ;;  %v263_v21 = vmul.f32 %v39_v11, %v39_v11  ;;  %2720 = vmatpush1.bf16.msra.mxu0 %v6484_v25  ;;  %v6491_v55 = vld [vmem:[%s10864_s1 + $0x68] ss:$48 sps:$4 sm:$0xff]   ;;  %v51_v59 = vld [vmem:[%s10863_s0 + $0x120] sm:$0xff]  ;;  %v53_v2 = vld [vmem:[%s10863_s0 + $0x130] sm:$0xff] }
  0x10   :  { %125 = vadd.xlane.f32.xlu1 %v124_v37  ;;  %v360_v19 = vadd.f32 %v359_v10, %v259_v9  ;;  %v264_v22 = vmul.f32 %v40_v12, %v40_v12  ;;  %v147_v27 = vadd.f32 %v43_v17, %v42_v16  ;;  %v266_v28 = vmul.f32 %v42_v16, %v42_v16  ;;  %v48_v37 = vld [vmem:[%s10863_s0 + $0x108] sm:$0xff]  ;;  %v6492_v61 = vld [vmem:[%s10864_s1 + $0xc4] ss:$48 sps:$4 sm:$0xff]   ;;  %v54_v1 = vld [vmem:[%s10863_s0 + $0x138] sm:$0xff] }
  0x11   :  { %v364_v26 = vadd.f32 %v363_v15, %v262_v14  ;;  %v267_v29 = vmul.f32 %v43_v17, %v43_v17  ;;  %v144_v32 = vadd.f32 %v143_v20, %v41_v24  ;;  %v265_v33 = vmul.f32 %v41_v24, %v41_v24  ;;  %3106 = vmatpush1.bf16.msra.mxu1 %v6485_v31  ;;  %v6494_v4 = vld [vmem:[%s10864_s1 + $0xcc] ss:$48 sps:$4 sm:$0xff]   ;;  %v6496_v9 = vld [vmem:[%s10864_s1 + $0xc0] ss:$48 sps:$4 sm:$0xff]   ;;  %v6497_v10 = vld [vmem:[%s10864_s1 + $0xc8] ss:$48 sps:$4 sm:$0xff]  }
  0x12   :  { %345 = vadd.xlane.f32.xlu0 %v344_v42  ;;  %v367_v34 = vadd.f32 %v264_v22, %v263_v21  ;;  %v148_v39 = vadd.f32 %v147_v27, %v44_v30  ;;  %v268_v40 = vmul.f32 %v44_v30, %v44_v30  ;;  %v49_v42 = vld [vmem:[%s10863_s0 + $0x110] sm:$0xff]  ;;  %v151_v46 = vadd.f32 %v46_v36, %v45_v35  ;;  %v56_v12 = vld [vmem:[%s10863_s0 + $0x148] sm:$0xff]  ;;  %v58_v17 = vld [vmem:[%s10863_s0 + $0x158] sm:$0xff] }
  0x13   :  { %v371_v41 = vadd.f32 %v267_v29, %v266_v28  ;;  %v270_v48 = vmul.f32 %v46_v36, %v46_v36  ;;  %2721 = vmatprep.subr.bf16.mxu0 %v6486_v38  ;;  %v155_v51 = vadd.f32 %v49_v42, %v48_v37  ;;  %v273_v53 = vmul.f32 %v49_v42, %v49_v42  ;;  %v57_v16 = vld [vmem:[%s10863_s0 + $0x150] sm:$0xff]  ;;  %v60_v22 = vld [vmem:[%s10863_s0 + $0x168] sm:$0xff]  ;;  %v59_v31 = vld [vmem:[%s10863_s0 + $0x160] sm:$0xff] }
  0x14   :  { %349 = vadd.xlane.f32.xlu1 %v348_v47  ;;  %v368_v44 = vadd.f32 %v367_v34, %v265_v33  ;;  %v269_v47 = vmul.f32 %v45_v35, %v45_v35  ;;  %3107 = vmatprep.subr.bf16.mxu1 %v6488_v43  ;;  %v152_v56 = vadd.f32 %v151_v46, %v47_v45  ;;  %v6498_v18 = vld [vmem:[%s10864_s1 + $0x124] ss:$48 sps:$4 sm:$0xff]   ;;  %v6500_v24 = vld [vmem:[%s10864_s1 + $0x12c] ss:$48 sps:$4 sm:$0xff]   ;;  %v6502_v25 = vld [vmem:[%s10864_s1 + $0x120] ss:$48 sps:$4 sm:$0xff]  }
  0x15   :  { %v372_v50 = vadd.f32 %v371_v41, %v268_v40  ;;  %2722 = vmatpush1.bf16.msra.mxu0 %v6490_v49  ;;  %v274_v63 = vmul.f32 %v50_v54, %v50_v54  ;;  %3108 = vmatpush1.bf16.msra.mxu1 %v6491_v55  ;;  %v159_v6 = vadd.f32 %v52_v60, %v51_v59  ;;  %v61_v23 = vld [vmem:[%s10863_s0 + $0x170] sm:$0xff]  ;;  %v6506_v33 = vld [vmem:[%s10864_s1 + $0x18c] ss:$48 sps:$4 sm:$0xff]  }
  0x16   :  { %129 = vadd.xlane.f32.xlu0 %v128_v52  ;;  %v272_v52 = vmul.f32 %v48_v37, %v48_v37  ;;  %v375_v58 = vadd.f32 %v270_v48, %v269_v47  ;;  %v275_v7 = vmul.f32 %v51_v59, %v51_v59  ;;  %2723 = vmatprep.subr.bf16.mxu0 %v6492_v61  ;;  %v6504_v30 = vld [vmem:[%s10864_s1 + $0x184] ss:$48 sps:$4 sm:$0xff]   ;;  %v6508_v37 = vld [vmem:[%s10864_s1 + $0x180] ss:$48 sps:$4 sm:$0xff]   ;;  %v62_v41 = vld [vmem:[%s10863_s0 + $0x178] sm:$0xff] }
  0x17   :  { %v278_v14 = vmul.f32 %v54_v1, %v54_v1  ;;  %3109 = vmatprep.subr.bf16.mxu1 %v6494_v4  ;;  %v277_v20 = vmul.f32 %v53_v2, %v53_v2  ;;  %v280_v28 = vmul.f32 %v56_v12, %v56_v12  ;;  %v281_v35 = vmul.f32 %v57_v16, %v57_v16  ;;  %v64_v46 = vld [vmem:[%s10863_s0 + $0x188] sm:$0xff]  ;;  %v65_v59 = vld [vmem:[%s10863_s0 + $0x190] sm:$0xff] }
  0x18   :  { %133 = vadd.xlane.f32.xlu1 %v132_v57  ;;  %v271_v57 = vmul.f32 %v47_v45, %v47_v45  ;;  %v379_v0 = vadd.f32 %v273_v53, %v272_v52  ;;  %v282_v36 = vmul.f32 %v58_v17, %v58_v17  ;;  %v171_v38 = vadd.f32 %v61_v23, %v60_v22  ;;  %v63_v45 = vld [vmem:[%s10863_s0 + $0x180] sm:$0xff]  ;;  %v6512_v47 = vld [vmem:[%s10864_s1 + $0x1ec] ss:$48 sps:$4 sm:$0xff]  }
  0x19   :  { %2724 = vmatpush1.bf16.msra.mxu0 %v6496_v9  ;;  %3110 = vmatpush1.bf16.msra.mxu1 %v6497_v10  ;;  %v284_v42 = vmul.f32 %v60_v22, %v60_v22  ;;  %v285_v43 = vmul.f32 %v61_v23, %v61_v23  ;;  %v283_v49 = vmul.f32 %v59_v31, %v59_v31  ;;  %v67_v52 = vld [vmem:[%s10863_s0 + $0x1a0] sm:$0xff]  ;;  %v69_v9 = vld [vmem:[%s10863_s0 + $0x1b0] sm:$0xff]  ;;  %v70_v10 = vld [vmem:[%s10863_s0 + $0x1b8] sm:$0xff] }
  0x1a   :  { %353 = vadd.xlane.f32.xlu0 %v352_v62  ;;  %v156_v62 = vadd.f32 %v155_v51, %v50_v54  ;;  %v376_v5 = vadd.f32 %v375_v58, %v271_v57  ;;  %v380_v11 = vadd.f32 %v379_v0, %v274_v63  ;;  %2725 = vmatprep.subr.bf16.mxu0 %v6498_v18  ;;  %v66_v51 = vld [vmem:[%s10863_s0 + $0x198] sm:$0xff]  ;;  %v6514_v53 = vld [vmem:[%s10864_s1 + $0x1e0] ss:$48 sps:$4 sm:$0xff]   ;;  %v6516_v58 = vld [vmem:[%s10864_s1 + $0x244] ss:$48 sps:$4 sm:$0xff]  }
  0x1b   :  { %3111 = vmatprep.subr.bf16.mxu1 %v6500_v24  ;;  %v6515_v54 = vld [vmem:[%s10864_s1 + $0x1e8] ss:$48 sps:$4 sm:$0xff]   ;;  %v172_v55 = vadd.f32 %v171_v38, %v62_v41  ;;  %v395_v57 = vadd.f32 %v285_v43, %v284_v42  ;;  %v287_v63 = vmul.f32 %v63_v45, %v63_v45  ;;  %v288_v0 = vmul.f32 %v64_v46, %v64_v46  ;;  %v6528_v22 = vld [vmem:[%s10864_s1 + $0x304] ss:$48 sps:$4 sm:$0xff]   ;;  %v6530_v24 = vld [vmem:[%s10864_s1 + $0x30c] ss:$48 sps:$4 sm:$0xff]  }
  0x1c   :  { %357 = vadd.xlane.f32.xlu1 %v356_v3  ;;  %v55_v3 = vld [vmem:[%s10863_s0 + $0x140] sm:$0xff]  ;;  %v6527_v18 = vld [vmem:[%s10864_s1 + $0x2a8] ss:$48 sps:$4 sm:$0xff]  }
  0x1d   :  { %v279_v15 = vmul.f32 %v55_v3, %v55_v3  ;;  %2726 = vmatpush1.bf16.msra.mxu0 %v6502_v25  ;;  %v71_v23 = vld [vmem:[%s10863_s0 + $0x1c0] sm:$0xff]  ;;  %v76_v38 = vld [vmem:[%s10863_s0 + $0x1e8] sm:$0xff]  ;;  %v78_v43 = vld [vmem:[%s10863_s0 + $0x1f8] sm:$0xff] }
  0x1e   :  { %137 = vadd.xlane.f32.xlu0 %v136_v8  ;;  %v276_v8 = vmul.f32 %v52_v60, %v52_v60  ;;  %2727 = vmatprep.subr.bf16.mxu0 %v6504_v30  ;;  %v6518_v60 = vld [vmem:[%s10864_s1 + $0x24c] ss:$48 sps:$4 sm:$0xff]  }
  0x1f   :  { %v387_v29 = vadd.f32 %v279_v15, %v278_v14  ;;  %v399_v14 = vadd.f32 %v288_v0, %v287_v63  ;;  %v72_v15 = vld [vmem:[%s10863_s0 + $0x1c8] sm:$0xff]  ;;  %v6546_v0 = vld [vmem:[%s10864_s1 + $0x424] ss:$48 sps:$4 sm:$0xff]  }
  0x20   :  { %141 = vadd.xlane.f32.xlu1 %v140_v13  ;;  %v163_v13 = vadd.f32 %v55_v3, %v54_v1  ;;  %v383_v21 = vadd.f32 %v276_v8, %v275_v7  ;;  %v6520_v1 = vld [vmem:[%s10864_s1 + $0x240] ss:$48 sps:$4 sm:$0xff]   ;;  %v6521_v3 = vld [vmem:[%s10864_s1 + $0x248] ss:$48 sps:$4 sm:$0xff]   ;;  %v291_v7 = vmul.f32 %v67_v52, %v67_v52  ;;  %v6522_v8 = vld [vmem:[%s10864_s1 + $0x2a4] ss:$48 sps:$4 sm:$0xff]  }
  0x21   :  { %v388_v40 = vadd.f32 %v387_v29, %v280_v28  ;;  %2728 = vmatpush1.bf16.msra.mxu0 %v6508_v37  ;;  %v294_v28 = vmul.f32 %v70_v10, %v70_v10  ;;  %v6532_v29 = vld [vmem:[%s10864_s1 + $0x300] ss:$48 sps:$4 sm:$0xff]  }
  0x22   :  { %361 = vadd.xlane.f32.xlu0 %v360_v19  ;;  %v160_v19 = vadd.f32 %v159_v6, %v53_v2  ;;  %v164_v27 = vadd.f32 %v163_v13, %v56_v12  ;;  %v384_v34 = vadd.f32 %v383_v21, %v277_v20  ;;  %v179_v2 = vadd.f32 %v67_v52, %v66_v51  ;;  %v75_v37 = vld [vmem:[%s10863_s0 + $0x1e0] sm:$0xff] }
  0x23   :  { %v290_v6 = vmul.f32 %v66_v51, %v66_v51  ;;  %v289_v13 = vmul.f32 %v65_v59, %v65_v59  ;;  %v6542_v51 = vld [vmem:[%s10864_s1 + $0x3cc] ss:$48 sps:$4 sm:$0xff]  }
  0x24   :  { %365 = vadd.xlane.f32.xlu1 %v364_v26  ;;  %v6503_v26 = vld [vmem:[%s10864_s1 + $0x128] ss:$48 sps:$4 sm:$0xff]  }
  0x25   :  { %3112 = vmatpush1.bf16.msra.mxu1 %v6503_v26  ;;  %v403_v21 = vadd.f32 %v291_v7, %v290_v6  ;;  %v400_v25 = vadd.f32 %v399_v14, %v289_v13  ;;  %v183_v26 = vadd.f32 %v70_v10, %v69_v9  ;;  %v85_v10 = vld [vmem:[%s10863_s0 + $0x230] sm:$0xff] }
  0x26   :  { %145 = vadd.xlane.f32.xlu0 %v144_v32  ;;  %v167_v32 = vadd.f32 %v58_v17, %v57_v16  ;;  %3113 = vmatprep.subr.bf16.mxu1 %v6506_v33  ;;  %v73_v16 = vld [vmem:[%s10863_s0 + $0x1d0] sm:$0xff]  ;;  %v74_v33 = vld [vmem:[%s10863_s0 + $0x1d8] sm:$0xff] }
  0x27   :  { %v6526_v17 = vld [vmem:[%s10864_s1 + $0x2a0] ss:$48 sps:$4 sm:$0xff]   ;;  %v187_v30 = vadd.f32 %v73_v16, %v72_v15 }
  0x28   :  { %149 = vadd.xlane.f32.xlu1 %v148_v39  ;;  %v6509_v39 = vld [vmem:[%s10864_s1 + $0x188] ss:$48 sps:$4 sm:$0xff]   ;;  %v168_v48 = vadd.f32 %v167_v32, %v59_v31 }
  0x29   :  { %3114 = vmatpush1.bf16.msra.mxu1 %v6509_v39  ;;  %v6533_v31 = vld [vmem:[%s10864_s1 + $0x308] ss:$48 sps:$4 sm:$0xff]   ;;  %v6536_v39 = vld [vmem:[%s10864_s1 + $0x36c] ss:$48 sps:$4 sm:$0xff]  }
  0x2a   :  { %369 = vadd.xlane.f32.xlu0 %v368_v44  ;;  %v6510_v44 = vld [vmem:[%s10864_s1 + $0x1e4] ss:$48 sps:$4 sm:$0xff]   ;;  %3115 = vmatprep.subr.bf16.mxu1 %v6512_v47  ;;  %v298_v47 = vmul.f32 %v74_v33, %v74_v33 }
  0x2b   :  { %2729 = vmatprep.subr.bf16.mxu0 %v6510_v44  ;;  %v6538_v44 = vld [vmem:[%s10864_s1 + $0x360] ss:$48 sps:$4 sm:$0xff]  }
  0x2c   :  { %373 = vadd.xlane.f32.xlu1 %v372_v50  ;;  %v391_v50 = vadd.f32 %v282_v36, %v281_v35  ;;  %2730 = vmatpush1.bf16.msra.mxu0 %v6514_v53  ;;  %v297_v35 = vmul.f32 %v73_v16, %v73_v16  ;;  %v6534_v36 = vld [vmem:[%s10864_s1 + $0x364] ss:$48 sps:$4 sm:$0xff]  }
  0x2d   :  { %3116 = vmatpush1.bf16.msra.mxu1 %v6515_v54  ;;  %2731 = vmatprep.subr.bf16.mxu0 %v6516_v58  ;;  %v77_v53 = vld [vmem:[%s10863_s0 + $0x1f0] sm:$0xff]  ;;  %v191_v54 = vadd.f32 %v76_v38, %v75_v37  ;;  %v83_v16 = vld [vmem:[%s10863_s0 + $0x220] sm:$0xff] }
  0x2e   :  { %153 = vadd.xlane.f32.xlu0 %v152_v56  ;;  %v286_v56 = vmul.f32 %v62_v41, %v62_v41  ;;  %v392_v61 = vadd.f32 %v391_v50, %v283_v49  ;;  %3117 = vmatprep.subr.bf16.mxu1 %v6518_v60  ;;  %v295_v41 = vmul.f32 %v71_v23, %v71_v23  ;;  %v79_v49 = vld [vmem:[%s10863_s0 + $0x200] sm:$0xff]  ;;  %v6545_v60 = vld [vmem:[%s10864_s1 + $0x3c8] ss:$48 sps:$4 sm:$0xff]  }
  0x2f   :  { %v6540_v50 = vld [vmem:[%s10864_s1 + $0x3c4] ss:$48 sps:$4 sm:$0xff]   ;;  %v195_v58 = vadd.f32 %v79_v49, %v78_v43  ;;  %v303_v63 = vmul.f32 %v79_v49, %v79_v49  ;;  %v192_v6 = vadd.f32 %v191_v54, %v77_v53  ;;  %v301_v7 = vmul.f32 %v77_v53, %v77_v53  ;;  %v6572_v54 = vld [vmem:[%s10864_s1 + $0x5ac] ss:$48 sps:$4 sm:$0xff]  }
  0x30   :  { %157 = vadd.xlane.f32.xlu1 %v156_v62  ;;  %v175_v62 = vadd.f32 %v64_v46, %v63_v45  ;;  %v396_v4 = vadd.f32 %v395_v57, %v286_v56  ;;  %2732 = vmatpush1.bf16.msra.mxu0 %v6520_v1  ;;  %v6539_v45 = vld [vmem:[%s10864_s1 + $0x368] ss:$48 sps:$4 sm:$0xff]   ;;  %v188_v46 = vadd.f32 %v187_v30, %v74_v33  ;;  %v6548_v1 = vld [vmem:[%s10864_s1 + $0x42c] ss:$48 sps:$4 sm:$0xff]   ;;  %v87_v30 = vld [vmem:[%s10863_s0 + $0x240] sm:$0xff] }
  0x31   :  { %3118 = vmatpush1.bf16.msra.mxu1 %v6521_v3  ;;  %2733 = vmatprep.subr.bf16.mxu0 %v6522_v8  ;;  %v300_v56 = vmul.f32 %v76_v38, %v76_v38  ;;  %v80_v57 = vld [vmem:[%s10863_s0 + $0x208] sm:$0xff]  ;;  %v82_v3 = vld [vmem:[%s10863_s0 + $0x218] sm:$0xff]  ;;  %v307_v33 = vmul.f32 %v83_v16, %v83_v16  ;;  %v311_v49 = vmul.f32 %v87_v30, %v87_v30 }
  0x32   :  { %377 = vadd.xlane.f32.xlu0 %v376_v5  ;;  %v68_v5 = vld [vmem:[%s10863_s0 + $0x1a8] sm:$0xff]  ;;  %v176_v12 = vadd.f32 %v175_v62, %v65_v59  ;;  %v6544_v59 = vld [vmem:[%s10864_s1 + $0x3c0] ss:$48 sps:$4 sm:$0xff]   ;;  %v302_v62 = vmul.f32 %v78_v43, %v78_v43  ;;  %v196_v13 = vadd.f32 %v195_v58, %v80_v57  ;;  %v304_v14 = vmul.f32 %v80_v57, %v80_v57 }
  0x33   :  { %v292_v20 = vmul.f32 %v68_v5, %v68_v5  ;;  %v6563_v38 = vld [vmem:[%s10864_s1 + $0x4e8] ss:$48 sps:$4 sm:$0xff]   ;;  %v93_v58 = vld [vmem:[%s10863_s0 + $0x270] sm:$0xff] }
  0x34   :  { %381 = vadd.xlane.f32.xlu1 %v380_v11  ;;  %v6524_v11 = vld [vmem:[%s10864_s1 + $0x2ac] ss:$48 sps:$4 sm:$0xff]   ;;  %2734 = vmatpush1.bf16.msra.mxu0 %v6526_v17  ;;  %v6556_v17 = vld [vmem:[%s10864_s1 + $0x480] ss:$48 sps:$4 sm:$0xff]  }
  0x35   :  { %3119 = vmatprep.subr.bf16.mxu1 %v6524_v11  ;;  %v404_v32 = vadd.f32 %v403_v21, %v292_v20  ;;  %2735 = vmatprep.subr.bf16.mxu0 %v6528_v22  ;;  %v6552_v11 = vld [vmem:[%s10864_s1 + $0x484] ss:$48 sps:$4 sm:$0xff]   ;;  %v306_v22 = vmul.f32 %v82_v3, %v82_v3 }
  0x36   :  { %161 = vadd.xlane.f32.xlu0 %v160_v19  ;;  %v180_v19 = vadd.f32 %v179_v2, %v68_v5  ;;  %3120 = vmatpush1.bf16.msra.mxu1 %v6527_v18  ;;  %v81_v2 = vld [vmem:[%s10863_s0 + $0x210] sm:$0xff]  ;;  %v6551_v5 = vld [vmem:[%s10864_s1 + $0x428] ss:$48 sps:$4 sm:$0xff]  }
  0x37   :  { %3121 = vmatprep.subr.bf16.mxu1 %v6530_v24  ;;  %v6557_v18 = vld [vmem:[%s10864_s1 + $0x488] ss:$48 sps:$4 sm:$0xff]   ;;  %v199_v20 = vadd.f32 %v82_v3, %v81_v2  ;;  %v305_v21 = vmul.f32 %v81_v2, %v81_v2  ;;  %v97_v2 = vld [vmem:[%s10863_s0 + $0x290] sm:$0xff] }
  0x38   :  { %165 = vadd.xlane.f32.xlu1 %v164_v27  ;;  %v293_v27 = vmul.f32 %v69_v9, %v69_v9  ;;  %2736 = vmatpush1.bf16.msra.mxu0 %v6532_v29  ;;  %v84_v9 = vld [vmem:[%s10863_s0 + $0x228] sm:$0xff]  ;;  %v86_v24 = vld [vmem:[%s10863_s0 + $0x238] sm:$0xff]  ;;  %v309_v29 = vmul.f32 %v85_v10, %v85_v10  ;;  %v6578_v3 = vld [vmem:[%s10864_s1 + $0x604] ss:$48 sps:$4 sm:$0xff]  }
  0x39   :  { %2737 = vmatprep.subr.bf16.mxu0 %v6534_v36  ;;  %v91_v36 = vld [vmem:[%s10863_s0 + $0x260] sm:$0xff] }
  0x3a   :  { %385 = vadd.xlane.f32.xlu0 %v384_v34  ;;  %v296_v34 = vmul.f32 %v72_v15, %v72_v15  ;;  %v407_v42 = vadd.f32 %v294_v28, %v293_v27  ;;  %3122 = vmatpush1.bf16.msra.mxu1 %v6533_v31  ;;  %v419_v15 = vadd.f32 %v303_v63, %v302_v62  ;;  %v88_v31 = vld [vmem:[%s10863_s0 + $0x248] sm:$0xff] }
  0x3b   :  { %3123 = vmatprep.subr.bf16.mxu1 %v6536_v39  ;;  %v308_v28 = vmul.f32 %v84_v9, %v84_v9  ;;  %v6564_v39 = vld [vmem:[%s10864_s1 + $0x544] ss:$48 sps:$4 sm:$0xff]   ;;  %v315_v57 = vmul.f32 %v91_v36, %v91_v36 }
  0x3c   :  { %389 = vadd.xlane.f32.xlu1 %v388_v40  ;;  %v184_v40 = vadd.f32 %v183_v26, %v71_v23  ;;  %v408_v52 = vadd.f32 %v407_v42, %v295_v41  ;;  %2738 = vmatpush1.bf16.msra.mxu0 %v6538_v44  ;;  %v6558_v23 = vld [vmem:[%s10864_s1 + $0x4e4] ss:$48 sps:$4 sm:$0xff]   ;;  %v6560_v26 = vld [vmem:[%s10864_s1 + $0x4ec] ss:$48 sps:$4 sm:$0xff]   ;;  %v420_v27 = vadd.f32 %v419_v15, %v304_v14 }
  0x3d   :  { %2739 = vmatprep.subr.bf16.mxu0 %v6540_v50  ;;  %v310_v42 = vmul.f32 %v86_v24, %v86_v24  ;;  %v427_v43 = vadd.f32 %v309_v29, %v308_v28  ;;  %v89_v44 = vld [vmem:[%s10863_s0 + $0x250] sm:$0xff]  ;;  %v312_v50 = vmul.f32 %v88_v31, %v88_v31 }
  0x3e   :  { %169 = vadd.xlane.f32.xlu0 %v168_v48  ;;  %v411_v48 = vadd.f32 %v297_v35, %v296_v34  ;;  %3124 = vmatpush1.bf16.msra.mxu1 %v6539_v45  ;;  %v423_v34 = vadd.f32 %v306_v22, %v305_v21  ;;  %v90_v35 = vld [vmem:[%s10863_s0 + $0x258] sm:$0xff]  ;;  %v6568_v45 = vld [vmem:[%s10864_s1 + $0x540] ss:$48 sps:$4 sm:$0xff]   ;;  %v313_v63 = vmul.f32 %v89_v44, %v89_v44  ;;  %v100_v22 = vld [vmem:[%s10863_s0 + $0x2a8] sm:$0xff] }
  0x3f   :  { %3125 = vmatprep.subr.bf16.mxu1 %v6542_v51  ;;  %v6570_v51 = vld [vmem:[%s10864_s1 + $0x5a4] ss:$48 sps:$4 sm:$0xff]   ;;  %v211_v53 = vadd.f32 %v91_v36, %v90_v35 }
  0x40   :  { %173 = vadd.xlane.f32.xlu1 %v172_v55  ;;  %v299_v55 = vmul.f32 %v75_v37, %v75_v37  ;;  %2740 = vmatpush1.bf16.msra.mxu0 %v6544_v59  ;;  %v6562_v37 = vld [vmem:[%s10864_s1 + $0x4e0] ss:$48 sps:$4 sm:$0xff]   ;;  %v94_v59 = vld [vmem:[%s10863_s0 + $0x278] sm:$0xff] }
  0x41   :  { %2741 = vmatprep.subr.bf16.mxu0 %v6546_v0  ;;  %v431_v0 = vadd.f32 %v312_v50, %v311_v49  ;;  %v99_v21 = vld [vmem:[%s10863_s0 + $0x2a0] sm:$0xff]  ;;  %v101_v28 = vld [vmem:[%s10863_s0 + $0x2b0] sm:$0xff] }
  0x42   :  { %393 = vadd.xlane.f32.xlu0 %v392_v61  ;;  %v412_v61 = vadd.f32 %v411_v48, %v298_v47  ;;  %v415_v8 = vadd.f32 %v300_v56, %v299_v55  ;;  %3126 = vmatpush1.bf16.msra.mxu1 %v6545_v60  ;;  %v424_v47 = vadd.f32 %v423_v34, %v307_v33  ;;  %v6574_v60 = vld [vmem:[%s10864_s1 + $0x5a0] ss:$48 sps:$4 sm:$0xff]   ;;  %v104_v33 = vld [vmem:[%s10863_s0 + $0x2c8] sm:$0xff] }
  0x43   :  { %3127 = vmatprep.subr.bf16.mxu1 %v6548_v1  ;;  %v207_v48 = vadd.f32 %v88_v31, %v87_v30  ;;  %v428_v55 = vadd.f32 %v427_v43, %v310_v42  ;;  %v314_v56 = vmul.f32 %v90_v35, %v90_v35  ;;  %v96_v1 = vld [vmem:[%s10863_s0 + $0x288] sm:$0xff]  ;;  %v223_v30 = vadd.f32 %v100_v22, %v99_v21 }
  0x44   :  { %397 = vadd.xlane.f32.xlu1 %v396_v4  ;;  %v6550_v4 = vld [vmem:[%s10864_s1 + $0x420] ss:$48 sps:$4 sm:$0xff]   ;;  %v219_v14 = vadd.f32 %v97_v2, %v96_v1  ;;  %v323_v31 = vmul.f32 %v99_v21, %v99_v21  ;;  %v108_v43 = vld [vmem:[%s10863_s0 + $0x2e8] sm:$0xff] }
  0x45   :  { %2742 = vmatpush1.bf16.msra.mxu0 %v6550_v4  ;;  %v208_v62 = vadd.f32 %v207_v48, %v89_v44  ;;  %v6581_v4 = vld [vmem:[%s10864_s1 + $0x60c] ss:$48 sps:$4 sm:$0xff]   ;;  %v109_v44 = vld [vmem:[%s10863_s0 + $0x2f0] sm:$0xff]  ;;  %v107_v48 = vld [vmem:[%s10863_s0 + $0x2e0] sm:$0xff] }
  0x46   :  { %177 = vadd.xlane.f32.xlu0 %v176_v12  ;;  %v6554_v12 = vld [vmem:[%s10864_s1 + $0x48c] ss:$48 sps:$4 sm:$0xff]   ;;  %3128 = vmatpush1.bf16.msra.mxu1 %v6551_v5 }
  0x47   :  { %2743 = vmatprep.subr.bf16.mxu0 %v6552_v11  ;;  %3129 = vmatprep.subr.bf16.mxu1 %v6554_v12  ;;  %v317_v11 = vmul.f32 %v93_v58, %v93_v58  ;;  %v318_v12 = vmul.f32 %v94_v59, %v94_v59 }
  0x48   :  { %181 = vadd.xlane.f32.xlu1 %v180_v19  ;;  %v416_v19 = vadd.f32 %v415_v8, %v301_v7  ;;  %v435_v7 = vadd.f32 %v315_v57, %v314_v56  ;;  %v95_v8 = vld [vmem:[%s10863_s0 + $0x280] sm:$0xff]  ;;  %v332_v56 = vmul.f32 %v108_v43, %v108_v43  ;;  %v333_v57 = vmul.f32 %v109_v44, %v109_v44 }
  0x49   :  { %2744 = vmatpush1.bf16.msra.mxu0 %v6556_v17  ;;  %v321_v17 = vmul.f32 %v97_v2, %v97_v2 }
  0x4a   :  { %401 = vadd.xlane.f32.xlu0 %v400_v25  ;;  %v203_v25 = vadd.f32 %v85_v10, %v84_v9  ;;  %3130 = vmatpush1.bf16.msra.mxu1 %v6557_v18  ;;  %v432_v9 = vadd.f32 %v431_v0, %v313_v63  ;;  %v215_v10 = vadd.f32 %v94_v59, %v93_v58 }
  0x4b   :  { %2745 = vmatprep.subr.bf16.mxu0 %v6558_v23  ;;  %3131 = vmatprep.subr.bf16.mxu1 %v6560_v26  ;;  %v102_v23 = vld [vmem:[%s10863_s0 + $0x2b8] sm:$0xff]  ;;  %v331_v59 = vmul.f32 %v107_v48, %v107_v48  ;;  %v459_v63 = vadd.f32 %v333_v57, %v332_v56 }
  0x4c   :  { %405 = vadd.xlane.f32.xlu1 %v404_v32  ;;  %v200_v32 = vadd.f32 %v199_v20, %v83_v16  ;;  %v204_v41 = vadd.f32 %v203_v25, %v86_v24  ;;  %v320_v16 = vmul.f32 %v96_v1, %v96_v1  ;;  %v216_v18 = vadd.f32 %v215_v10, %v95_v8  ;;  %v103_v24 = vld [vmem:[%s10863_s0 + $0x2c0] sm:$0xff] }
  0x4d   :  { %2746 = vmatpush1.bf16.msra.mxu0 %v6562_v37  ;;  %v439_v20 = vadd.f32 %v318_v12, %v317_v11  ;;  %v227_v35 = vadd.f32 %v103_v24, %v102_v23  ;;  %v326_v36 = vmul.f32 %v102_v23, %v102_v23  ;;  %v327_v37 = vmul.f32 %v103_v24, %v103_v24 }
  0x4e   :  { %185 = vadd.xlane.f32.xlu0 %v184_v40  ;;  %v6566_v40 = vld [vmem:[%s10864_s1 + $0x54c] ss:$48 sps:$4 sm:$0xff]   ;;  %3132 = vmatpush1.bf16.msra.mxu1 %v6563_v38  ;;  %v105_v38 = vld [vmem:[%s10863_s0 + $0x2d0] sm:$0xff] }
  0x4f   :  { %2747 = vmatprep.subr.bf16.mxu0 %v6564_v39  ;;  %3133 = vmatprep.subr.bf16.mxu1 %v6566_v40  ;;  %v106_v39 = vld [vmem:[%s10863_s0 + $0x2d8] sm:$0xff]  ;;  %v224_v40 = vadd.f32 %v223_v30, %v101_v28 }
  0x50   :  { %189 = vadd.xlane.f32.xlu1 %v188_v46  ;;  %v6569_v46 = vld [vmem:[%s10864_s1 + $0x548] ss:$48 sps:$4 sm:$0xff]   ;;  %v231_v50 = vadd.f32 %v106_v39, %v105_v38 }
  0x51   :  { %2748 = vmatpush1.bf16.msra.mxu0 %v6568_v45  ;;  %v228_v45 = vadd.f32 %v227_v35, %v104_v33 }
  0x52   :  { %409 = vadd.xlane.f32.xlu0 %v408_v52  ;;  %v92_v52 = vld [vmem:[%s10863_s0 + $0x268] sm:$0xff]  ;;  %3134 = vmatpush1.bf16.msra.mxu1 %v6569_v46  ;;  %v328_v46 = vmul.f32 %v104_v33, %v104_v33  ;;  %v232_v58 = vadd.f32 %v231_v50, %v107_v48  ;;  %v6977_v48 = vld [vmem:[%s10863_s0] sm:$0xff] }
  0x53   :  { %v212_v5 = vadd.f32 %v211_v53, %v92_v52  ;;  %2749 = vmatprep.subr.bf16.mxu0 %v6570_v51  ;;  %3135 = vmatprep.subr.bf16.mxu1 %v6572_v54  ;;  %v329_v51 = vmul.f32 %v105_v38, %v105_v38  ;;  %v110_v53 = vld [vmem:[%s10863_s0 + $0x2f8] sm:$0xff] }
  0x54   :  { %413 = vadd.xlane.f32.xlu1 %v412_v61  ;;  %v6575_v61 = vld [vmem:[%s10864_s1 + $0x5a8] ss:$48 sps:$4 sm:$0xff]  }
  0x55   :  { %2750 = vmatpush1.bf16.msra.mxu0 %v6574_v60 }
  0x56   :  { %193 = vadd.xlane.f32.xlu0 %v192_v6  ;;  %v316_v6 = vmul.f32 %v92_v52, %v92_v52  ;;  %3136 = vmatpush1.bf16.msra.mxu1 %v6575_v61  ;;  %v330_v52 = vmul.f32 %v106_v39, %v106_v39 }
  0x57   :  { %2912 = vmatprep.subr.bf16.mxu0 %v6578_v3  ;;  %3298 = vmatprep.subr.bf16.mxu1 %v6581_v4 }
  0x58   :  { %197 = vadd.xlane.f32.xlu1 %v196_v13  ;;  %v98_v13 = vld [vmem:[%s10863_s0 + $0x298] sm:$0xff]  ;;  %v436_v15 = vadd.f32 %v435_v7, %v316_v6  ;;  %v455_v60 = vadd.f32 %v330_v52, %v329_v51  ;;  %v6978_v52 = vld [vmem:[%s10863_s0 + $0x8] sm:$0xff] }
  0x59   :  { %v220_v25 = vadd.f32 %v219_v14, %v98_v13  ;;  %v322_v26 = vmul.f32 %v98_v13, %v98_v13 }
  0x5a   :  { %417 = vadd.xlane.f32.xlu0 %v416_v19  ;;  %v319_v19 = vmul.f32 %v95_v8, %v95_v8  ;;  %v456_v0 = vadd.f32 %v455_v60, %v331_v59  ;;  %v6980_v60 = vld [vmem:[%s10863_s0 + $0x20] sm:$0xff] }
  0x5c   :  { %421 = vadd.xlane.f32.xlu1 %v420_v27  ;;  %v443_v27 = vadd.f32 %v321_v17, %v320_v16  ;;  %v440_v29 = vadd.f32 %v439_v20, %v319_v19 }
  0x5e   :  { %201 = vadd.xlane.f32.xlu0 %v200_v32  ;;  %v324_v32 = vmul.f32 %v100_v22, %v100_v22  ;;  %v444_v34 = vadd.f32 %v443_v27, %v322_v26 }
  0x60   :  { %205 = vadd.xlane.f32.xlu1 %v204_v41  ;;  %v325_v41 = vmul.f32 %v101_v28, %v101_v28  ;;  %v447_v42 = vadd.f32 %v324_v32, %v323_v31 }
  0x62   :  { %425 = vadd.xlane.f32.xlu0 %v424_v47  ;;  %v451_v47 = vadd.f32 %v327_v37, %v326_v36  ;;  %v448_v49 = vadd.f32 %v447_v42, %v325_v41  ;;  %v6976_v42 = vld [vmem:[%s10863_s0 + $0x10] sm:$0xff] }
  0x64   :  { %429 = vadd.xlane.f32.xlu1 %v428_v55  ;;  %v452_v54 = vadd.f32 %v451_v47, %v328_v46  ;;  %v235_v55 = vadd.f32 %v109_v44, %v108_v43 }
  0x66   :  { %209 = vadd.xlane.f32.xlu0 %v208_v62  ;;  %v236_v61 = vadd.f32 %v235_v55, %v110_v53  ;;  %v334_v62 = vmul.f32 %v110_v53, %v110_v53 }
  0x68   :  { %213 = vadd.xlane.f32.xlu1 %v212_v5  ;;  %v460_v1 = vadd.f32 %v459_v63, %v334_v62  ;;  %v6981_v62 = vld [vmem:[%s10863_s0 + $0x28] sm:$0xff] }
  0x6a   :  { %433 = vadd.xlane.f32.xlu0 %v432_v9 }
  0x6c   :  { %437 = vadd.xlane.f32.xlu1 %v436_v15 }
  0x6e   :  { %217 = vadd.xlane.f32.xlu0 %v216_v18 }
  0x70   :  { %221 = vadd.xlane.f32.xlu1 %v220_v25 }
  0x72   :  { %441 = vadd.xlane.f32.xlu0 %v440_v29 }
  0x74   :  { %445 = vadd.xlane.f32.xlu1 %v444_v34 }
  0x76   :  { %225 = vadd.xlane.f32.xlu0 %v224_v40 }
  0x78   :  { %229 = vadd.xlane.f32.xlu1 %v228_v45 }
  0x7a   :  { %449 = vadd.xlane.f32.xlu0 %v448_v49 }
  0x7c   :  { %453 = vadd.xlane.f32.xlu1 %v452_v54 }
  0x7e   :  { %233 = vadd.xlane.f32.xlu0 %v232_v58  ;;  %v6979_v58 = vld [vmem:[%s10863_s0 + $0x18] sm:$0xff] }
  0x80   :  { %237 = vadd.xlane.f32.xlu1 %v236_v61 }
  0x82   :  { %457 = vadd.xlane.f32.xlu0 %v456_v0  ;;  %v7635_v0 = vld [vmem:[%s10863_s0 + $0x30] sm:$0xff] }
  0x84   :  { %461 = vadd.xlane.f32.xlu1 %v460_v1 }
  0x93   :  { %v114_v2 = vpop.xlane.xlu0 %113 }
  0x94   :  { %v7580_v3 = vmul.f32 0.0026041667, %v114_v2 }
  0x95   :  { %v338_v4 = vpop.xlane.xlu1 %337 }
  0x96   :  { %v495_v5 = vmul.f32 0.0026041667, %v338_v4  ;;  %v527_v6 = vmul.f32 %v7580_v3, %v7580_v3  ;;  %v689_v43 = vsub.f32 %v6976_v42, %v7580_v3  ;;  %v687_v49 = vsub.f32 %v6977_v48, %v7580_v3 }
  0x97   :  { %v118_v7 = vpop.xlane.xlu0 %117  ;;  %v688_v53 = vsub.f32 %v6978_v52, %v7580_v3  ;;  %v6983_v3 = vld [vmem:[%s10863_s0 + $0x38] sm:$0xff] }
  0x98   :  { %v7584_v8 = vmul.f32 0.0026041667, %v118_v7  ;;  %v559_v9 = vsub.f32 %v495_v5, %v527_v6  ;;  %v6984_v5 = vld [vmem:[%s10863_s0 + $0x40] sm:$0xff] }
  0x99   :  { %v342_v10 = vpop.xlane.xlu1 %341 }
  0x9a   :  { %v496_v11 = vmul.f32 0.0026041667, %v342_v10  ;;  %v591_v12 = vmax.f32 %v559_v9, 0.0  ;;  %v528_v13 = vmul.f32 %v7584_v8, %v7584_v8  ;;  %v690_v59 = vsub.f32 %v6979_v58, %v7584_v8 }
  0x9b   :  { %v122_v14 = vpop.xlane.xlu0 %121  ;;  %v691_v61 = vsub.f32 %v6980_v60, %v7584_v8  ;;  %v692_v63 = vsub.f32 %v6981_v62, %v7584_v8 }
  0x9c   :  { %v7588_v15 = vmul.f32 0.0026041667, %v122_v14  ;;  %v623_v16 = vadd.f32 1e-05, %v591_v12  ;;  %v560_v17 = vsub.f32 %v496_v11, %v528_v13 }
  0x9d   :  { %v126_v18 = vpop.xlane.xlu1 %125 }
  0x9e   :  { %v7590_v19 = vmul.f32 0.0026041667, %v126_v18  ;;  %6912 = vrsqrt.f32 %v623_v16  ;;  %v592_v20 = vmax.f32 %v560_v17, 0.0  ;;  %v529_v21 = vmul.f32 %v7588_v15, %v7588_v15  ;;  %v6985_v18 = vld [vmem:[%s10863_s0 + $0x48] sm:$0xff] }
  0x9f   :  { %v346_v22 = vpop.xlane.xlu0 %345  ;;  %v693_v1 = vsub.f32 %v7635_v0, %v7588_v15  ;;  %v694_v4 = vsub.f32 %v6983_v3, %v7588_v15  ;;  %v695_v6 = vsub.f32 %v6984_v5, %v7588_v15  ;;  %v6990_v3 = vld [vmem:[%s10863_s0 + $0x70] sm:$0xff]  ;;  %v6593_v0 = vld [vmem:[%s10864_s1 + $0x6cc] ss:$48 sps:$4 sm:$0xff]  }
  0xa0   :  { %v497_v23 = vmul.f32 0.0026041667, %v346_v22  ;;  %v624_v24 = vadd.f32 1e-05, %v592_v20  ;;  %v530_v27 = vmul.f32 %v7590_v19, %v7590_v19  ;;  %v696_v20 = vsub.f32 %v6985_v18, %v7590_v19 }
  0xa1   :  { %v350_v25 = vpop.xlane.xlu1 %349 }
  0xa2   :  { %v561_v26 = vsub.f32 %v497_v23, %v529_v21  ;;  %v498_v28 = vmul.f32 0.0026041667, %v350_v25  ;;  %6914 = vrsqrt.f32 %v624_v24  ;;  %v6986_v21 = vld [vmem:[%s10863_s0 + $0x50] sm:$0xff] }
  0xa3   :  { %v130_v29 = vpop.xlane.xlu0 %129  ;;  %v697_v22 = vsub.f32 %v6986_v21, %v7590_v19 }
  0xa4   :  { %v593_v30 = vmax.f32 %v561_v26, 0.0  ;;  %v562_v31 = vsub.f32 %v498_v28, %v530_v27  ;;  %v7596_v32 = vmul.f32 0.0026041667, %v130_v29  ;;  %v6576_v28 = vld [vmem:[%s10864_s1 + $0x600] ss:$48 sps:$4 sm:$0xff]  }
  0xa5   :  { %v134_v33 = vpop.xlane.xlu1 %133  ;;  %v6579_v29 = vld [vmem:[%s10864_s1 + $0x608] ss:$48 sps:$4 sm:$0xff]  }
  0xa6   :  { %v625_v34 = vadd.f32 1e-05, %v593_v30  ;;  %v594_v35 = vmax.f32 %v562_v31, 0.0  ;;  %v7598_v36 = vmul.f32 0.0026041667, %v134_v33  ;;  %v531_v37 = vmul.f32 %v7596_v32, %v7596_v32  ;;  %v6987_v33 = vld [vmem:[%s10863_s0 + $0x58] sm:$0xff] }
  0xa7   :  { %v354_v38 = vpop.xlane.xlu0 %353 }
  0xa8   :  { %6916 = vrsqrt.f32 %v625_v34  ;;  %v626_v39 = vadd.f32 1e-05, %v594_v35  ;;  %v499_v40 = vmul.f32 0.0026041667, %v354_v38  ;;  %v6913_v41 = vpop.eup %6912  ;;  %v532_v46 = vmul.f32 %v7598_v36, %v7598_v36 }
  0xa9   :  { %v358_v44 = vpop.xlane.xlu1 %357  ;;  %v7612_v51 = vmul.f32 %v6913_v41, %v689_v43  ;;  %v784_v12 = vmul.f32 %v6913_v41, %v688_v53  ;;  %v783_v25 = vmul.f32 %v6913_v41, %v687_v49  ;;  %v698_v34 = vsub.f32 %v6987_v33, %v7590_v19  ;;  %v6989_v53 = vld [vmem:[%s10863_s0 + $0x68] sm:$0xff] }
  0xaa   :  { %6918 = vrsqrt.f32 %v626_v39  ;;  %v563_v45 = vsub.f32 %v499_v40, %v531_v37  ;;  %v500_v47 = vmul.f32 0.0026041667, %v358_v44  ;;  %v6584_v39 = vld [vmem:[%s10864_s1 + $0x664] ss:$48 sps:$4 sm:$0xff]   ;;  %v6587_v40 = vld [vmem:[%s10864_s1 + $0x66c] ss:$48 sps:$4 sm:$0xff]  }
  0xab   :  { %v138_v50 = vpop.xlane.xlu0 %137 }
  0xac   :  { %v595_v54 = vmax.f32 %v563_v45, 0.0  ;;  %v564_v55 = vsub.f32 %v500_v47, %v532_v46  ;;  %v7618_v56 = vmul.f32 0.0026041667, %v138_v50  ;;  %v6915_v57 = vpop.eup %6914  ;;  %v7693_v50 = vld [vmem:[%s10863_s0 + $0x60] sm:$0xff] }
  0xad   :  { %v142_v2 = vpop.xlane.xlu1 %141  ;;  %v787_v13 = vmul.f32 %v6915_v57, %v691_v61  ;;  %v786_v17 = vmul.f32 %v6915_v57, %v690_v59  ;;  %v788_v41 = vmul.f32 %v6915_v57, %v692_v63  ;;  %v699_v52 = vsub.f32 %v7693_v50, %v7596_v32  ;;  %v6585_v63 = vld [vmem:[%s10864_s1 + $0x668] ss:$48 sps:$4 sm:$0xff]   ;;  %v6605_v50 = vld [vmem:[%s10864_s1 + $0x78c] ss:$48 sps:$4 sm:$0xff]  }
  0xae   :  { %v627_v7 = vadd.f32 1e-05, %v595_v54  ;;  %v596_v8 = vmax.f32 %v564_v55, 0.0  ;;  %v7647_v9 = vmul.f32 0.0026041667, %v142_v2  ;;  %v533_v10 = vmul.f32 %v7618_v56, %v7618_v56 }
  0xaf   :  { %v362_v11 = vpop.xlane.xlu0 %361  ;;  %v7667_v31 = vpack.c.bf16 %v787_v13, %v784_v12  ;;  %v7673_v35 = vpack.c.bf16 %v786_v17, %v783_v25  ;;  %v7688_v49 = vpack.c.bf16 %v788_v41, %v7612_v51  ;;  %v700_v54 = vsub.f32 %v6989_v53, %v7596_v32  ;;  %v6582_v51 = vld [vmem:[%s10864_s1 + $0x660] ss:$48 sps:$4 sm:$0xff]   ;;  %v6590_v2 = vld [vmem:[%s10864_s1 + $0x6c4] ss:$48 sps:$4 sm:$0xff]  }
  0xb0   :  { %6920 = vrsqrt.f32 %v627_v7  ;;  %v628_v14 = vadd.f32 1e-05, %v596_v8  ;;  %v501_v16 = vmul.f32 0.0026041667, %v362_v11  ;;  %v534_v23 = vmul.f32 %v7647_v9, %v7647_v9  ;;  %v6992_v7 = vld [vmem:[%s10863_s0 + $0x80] sm:$0xff] }
  0xb1   :  { %v366_v24 = vpop.xlane.xlu1 %365  ;;  %2751 = vmatprep.mubr.bf16.mxu0 %v7667_v31  ;;  %3137 = vmatprep.mubr.bf16.mxu1 %v7667_v31  ;;  %10892 = vst [vmem:[#allocation2_spill] sm:$0xff] %v7688_v49  ;;  %v703_v8 = vsub.f32 %v6992_v7, %v7598_v36  ;;  %v6588_v17 = vld [vmem:[%s10864_s1 + $0x6c0] ss:$48 sps:$4 sm:$0xff]   ;;  %v6596_v25 = vld [vmem:[%s10864_s1 + $0x724] ss:$48 sps:$4 sm:$0xff]  }
  0xb2   :  { %v6917_v26 = vpop.eup %6916  ;;  %6922 = vrsqrt.f32 %v628_v14  ;;  %v565_v27 = vsub.f32 %v501_v16, %v533_v10  ;;  %v502_v30 = vmul.f32 0.0026041667, %v366_v24  ;;  %2752 = vmatmul.mubr.bf16.vlgmr.msra.gmra.mrb[0].mxu0 %v7673_v35  ;;  %3138 = vmatmul.mubr.bf16.vlgmr.msra.gmra.mrb[0].mxu1 %v7673_v35  ;;  %v6591_v24 = vld [vmem:[%s10864_s1 + $0x6c8] ss:$48 sps:$4 sm:$0xff]   ;;  %v6998_v7 = vld [vmem:[%s10863_s0 + $0xb0] sm:$0xff] }
  0xb3   :  { %v146_v37 = vpop.xlane.xlu0 %145  ;;  %v790_v38 = vmul.f32 %v6917_v26, %v694_v4  ;;  %v791_v45 = vmul.f32 %v6917_v26, %v695_v6  ;;  %2913 = vmatpush1.bf16.msra.mxu0 %v6576_v28  ;;  %3299 = vmatpush1.bf16.msra.mxu1 %v6579_v29  ;;  %v789_v62 = vmul.f32 %v6917_v26, %v693_v1  ;;  %v6991_v1 = vld [vmem:[%s10863_s0 + $0x78] sm:$0xff] }
  0xb4   :  { %v6919_v42 = vpop.eup %6918  ;;  %v597_v43 = vmax.f32 %v565_v27, 0.0  ;;  %v566_v44 = vsub.f32 %v502_v30, %v534_v23  ;;  %v7683_v19 = vmul.f32 0.0026041667, %v146_v37  ;;  %2914 = vmatprep.subr.bf16.mxu0 %v6584_v39  ;;  %3300 = vmatprep.subr.bf16.mxu1 %v6587_v40  ;;  %v701_v4 = vsub.f32 %v6990_v3, %v7596_v32  ;;  %v7765_v40 = vld [vmem:[%s10863_s0 + $0x90] sm:$0xff] }
  0xb5   :  { %v150_v46 = vpop.xlane.xlu1 %149  ;;  %v793_v47 = vmul.f32 %v6919_v42, %v697_v22  ;;  %v792_v48 = vmul.f32 %v6919_v42, %v696_v20  ;;  %v702_v6 = vsub.f32 %v6991_v1, %v7598_v36  ;;  %v794_v18 = vmul.f32 %v6919_v42, %v698_v34  ;;  %v6993_v20 = vld [vmem:[%s10863_s0 + $0x88] sm:$0xff]  ;;  %v6600_v1 = vld [vmem:[%s10864_s1 + $0x780] ss:$48 sps:$4 sm:$0xff]  }
  0xb6   :  { %v629_v55 = vadd.f32 1e-05, %v597_v43  ;;  %v598_v57 = vmax.f32 %v566_v44, 0.0  ;;  %v7704_v58 = vmul.f32 0.0026041667, %v150_v46  ;;  %v535_v59 = vmul.f32 %v7683_v19, %v7683_v19 }
  0xb7   :  { %v370_v60 = vpop.xlane.xlu0 %369  ;;  %v7708_v61 = vpack.c.bf16 %v793_v47, %v790_v38  ;;  %v7737_v12 = vpack.c.bf16 %v792_v48, %v789_v62  ;;  %2915 = vmatpush1.bf16.msra.mxu0 %v6582_v51  ;;  %v704_v21 = vsub.f32 %v6993_v20, %v7598_v36  ;;  %3301 = vmatpush1.bf16.msra.mxu1 %v6585_v63  ;;  %v6599_v36 = vld [vmem:[%s10864_s1 + $0x72c] ss:$48 sps:$4 sm:$0xff]   ;;  %v6594_v44 = vld [vmem:[%s10864_s1 + $0x720] ss:$48 sps:$4 sm:$0xff]  }
  0xb8   :  { %6924 = vrsqrt.f32 %v629_v55  ;;  %v630_v5 = vadd.f32 1e-05, %v598_v57  ;;  %v503_v15 = vmul.f32 0.0026041667, %v370_v60  ;;  %v536_v10 = vmul.f32 %v7704_v58, %v7704_v58  ;;  %2916 = vmatprep.subr.bf16.mxu0 %v6590_v2  ;;  %3302 = vmatprep.subr.bf16.mxu1 %v6593_v0  ;;  %v6602_v55 = vld [vmem:[%s10864_s1 + $0x784] ss:$48 sps:$4 sm:$0xff]  }
  0xb9   :  { %v374_v11 = vpop.xlane.xlu1 %373  ;;  %2761 = vmatprep.mubr.bf16.mxu0 %v7708_v61  ;;  %3147 = vmatprep.mubr.bf16.mxu1 %v7708_v61  ;;  %v7758_v33 = vpack.c.bf16 %v794_v18, %v791_v45  ;;  %v705_v41 = vsub.f32 %v7765_v40, %v7618_v56  ;;  %v6995_v57 = vld [vmem:[%s10863_s0 + $0x98] sm:$0xff]  ;;  %v6997_v62 = vld [vmem:[%s10863_s0 + $0xa8] sm:$0xff] }
  0xba   :  { %v6921_v13 = vpop.eup %6920  ;;  %6926 = vrsqrt.f32 %v630_v5  ;;  %v567_v14 = vsub.f32 %v503_v15, %v535_v59  ;;  %v504_v16 = vmul.f32 0.0026041667, %v374_v11  ;;  %2762 = vmatmul.mubr.bf16.gmra.mrb[4].mxu0 %v7737_v12  ;;  %3148 = vmatmul.mubr.bf16.gmra.mrb[4].mxu1 %v7737_v12  ;;  %v706_v51 = vsub.f32 %v6995_v57, %v7618_v56  ;;  %v6617_v40 = vld [vmem:[%s10864_s1 + $0x84c] ss:$48 sps:$4 sm:$0xff]  }
  0xbb   :  { %v154_v22 = vpop.xlane.xlu0 %153  ;;  %v796_v23 = vmul.f32 %v6921_v13, %v700_v54  ;;  %v797_v26 = vmul.f32 %v6921_v13, %v701_v4  ;;  %2917 = vmatpush1.bf16.msra.mxu0 %v6588_v17  ;;  %v795_v53 = vmul.f32 %v6921_v13, %v699_v52  ;;  %3303 = vmatpush1.bf16.msra.mxu1 %v6591_v24  ;;  %v6597_v54 = vld [vmem:[%s10864_s1 + $0x728] ss:$48 sps:$4 sm:$0xff]   ;;  %v6996_v52 = vld [vmem:[%s10863_s0 + $0xa0] sm:$0xff] }
  0xbc   :  { %v6923_v27 = vpop.eup %6922  ;;  %v599_v28 = vmax.f32 %v567_v14, 0.0  ;;  %v568_v29 = vsub.f32 %v504_v16, %v536_v10  ;;  %v7753_v30 = vmul.f32 0.0026041667, %v154_v22  ;;  %2918 = vmatprep.subr.bf16.mxu0 %v6596_v25  ;;  %3304 = vmatprep.subr.bf16.mxu1 %v6599_v36  ;;  %v707_v60 = vsub.f32 %v6996_v52, %v7618_v56  ;;  %v6999_v10 = vld [vmem:[%s10863_s0 + $0xb8] sm:$0xff]  ;;  %v6608_v16 = vld [vmem:[%s10864_s1 + $0x7e4] ss:$48 sps:$4 sm:$0xff]  }
  0xbd   :  { %v158_v34 = vpop.xlane.xlu1 %157  ;;  %v799_v37 = vmul.f32 %v6923_v27, %v703_v8  ;;  %v798_v38 = vmul.f32 %v6923_v27, %v702_v6  ;;  %v800_v39 = vmul.f32 %v6923_v27, %v704_v21  ;;  %v708_v63 = vsub.f32 %v6997_v62, %v7647_v9  ;;  %v6603_v14 = vld [vmem:[%s10864_s1 + $0x788] ss:$48 sps:$4 sm:$0xff]  }
  0xbe   :  { %v631_v42 = vadd.f32 1e-05, %v599_v28  ;;  %v600_v43 = vmax.f32 %v568_v29, 0.0  ;;  %v7772_v45 = vmul.f32 0.0026041667, %v158_v34  ;;  %v537_v46 = vmul.f32 %v7753_v30, %v7753_v30  ;;  %v7837_v28 = vld [vmem:[%s10863_s0 + $0xc0] sm:$0xff] }
  0xbf   :  { %v378_v47 = vpop.xlane.xlu0 %377  ;;  %v7776_v48 = vpack.c.bf16 %v799_v37, %v796_v23  ;;  %v7805_v4 = vpack.c.bf16 %v798_v38, %v795_v53  ;;  %2919 = vmatpush1.bf16.msra.mxu0 %v6594_v44  ;;  %v7811_v6 = vpack.c.bf16 %v800_v39, %v797_v26  ;;  %v709_v8 = vsub.f32 %v6998_v7, %v7647_v9  ;;  %v6606_v37 = vld [vmem:[%s10864_s1 + $0x7e0] ss:$48 sps:$4 sm:$0xff]   ;;  %v7001_v53 = vld [vmem:[%s10863_s0 + $0xc8] sm:$0xff] }
  0xc0   :  { %6928 = vrsqrt.f32 %v631_v42  ;;  %v632_v59 = vadd.f32 1e-05, %v600_v43  ;;  %v505_v32 = vmul.f32 0.0026041667, %v378_v47  ;;  %v538_v2 = vmul.f32 %v7772_v45, %v7772_v45  ;;  %3305 = vmatpush1.bf16.msra.mxu1 %v6597_v54  ;;  %2920 = vmatprep.subr.bf16.mxu0 %v6602_v55  ;;  %v6614_v47 = vld [vmem:[%s10864_s1 + $0x844] ss:$48 sps:$4 sm:$0xff]  }
  0xc1   :  { %v382_v3 = vpop.xlane.xlu1 %381  ;;  %2771 = vmatprep.mubr.bf16.mxu0 %v7776_v48  ;;  %3157 = vmatprep.mubr.bf16.mxu1 %v7776_v48  ;;  %v710_v11 = vsub.f32 %v6999_v10, %v7647_v9  ;;  %v6611_v9 = vld [vmem:[%s10864_s1 + $0x7ec] ss:$48 sps:$4 sm:$0xff]   ;;  %v711_v29 = vsub.f32 %v7837_v28, %v7683_v19  ;;  %v712_v54 = vsub.f32 %v7001_v53, %v7683_v19  ;;  %v6620_v10 = vld [vmem:[%s10864_s1 + $0x8a4] ss:$48 sps:$4 sm:$0xff]  }
  0xc2   :  { %v6925_v5 = vpop.eup %6924  ;;  %6930 = vrsqrt.f32 %v632_v59  ;;  %v569_v15 = vsub.f32 %v505_v32, %v537_v46  ;;  %v506_v0 = vmul.f32 0.0026041667, %v382_v3  ;;  %3306 = vmatprep.subr.bf16.mxu1 %v6605_v50  ;;  %2772 = vmatmul.mubr.bf16.gmra.mrb[8].mxu0 %v7805_v4  ;;  %v6609_v46 = vld [vmem:[%s10864_s1 + $0x7e8] ss:$48 sps:$4 sm:$0xff]   ;;  %v6629_v28 = vld [vmem:[%s10864_s1 + $0x1c] ss:$48 sps:$4 sm:$0xff]  }
  0xc3   :  { %v162_v13 = vpop.xlane.xlu0 %161  ;;  %v803_v17 = vmul.f32 %v6925_v5, %v707_v60  ;;  %v802_v23 = vmul.f32 %v6925_v5, %v706_v51  ;;  %3158 = vmatmul.mubr.bf16.gmra.mrb[8].mxu1 %v7805_v4  ;;  %2921 = vmatpush1.bf16.msra.mxu0 %v6600_v1  ;;  %v801_v44 = vmul.f32 %v6925_v5, %v705_v41  ;;  %v7002_v41 = vld [vmem:[%s10863_s0 + $0xd0] sm:$0xff]  ;;  %v7003_v51 = vld [vmem:[%s10863_s0 + $0xd8] sm:$0xff]  ;;  %v7004_v5 = vld [vmem:[%s10863_s0 + $0xe0] sm:$0xff] }
  0xc4   :  { %v6927_v18 = vpop.eup %6926  ;;  %v601_v20 = vmax.f32 %v569_v15, 0.0  ;;  %v570_v21 = vsub.f32 %v506_v0, %v538_v2  ;;  %v7827_v22 = vmul.f32 0.0026041667, %v162_v13  ;;  %3307 = vmatpush1.bf16.msra.mxu1 %v6603_v14  ;;  %2922 = vmatprep.subr.bf16.mxu0 %v6608_v16  ;;  %v713_v57 = vsub.f32 %v7002_v41, %v7683_v19  ;;  %v6612_v2 = vld [vmem:[%s10864_s1 + $0x840] ss:$48 sps:$4 sm:$0xff]   ;;  %v7005_v0 = vld [vmem:[%s10863_s0 + $0xe8] sm:$0xff] }
  0xc5   :  { %v166_v24 = vpop.xlane.xlu1 %165  ;;  %v805_v25 = vmul.f32 %v6927_v18, %v709_v8  ;;  %v804_v26 = vmul.f32 %v6927_v18, %v708_v63  ;;  %v806_v27 = vmul.f32 %v6927_v18, %v710_v11  ;;  %3308 = vmatprep.subr.bf16.mxu1 %v6611_v9  ;;  %v714_v59 = vsub.f32 %v7003_v51, %v7704_v58  ;;  %v6615_v8 = vld [vmem:[%s10864_s1 + $0x848] ss:$48 sps:$4 sm:$0xff]  }
  0xc6   :  { %v633_v36 = vadd.f32 1e-05, %v601_v20  ;;  %v602_v34 = vmax.f32 %v570_v21, 0.0  ;;  %v7844_v38 = vmul.f32 0.0026041667, %v166_v24  ;;  %v539_v39 = vmul.f32 %v7827_v22, %v7827_v22  ;;  %v7909_v24 = vld [vmem:[%s10863_s0 + $0xf0] sm:$0xff] }
  0xc7   :  { %v386_v42 = vpop.xlane.xlu0 %385  ;;  %v7848_v43 = vpack.c.bf16 %v805_v25, %v802_v23  ;;  %v7877_v52 = vpack.c.bf16 %v804_v26, %v801_v44  ;;  %2923 = vmatpush1.bf16.msra.mxu0 %v6606_v37  ;;  %v7883_v3 = vpack.c.bf16 %v806_v27, %v803_v17  ;;  %v715_v15 = vsub.f32 %v7004_v5, %v7704_v58  ;;  %v7007_v53 = vld [vmem:[%s10863_s0 + $0xf8] sm:$0xff] }
  0xc8   :  { %6932 = vrsqrt.f32 %v633_v36  ;;  %v634_v55 = vadd.f32 1e-05, %v602_v34  ;;  %v507_v56 = vmul.f32 0.0026041667, %v386_v42  ;;  %v540_v32 = vmul.f32 %v7844_v38, %v7844_v38  ;;  %3309 = vmatpush1.bf16.msra.mxu1 %v6609_v46  ;;  %2924 = vmatprep.subr.bf16.mxu0 %v6614_v47  ;;  %v6618_v36 = vld [vmem:[%s10864_s1 + $0x8a0] ss:$48 sps:$4 sm:$0xff]  }
  0xc9   :  { %v390_v50 = vpop.xlane.xlu1 %389  ;;  %2781 = vmatprep.mubr.bf16.mxu0 %v7848_v43  ;;  %3167 = vmatprep.mubr.bf16.mxu1 %v7848_v43  ;;  %v716_v1 = vsub.f32 %v7005_v0, %v7704_v58  ;;  %v6623_v58 = vld [vmem:[%s10864_s1 + $0x8ac] ss:$48 sps:$4 sm:$0xff]   ;;  %v717_v25 = vsub.f32 %v7909_v24, %v7753_v30  ;;  %v6621_v46 = vld [vmem:[%s10864_s1 + $0x8a8] ss:$48 sps:$4 sm:$0xff]   ;;  %v6626_v47 = vld [vmem:[%s10864_s1 + $0x14] ss:$48 sps:$4 sm:$0xff]  }
  0xca   :  { %v6929_v60 = vpop.eup %6928  ;;  %6934 = vrsqrt.f32 %v634_v55  ;;  %v571_v62 = vsub.f32 %v507_v56, %v539_v39  ;;  %v508_v63 = vmul.f32 0.0026041667, %v390_v50  ;;  %3310 = vmatprep.subr.bf16.mxu1 %v6617_v40  ;;  %2782 = vmatmul.mubr.bf16.gmra.mrb[12].mxu0 %v7877_v52  ;;  %v7009_v40 = vld [vmem:[%s10863_s0 + $0x108] sm:$0xff] }
  0xcb   :  { %v170_v7 = vpop.xlane.xlu0 %169  ;;  %v809_v11 = vmul.f32 %v6929_v60, %v713_v57  ;;  %v808_v18 = vmul.f32 %v6929_v60, %v712_v54  ;;  %3168 = vmatmul.mubr.bf16.gmra.mrb[12].mxu1 %v7877_v52  ;;  %2925 = vmatpush1.bf16.msra.mxu0 %v6612_v2  ;;  %v807_v44 = vmul.f32 %v6929_v60, %v711_v29  ;;  %v7008_v29 = vld [vmem:[%s10863_s0 + $0x100] sm:$0xff]  ;;  %v7011_v2 = vld [vmem:[%s10863_s0 + $0x118] sm:$0xff] }
  0xcc   :  { %v6931_v13 = vpop.eup %6930  ;;  %v603_v14 = vmax.f32 %v571_v62, 0.0  ;;  %v572_v16 = vsub.f32 %v508_v63, %v540_v32  ;;  %v7899_v17 = vmul.f32 0.0026041667, %v170_v7  ;;  %3311 = vmatpush1.bf16.msra.mxu1 %v6615_v8  ;;  %2926 = vmatprep.subr.bf16.mxu0 %v6620_v10  ;;  %v718_v54 = vsub.f32 %v7007_v53, %v7753_v30  ;;  %v7010_v62 = vld [vmem:[%s10863_s0 + $0x110] sm:$0xff] }
  0xcd   :  { %v174_v20 = vpop.xlane.xlu1 %173  ;;  %v811_v21 = vmul.f32 %v6931_v13, %v715_v15  ;;  %v810_v23 = vmul.f32 %v6931_v13, %v714_v59  ;;  %v812_v9 = vmul.f32 %v6931_v13, %v716_v1  ;;  %3312 = vmatprep.subr.bf16.mxu1 %v6623_v58  ;;  %v719_v56 = vsub.f32 %v7008_v29, %v7753_v30 }
  0xce   :  { %v635_v26 = vadd.f32 1e-05, %v603_v14  ;;  %v604_v27 = vmax.f32 %v572_v16, 0.0  ;;  %v7916_v34 = vmul.f32 0.0026041667, %v174_v20  ;;  %v541_v37 = vmul.f32 %v7899_v17, %v7899_v17 }
  0xcf   :  { %v394_v39 = vpop.xlane.xlu0 %393  ;;  %v7920_v42 = vpack.c.bf16 %v811_v21, %v808_v18  ;;  %v720_v41 = vsub.f32 %v7009_v40, %v7772_v45  ;;  %v7949_v59 = vpack.c.bf16 %v810_v23, %v807_v44  ;;  %2927 = vmatpush1.bf16.msra.mxu0 %v6618_v36  ;;  %v7952_v30 = vpack.c.bf16 %v812_v9, %v809_v11  ;;  %v7016_v40 = vld [vmem:[%s10863_s0 + $0x140] sm:$0xff] }
  0xd0   :  { %6936 = vrsqrt.f32 %v635_v26  ;;  %v636_v55 = vadd.f32 1e-05, %v604_v27  ;;  %v509_v19 = vmul.f32 0.0026041667, %v394_v39  ;;  %v542_v57 = vmul.f32 %v7916_v34, %v7916_v34  ;;  %3313 = vmatpush1.bf16.msra.mxu1 %v6621_v46  ;;  %3491 = vmatprep.subr.bf16.mxu0 %v6626_v47  ;;  %v7012_v26 = vld [vmem:[%s10863_s0 + $0x120] sm:$0xff]  ;;  %v7013_v39 = vld [vmem:[%s10863_s0 + $0x128] sm:$0xff] }
  0xd1   :  { %v398_v51 = vpop.xlane.xlu1 %397  ;;  %2791 = vmatprep.mubr.bf16.mxu0 %v7920_v42  ;;  %3177 = vmatprep.mubr.bf16.mxu1 %v7920_v42  ;;  %v721_v63 = vsub.f32 %v7010_v62, %v7772_v45  ;;  %v722_v5 = vsub.f32 %v7011_v2, %v7772_v45  ;;  %v723_v27 = vsub.f32 %v7012_v26, %v7827_v22  ;;  %v7014_v46 = vld [vmem:[%s10863_s0 + $0x130] sm:$0xff] }
  0xd2   :  { %v6933_v32 = vpop.eup %6932  ;;  %6938 = vrsqrt.f32 %v636_v55  ;;  %v573_v50 = vsub.f32 %v509_v19, %v541_v37  ;;  %v510_v60 = vmul.f32 0.0026041667, %v398_v51  ;;  %3877 = vmatprep.subr.bf16.mxu1 %v6629_v28  ;;  %2792 = vmatmul.mubr.bf16.gmra.mrb[16].mxu0 %v7949_v59  ;;  %v724_v44 = vsub.f32 %v7013_v39, %v7827_v22 }
  0xd3   :  { %v178_v15 = vpop.xlane.xlu0 %177  ;;  %v815_v0 = vmul.f32 %v6933_v32, %v719_v56  ;;  %v814_v11 = vmul.f32 %v6933_v32, %v718_v54  ;;  %3178 = vmatmul.mubr.bf16.gmra.mrb[16].mxu1 %v7949_v59  ;;  %v813_v24 = vmul.f32 %v6933_v32, %v717_v25  ;;  %v725_v25 = vsub.f32 %v7014_v46, %v7827_v22  ;;  %v7015_v22 = vld [vmem:[%s10863_s0 + $0x138] sm:$0xff] }
  0xd4   :  { %v6935_v1 = vpop.eup %6934  ;;  %v605_v7 = vmax.f32 %v573_v50, 0.0  ;;  %v574_v8 = vsub.f32 %v510_v60, %v542_v57  ;;  %v7962_v10 = vmul.f32 0.0026041667, %v178_v15  ;;  %v726_v56 = vsub.f32 %v7015_v22, %v7844_v38  ;;  %v7017_v57 = vld [vmem:[%s10863_s0 + $0x148] sm:$0xff]  ;;  %v7023_v22 = vld [vmem:[%s10863_s0 + $0x178] sm:$0xff] }
  0xd5   :  { %v182_v13 = vpop.xlane.xlu1 %181  ;;  %v817_v14 = vmul.f32 %v6935_v1, %v721_v63  ;;  %v816_v16 = vmul.f32 %v6935_v1, %v720_v41  ;;  %v818_v18 = vmul.f32 %v6935_v1, %v722_v5  ;;  %v727_v41 = vsub.f32 %v7016_v40, %v7844_v38 }
  0xd6   :  { %v637_v45 = vadd.f32 1e-05, %v605_v7  ;;  %v606_v58 = vmax.f32 %v574_v8, 0.0  ;;  %v7966_v20 = vmul.f32 0.0026041667, %v182_v13  ;;  %v543_v21 = vmul.f32 %v7962_v10, %v7962_v10 }
  0xd7   :  { %v402_v23 = vpop.xlane.xlu0 %401  ;;  %v7970_v9 = vpack.c.bf16 %v817_v14, %v814_v11  ;;  %v7987_v54 = vpack.c.bf16 %v816_v16, %v813_v24  ;;  %v7990_v29 = vpack.c.bf16 %v818_v18, %v815_v0  ;;  %v728_v51 = vsub.f32 %v7017_v57, %v7844_v38  ;;  %v7019_v24 = vld [vmem:[%s10863_s0 + $0x158] sm:$0xff] }
  0xd8   :  { %6940 = vrsqrt.f32 %v637_v45  ;;  %v638_v36 = vadd.f32 1e-05, %v606_v58  ;;  %v511_v37 = vmul.f32 0.0026041667, %v402_v23  ;;  %v544_v47 = vmul.f32 %v7966_v20, %v7966_v20  ;;  %v7018_v45 = vld [vmem:[%s10863_s0 + $0x150] sm:$0xff] }
  0xd9   :  { %v406_v53 = vpop.xlane.xlu1 %405  ;;  %2801 = vmatprep.mubr.bf16.mxu0 %v7970_v9  ;;  %3187 = vmatprep.mubr.bf16.mxu1 %v7970_v9  ;;  %v729_v58 = vsub.f32 %v7018_v45, %v7899_v17  ;;  %v730_v26 = vsub.f32 %v7019_v24, %v7899_v17 }
  0xda   :  { %v6937_v55 = vpop.eup %6936  ;;  %6942 = vrsqrt.f32 %v638_v36  ;;  %v575_v19 = vsub.f32 %v511_v37, %v543_v21  ;;  %v512_v28 = vmul.f32 0.0026041667, %v406_v53  ;;  %2802 = vmatmul.mubr.bf16.gmra.mrb[20].mxu0 %v7987_v54  ;;  %v7020_v36 = vld [vmem:[%s10863_s0 + $0x160] sm:$0xff] }
  0xdb   :  { %v186_v32 = vpop.xlane.xlu0 %185  ;;  %v821_v50 = vmul.f32 %v6937_v55, %v725_v25  ;;  %v820_v5 = vmul.f32 %v6937_v55, %v724_v44  ;;  %3188 = vmatmul.mubr.bf16.gmra.mrb[20].mxu1 %v7987_v54  ;;  %v819_v18 = vmul.f32 %v6937_v55, %v723_v27  ;;  %v731_v27 = vsub.f32 %v7020_v36, %v7899_v17  ;;  %v7021_v17 = vld [vmem:[%s10863_s0 + $0x168] sm:$0xff] }
  0xdc   :  { %v6939_v60 = vpop.eup %6938  ;;  %v607_v62 = vmax.f32 %v575_v19, 0.0  ;;  %v576_v63 = vsub.f32 %v512_v28, %v544_v47  ;;  %v8004_v2 = vmul.f32 0.0026041667, %v186_v32  ;;  %v732_v55 = vsub.f32 %v7021_v17, %v7916_v34  ;;  %v7022_v19 = vld [vmem:[%s10863_s0 + $0x170] sm:$0xff] }
  0xdd   :  { %v190_v15 = vpop.xlane.xlu1 %189  ;;  %v823_v0 = vmul.f32 %v6939_v60, %v727_v41  ;;  %v822_v1 = vmul.f32 %v6939_v60, %v726_v56  ;;  %v824_v7 = vmul.f32 %v6939_v60, %v728_v51  ;;  %v733_v28 = vsub.f32 %v7022_v19, %v7916_v34 }
  0xde   :  { %v639_v8 = vadd.f32 1e-05, %v607_v62  ;;  %v608_v11 = vmax.f32 %v576_v63, 0.0  ;;  %v8008_v13 = vmul.f32 0.0026041667, %v190_v15  ;;  %v545_v38 = vmul.f32 %v8004_v2, %v8004_v2 }
  0xdf   :  { %v410_v14 = vpop.xlane.xlu0 %409  ;;  %v8012_v16 = vpack.c.bf16 %v823_v0, %v820_v5  ;;  %v8029_v44 = vpack.c.bf16 %v822_v1, %v819_v18  ;;  %v8032_v53 = vpack.c.bf16 %v824_v7, %v821_v50  ;;  %v734_v56 = vsub.f32 %v7023_v22, %v7916_v34 }
  0xe0   :  { %6944 = vrsqrt.f32 %v639_v8  ;;  %v640_v21 = vadd.f32 1e-05, %v608_v11  ;;  %v513_v23 = vmul.f32 0.0026041667, %v410_v14  ;;  %v546_v37 = vmul.f32 %v8008_v13, %v8008_v13  ;;  %v7024_v14 = vld [vmem:[%s10863_s0 + $0x180] sm:$0xff] }
  0xe1   :  { %v414_v39 = vpop.xlane.xlu1 %413  ;;  %2811 = vmatprep.mubr.bf16.mxu0 %v8012_v16  ;;  %3197 = vmatprep.mubr.bf16.mxu1 %v8012_v16  ;;  %v735_v18 = vsub.f32 %v7024_v14, %v7962_v10 }
  0xe2   :  { %v6941_v46 = vpop.eup %6940  ;;  %6946 = vrsqrt.f32 %v640_v21  ;;  %v577_v25 = vsub.f32 %v513_v23, %v545_v38  ;;  %v514_v47 = vmul.f32 0.0026041667, %v414_v39  ;;  %2812 = vmatmul.mubr.bf16.gmra.mrb[24].mxu0 %v8029_v44  ;;  %v7025_v23 = vld [vmem:[%s10863_s0 + $0x188] sm:$0xff] }
  0xe3   :  { %v194_v40 = vpop.xlane.xlu0 %193  ;;  %v827_v41 = vmul.f32 %v6941_v46, %v731_v27  ;;  %v826_v60 = vmul.f32 %v6941_v46, %v730_v26  ;;  %3198 = vmatmul.mubr.bf16.gmra.mrb[24].mxu1 %v8029_v44  ;;  %v825_v38 = vmul.f32 %v6941_v46, %v729_v58  ;;  %v736_v24 = vsub.f32 %v7025_v23, %v7962_v10  ;;  %v7026_v26 = vld [vmem:[%s10863_s0 + $0x190] sm:$0xff] }
  0xe4   :  { %v6943_v57 = vpop.eup %6942  ;;  %v609_v51 = vmax.f32 %v577_v25, 0.0  ;;  %v578_v32 = vsub.f32 %v514_v47, %v546_v37  ;;  %v8046_v50 = vmul.f32 0.0026041667, %v194_v40  ;;  %v737_v58 = vsub.f32 %v7026_v26, %v7962_v10  ;;  %v7027_v10 = vld [vmem:[%s10863_s0 + $0x198] sm:$0xff] }
  0xe5   :  { %v198_v62 = vpop.xlane.xlu1 %197  ;;  %v829_v63 = vmul.f32 %v6943_v57, %v733_v28  ;;  %v828_v5 = vmul.f32 %v6943_v57, %v732_v55  ;;  %v830_v15 = vmul.f32 %v6943_v57, %v734_v56  ;;  %v738_v17 = vsub.f32 %v7027_v10, %v7966_v20  ;;  %v7028_v55 = vld [vmem:[%s10863_s0 + $0x1a0] sm:$0xff]  ;;  %v7029_v28 = vld [vmem:[%s10863_s0 + $0x1a8] sm:$0xff]  ;;  %v7031_v26 = vld [vmem:[%s10863_s0 + $0x1b8] sm:$0xff] }
  0xe6   :  { %v641_v0 = vadd.f32 1e-05, %v609_v51  ;;  %v610_v1 = vmax.f32 %v578_v32, 0.0  ;;  %v8050_v7 = vmul.f32 0.0026041667, %v198_v62  ;;  %v547_v34 = vmul.f32 %v8046_v50, %v8046_v50 }
  0xe7   :  { %v418_v8 = vpop.xlane.xlu0 %417  ;;  %v8054_v11 = vpack.c.bf16 %v829_v63, %v826_v60  ;;  %v8071_v37 = vpack.c.bf16 %v828_v5, %v825_v38  ;;  %v8074_v47 = vpack.c.bf16 %v830_v15, %v827_v41  ;;  %v739_v19 = vsub.f32 %v7028_v55, %v7966_v20 }
  0xe8   :  { %6948 = vrsqrt.f32 %v641_v0  ;;  %v642_v45 = vadd.f32 1e-05, %v610_v1  ;;  %v515_v21 = vmul.f32 0.0026041667, %v418_v8  ;;  %v548_v36 = vmul.f32 %v8050_v7, %v8050_v7 }
  0xe9   :  { %v422_v27 = vpop.xlane.xlu1 %421  ;;  %2821 = vmatprep.mubr.bf16.mxu0 %v8054_v11  ;;  %3207 = vmatprep.mubr.bf16.mxu1 %v8054_v11  ;;  %v740_v22 = vsub.f32 %v7029_v28, %v7966_v20  ;;  %v7034_v28 = vld [vmem:[%s10863_s0 + $0x1d0] sm:$0xff] }
  0xea   :  { %v6945_v39 = vpop.eup %6944  ;;  %6950 = vrsqrt.f32 %v642_v45  ;;  %v579_v46 = vsub.f32 %v515_v21, %v547_v34  ;;  %v516_v25 = vmul.f32 0.0026041667, %v422_v27  ;;  %2822 = vmatmul.mubr.bf16.gmra.mrb[28].mxu0 %v8071_v37  ;;  %v7030_v45 = vld [vmem:[%s10863_s0 + $0x1b0] sm:$0xff] }
  0xeb   :  { %v202_v56 = vpop.xlane.xlu0 %201  ;;  %v833_v40 = vmul.f32 %v6945_v39, %v737_v58  ;;  %v832_v60 = vmul.f32 %v6945_v39, %v736_v24  ;;  %3208 = vmatmul.mubr.bf16.gmra.mrb[28].mxu1 %v8071_v37  ;;  %v831_v14 = vmul.f32 %v6945_v39, %v735_v18  ;;  %v741_v21 = vsub.f32 %v7030_v45, %v8004_v2 }
  0xec   :  { %v6947_v41 = vpop.eup %6946  ;;  %v611_v57 = vmax.f32 %v579_v46, 0.0  ;;  %v580_v51 = vsub.f32 %v516_v25, %v548_v36  ;;  %v8088_v32 = vmul.f32 0.0026041667, %v202_v56  ;;  %v742_v58 = vsub.f32 %v7031_v26, %v8004_v2  ;;  %v7032_v36 = vld [vmem:[%s10863_s0 + $0x1c0] sm:$0xff]  ;;  %v7035_v56 = vld [vmem:[%s10863_s0 + $0x1d8] sm:$0xff] }
  0xed   :  { %v206_v62 = vpop.xlane.xlu1 %205  ;;  %v835_v63 = vmul.f32 %v6947_v41, %v739_v19  ;;  %v834_v5 = vmul.f32 %v6947_v41, %v738_v17  ;;  %v836_v15 = vmul.f32 %v6947_v41, %v740_v22  ;;  %v743_v18 = vsub.f32 %v7032_v36, %v8004_v2  ;;  %v7033_v2 = vld [vmem:[%s10863_s0 + $0x1c8] sm:$0xff] }
  0xee   :  { %v643_v0 = vadd.f32 1e-05, %v611_v57  ;;  %v612_v1 = vmax.f32 %v580_v51, 0.0  ;;  %v8092_v34 = vmul.f32 0.0026041667, %v206_v62  ;;  %v549_v20 = vmul.f32 %v8088_v32, %v8088_v32 }
  0xef   :  { %v426_v8 = vpop.xlane.xlu0 %425  ;;  %v8096_v38 = vpack.c.bf16 %v835_v63, %v832_v60  ;;  %v8113_v46 = vpack.c.bf16 %v834_v5, %v831_v14  ;;  %v8116_v55 = vpack.c.bf16 %v836_v15, %v833_v40  ;;  %v744_v19 = vsub.f32 %v7033_v2, %v8008_v13 }
  0xf0   :  { %6952 = vrsqrt.f32 %v643_v0  ;;  %v644_v23 = vadd.f32 1e-05, %v612_v1  ;;  %v517_v24 = vmul.f32 0.0026041667, %v426_v8  ;;  %v550_v27 = vmul.f32 %v8092_v34, %v8092_v34 }
  0xf1   :  { %v430_v39 = vpop.xlane.xlu1 %429  ;;  %2831 = vmatprep.mubr.bf16.mxu0 %v8096_v38  ;;  %3217 = vmatprep.mubr.bf16.mxu1 %v8096_v38  ;;  %v745_v22 = vsub.f32 %v7034_v28, %v8008_v13  ;;  %v746_v41 = vsub.f32 %v7035_v56, %v8008_v13 }
  0xf2   :  { %v6949_v25 = vpop.eup %6948  ;;  %6954 = vrsqrt.f32 %v644_v23  ;;  %v581_v10 = vsub.f32 %v517_v24, %v549_v20  ;;  %v518_v17 = vmul.f32 0.0026041667, %v430_v39  ;;  %2832 = vmatmul.mubr.bf16.gmra.mrb[32].mxu0 %v8113_v46  ;;  %v7037_v39 = vld [vmem:[%s10863_s0 + $0x1e8] sm:$0xff] }
  0xf3   :  { %v210_v40 = vpop.xlane.xlu0 %209  ;;  %v839_v57 = vmul.f32 %v6949_v25, %v743_v18  ;;  %v838_v5 = vmul.f32 %v6949_v25, %v742_v58  ;;  %3218 = vmatmul.mubr.bf16.gmra.mrb[32].mxu1 %v8113_v46  ;;  %v837_v26 = vmul.f32 %v6949_v25, %v741_v21  ;;  %v7036_v58 = vld [vmem:[%s10863_s0 + $0x1e0] sm:$0xff] }
  0xf4   :  { %v6951_v51 = vpop.eup %6950  ;;  %v613_v60 = vmax.f32 %v581_v10, 0.0  ;;  %v582_v62 = vsub.f32 %v518_v17, %v550_v27  ;;  %v8130_v63 = vmul.f32 0.0026041667, %v210_v40  ;;  %v747_v36 = vsub.f32 %v7036_v58, %v8046_v50  ;;  %v7038_v17 = vld [vmem:[%s10863_s0 + $0x1f0] sm:$0xff] }
  0xf5   :  { %v214_v15 = vpop.xlane.xlu1 %213  ;;  %v841_v0 = vmul.f32 %v6951_v51, %v745_v22  ;;  %v840_v1 = vmul.f32 %v6951_v51, %v744_v19  ;;  %v842_v20 = vmul.f32 %v6951_v51, %v746_v41  ;;  %v748_v10 = vsub.f32 %v7037_v39, %v8046_v50  ;;  %v7040_v51 = vld [vmem:[%s10863_s0 + $0x200] sm:$0xff] }
  0xf6   :  { %v645_v8 = vadd.f32 1e-05, %v613_v60  ;;  %v614_v14 = vmax.f32 %v582_v62, 0.0  ;;  %v8134_v45 = vmul.f32 0.0026041667, %v214_v15  ;;  %v551_v13 = vmul.f32 %v8130_v63, %v8130_v63  ;;  %v7041_v62 = vld [vmem:[%s10863_s0 + $0x208] sm:$0xff] }
  0xf7   :  { %v434_v23 = vpop.xlane.xlu0 %433  ;;  %v8138_v24 = vpack.c.bf16 %v841_v0, %v838_v5  ;;  %v749_v21 = vsub.f32 %v7038_v17, %v8046_v50  ;;  %v8155_v19 = vpack.c.bf16 %v840_v1, %v837_v26  ;;  %v8158_v41 = vpack.c.bf16 %v842_v20, %v839_v57  ;;  %v7039_v50 = vld [vmem:[%s10863_s0 + $0x1f8] sm:$0xff] }
  0xf8   :  { %6956 = vrsqrt.f32 %v645_v8  ;;  %v646_v18 = vadd.f32 1e-05, %v614_v14  ;;  %v519_v27 = vmul.f32 0.0026041667, %v434_v23  ;;  %v552_v25 = vmul.f32 %v8134_v45, %v8134_v45 }
  0xf9   :  { %v438_v2 = vpop.xlane.xlu1 %437  ;;  %2841 = vmatprep.mubr.bf16.mxu0 %v8138_v24  ;;  %3227 = vmatprep.mubr.bf16.mxu1 %v8138_v24  ;;  %v750_v40 = vsub.f32 %v7039_v50, %v8050_v7  ;;  %v751_v60 = vsub.f32 %v7040_v51, %v8050_v7  ;;  %v752_v5 = vsub.f32 %v7041_v62, %v8050_v7  ;;  %v7043_v50 = vld [vmem:[%s10863_s0 + $0x218] sm:$0xff]  ;;  %v7044_v51 = vld [vmem:[%s10863_s0 + $0x220] sm:$0xff] }
  0xfa   :  { %v6953_v28 = vpop.eup %6952  ;;  %6958 = vrsqrt.f32 %v646_v18  ;;  %v583_v22 = vsub.f32 %v519_v27, %v551_v13  ;;  %v520_v56 = vmul.f32 0.0026041667, %v438_v2  ;;  %2842 = vmatmul.mubr.bf16.gmra.mrb[36].mxu0 %v8155_v19 }
  0xfb   :  { %v218_v57 = vpop.xlane.xlu0 %217  ;;  %v845_v15 = vmul.f32 %v6953_v28, %v749_v21  ;;  %v844_v14 = vmul.f32 %v6953_v28, %v748_v10  ;;  %3228 = vmatmul.mubr.bf16.gmra.mrb[36].mxu1 %v8155_v19  ;;  %v7042_v10 = vld [vmem:[%s10863_s0 + $0x210] sm:$0xff] }
  0xfc   :  { %v6955_v0 = vpop.eup %6954  ;;  %v615_v1 = vmax.f32 %v583_v22, 0.0  ;;  %v584_v20 = vsub.f32 %v520_v56, %v552_v25  ;;  %v8172_v8 = vmul.f32 0.0026041667, %v218_v57  ;;  %v843_v25 = vmul.f32 %v6953_v28, %v747_v36 }
  0xfd   :  { %v222_v13 = vpop.xlane.xlu1 %221  ;;  %v847_v23 = vmul.f32 %v6955_v0, %v751_v60  ;;  %v846_v26 = vmul.f32 %v6955_v0, %v750_v40  ;;  %v848_v58 = vmul.f32 %v6955_v0, %v752_v5  ;;  %v753_v2 = vsub.f32 %v7042_v10, %v8088_v32 }
  0xfe   :  { %v647_v18 = vadd.f32 1e-05, %v615_v1  ;;  %v616_v27 = vmax.f32 %v584_v20, 0.0  ;;  %v8176_v39 = vmul.f32 0.0026041667, %v222_v13  ;;  %v553_v7 = vmul.f32 %v8172_v8, %v8172_v8 }
  0xff   :  { %v442_v17 = vpop.xlane.xlu0 %441  ;;  %v8180_v21 = vpack.c.bf16 %v847_v23, %v844_v14  ;;  %v754_v40 = vsub.f32 %v7043_v50, %v8088_v32  ;;  %v755_v36 = vsub.f32 %v7044_v51, %v8088_v32  ;;  %v8197_v62 = vpack.c.bf16 %v846_v26, %v843_v25  ;;  %v7045_v32 = vld [vmem:[%s10863_s0 + $0x228] sm:$0xff]  ;;  %v7046_v14 = vld [vmem:[%s10863_s0 + $0x230] sm:$0xff]  ;;  %v7047_v23 = vld [vmem:[%s10863_s0 + $0x238] sm:$0xff] }
 0x100   :  { %6960 = vrsqrt.f32 %v647_v18  ;;  %v648_v22 = vadd.f32 1e-05, %v616_v27  ;;  %v521_v56 = vmul.f32 0.0026041667, %v442_v17  ;;  %v554_v28 = vmul.f32 %v8176_v39, %v8176_v39 }
 0x101   :  { %v446_v60 = vpop.xlane.xlu1 %445  ;;  %2851 = vmatprep.mubr.bf16.mxu0 %v8180_v21  ;;  %10893 = vst [vmem:[#allocation3_spill] sm:$0xff] %v8197_v62  ;;  %3237 = vmatprep.mubr.bf16.mxu1 %v8180_v21  ;;  %v8200_v1 = vpack.c.bf16 %v848_v58, %v845_v15  ;;  %v756_v20 = vsub.f32 %v7045_v32, %v8092_v34 }
 0x102   :  { %v6957_v5 = vpop.eup %6956  ;;  %6962 = vrsqrt.f32 %v648_v22  ;;  %v585_v57 = vsub.f32 %v521_v56, %v553_v7  ;;  %v522_v0 = vmul.f32 0.0026041667, %v446_v60  ;;  %v757_v13 = vsub.f32 %v7046_v14, %v8092_v34  ;;  %2852 = vmatmul.mubr.bf16.gmra.mrb[40].mxu0 %v8197_v62 }
 0x103   :  { %v758_v26 = vsub.f32 %v7047_v23, %v8092_v34  ;;  %v226_v15 = vpop.xlane.xlu0 %225  ;;  %v851_v58 = vmul.f32 %v6957_v5, %v755_v36  ;;  %v850_v25 = vmul.f32 %v6957_v5, %v754_v40  ;;  %3238 = vmatmul.mubr.bf16.gmra.mrb[40].mxu1 %v8197_v62  ;;  %v7048_v40 = vld [vmem:[%s10863_s0 + $0x240] sm:$0xff] }
 0x104   :  { %v6959_v18 = vpop.eup %6958  ;;  %v617_v27 = vmax.f32 %v585_v57, 0.0  ;;  %v586_v7 = vsub.f32 %v522_v0, %v554_v28  ;;  %v8214_v17 = vmul.f32 0.0026041667, %v226_v15  ;;  %v849_v57 = vmul.f32 %v6957_v5, %v753_v2 }
 0x105   :  { %v230_v10 = vpop.xlane.xlu1 %229  ;;  %v853_v22 = vmul.f32 %v6959_v18, %v757_v13  ;;  %v852_v56 = vmul.f32 %v6959_v18, %v756_v20  ;;  %v854_v50 = vmul.f32 %v6959_v18, %v758_v26  ;;  %v759_v0 = vsub.f32 %v7048_v40, %v8130_v63  ;;  %v7049_v13 = vld [vmem:[%s10863_s0 + $0x248] sm:$0xff]  ;;  %v7050_v26 = vld [vmem:[%s10863_s0 + $0x250] sm:$0xff] }
 0x106   :  { %v649_v51 = vadd.f32 1e-05, %v617_v27  ;;  %v618_v60 = vmax.f32 %v586_v7, 0.0  ;;  %v8218_v32 = vmul.f32 0.0026041667, %v230_v10  ;;  %v555_v34 = vmul.f32 %v8214_v17, %v8214_v17 }
 0x107   :  { %v450_v36 = vpop.xlane.xlu0 %449  ;;  %v8222_v28 = vpack.c.bf16 %v853_v22, %v850_v25  ;;  %v760_v23 = vsub.f32 %v7049_v13, %v8130_v63  ;;  %v761_v2 = vsub.f32 %v7050_v26, %v8130_v63  ;;  %v8239_v18 = vpack.c.bf16 %v852_v56, %v849_v57  ;;  %v7051_v63 = vld [vmem:[%s10863_s0 + $0x258] sm:$0xff] }
 0x108   :  { %6964 = vrsqrt.f32 %v649_v51  ;;  %v650_v20 = vadd.f32 1e-05, %v618_v60  ;;  %v523_v14 = vmul.f32 0.0026041667, %v450_v36  ;;  %v556_v5 = vmul.f32 %v8218_v32, %v8218_v32  ;;  %v7052_v51 = vld [vmem:[%s10863_s0 + $0x260] sm:$0xff]  ;;  %v7053_v60 = vld [vmem:[%s10863_s0 + $0x268] sm:$0xff] }
 0x109   :  { %10894 = vst [vmem:[#allocation4_spill] sm:$0xff] %v8222_v28  ;;  %v454_v15 = vpop.xlane.xlu1 %453  ;;  %2861 = vmatprep.mubr.bf16.mxu0 %v8222_v28  ;;  %10895 = vst [vmem:[#allocation5_spill] sm:$0xff] %v8239_v18  ;;  %3247 = vmatprep.mubr.bf16.mxu1 %v8222_v28  ;;  %v8242_v10 = vpack.c.bf16 %v854_v50, %v851_v58  ;;  %v762_v22 = vsub.f32 %v7051_v63, %v8134_v45 }
 0x10a   :  { %v6961_v27 = vpop.eup %6960  ;;  %6966 = vrsqrt.f32 %v650_v20  ;;  %v587_v7 = vsub.f32 %v523_v14, %v555_v34  ;;  %v524_v25 = vmul.f32 0.0026041667, %v454_v15  ;;  %v763_v56 = vsub.f32 %v7052_v51, %v8134_v45  ;;  %2862 = vmatmul.mubr.bf16.gmra.mrb[44].mxu0 %v8239_v18 }
 0x10b   :  { %v764_v34 = vsub.f32 %v7053_v60, %v8134_v45  ;;  %v234_v58 = vpop.xlane.xlu0 %233  ;;  %v857_v50 = vmul.f32 %v6961_v27, %v761_v2  ;;  %v856_v14 = vmul.f32 %v6961_v27, %v760_v23  ;;  %3248 = vmatmul.mubr.bf16.gmra.mrb[44].mxu1 %v8239_v18  ;;  %v7055_v60 = vld [vmem:[%s10863_s0 + $0x280] sm:$0xff] }
 0x10c   :  { %v6963_v36 = vpop.eup %6962  ;;  %v619_v57 = vmax.f32 %v587_v7, 0.0  ;;  %v588_v40 = vsub.f32 %v524_v25, %v556_v5  ;;  %v8256_v20 = vmul.f32 0.0026041667, %v234_v58  ;;  %v855_v7 = vmul.f32 %v6961_v27, %v759_v0 }
 0x10d   :  { %v238_v13 = vpop.xlane.xlu1 %237  ;;  %v859_v26 = vmul.f32 %v6963_v36, %v763_v56  ;;  %v858_v15 = vmul.f32 %v6963_v36, %v762_v22  ;;  %v860_v63 = vmul.f32 %v6963_v36, %v764_v34  ;;  %v7054_v56 = vld [vmem:[%s10863_s0 + $0x278] sm:$0xff]  ;;  %v767_v34 = vsub.f32 %v7055_v60, %v8172_v8 }
 0x10e   :  { %v651_v51 = vadd.f32 1e-05, %v619_v57  ;;  %v620_v28 = vmax.f32 %v588_v40, 0.0  ;;  %v8260_v62 = vmul.f32 0.0026041667, %v238_v13  ;;  %v557_v45 = vmul.f32 %v8256_v20, %v8256_v20 }
 0x10f   :  { %v458_v2 = vpop.xlane.xlu0 %457  ;;  %v8264_v5 = vpack.c.bf16 %v859_v26, %v856_v14  ;;  %v766_v22 = vsub.f32 %v7054_v56, %v8172_v8  ;;  %v8280_v40 = vpack.c.bf16 %v860_v63, %v857_v50  ;;  %v7056_v14 = vld [vmem:[%s10863_s0 + $0x288] sm:$0xff]  ;;  %v7057_v26 = vld [vmem:[%s10863_s0 + $0x290] sm:$0xff] }
 0x110   :  { %6968 = vrsqrt.f32 %v651_v51  ;;  %v652_v23 = vadd.f32 1e-05, %v620_v28  ;;  %v525_v25 = vmul.f32 0.0026041667, %v458_v2  ;;  %v558_v58 = vmul.f32 %v8260_v62, %v8260_v62  ;;  %v7058_v51 = vld [vmem:[%s10863_s0 + $0x298] sm:$0xff]  ;;  %v7059_v2 = vld [vmem:[%s10863_s0 + $0x270] sm:$0xff] }
 0x111   :  { %10896 = vst [vmem:[#allocation6_spill] sm:$0xff] %v8264_v5  ;;  %v462_v36 = vpop.xlane.xlu1 %461  ;;  %2871 = vmatprep.mubr.bf16.mxu0 %v8264_v5  ;;  %v8277_v28 = vpack.c.bf16 %v858_v15, %v855_v7  ;;  %3257 = vmatprep.mubr.bf16.mxu1 %v8264_v5  ;;  %v768_v13 = vsub.f32 %v7056_v14, %v8176_v39 }
 0x112   :  { %v6965_v0 = vpop.eup %6964  ;;  %6970 = vrsqrt.f32 %v652_v23  ;;  %v589_v27 = vsub.f32 %v525_v25, %v557_v45  ;;  %v526_v57 = vmul.f32 0.0026041667, %v462_v36  ;;  %v769_v15 = vsub.f32 %v7057_v26, %v8176_v39 }
 0x113   :  { %v770_v45 = vsub.f32 %v7058_v51, %v8176_v39  ;;  %v863_v50 = vmul.f32 %v6965_v0, %v767_v34  ;;  %v765_v7 = vsub.f32 %v7059_v2, %v8172_v8  ;;  %v862_v56 = vmul.f32 %v6965_v0, %v766_v22  ;;  %2872 = vmatmul.mubr.bf16.gmra.mrb[48].mxu0 %v8277_v28  ;;  %v7060_v8 = vld [vmem:[%s10863_s0 + $0x2b0] sm:$0xff] }
 0x114   :  { %v6967_v63 = vpop.eup %6966  ;;  %v621_v23 = vmax.f32 %v589_v27, 0.0  ;;  %v590_v25 = vsub.f32 %v526_v57, %v558_v58  ;;  %3258 = vmatmul.mubr.bf16.gmra.mrb[48].mxu1 %v8277_v28  ;;  %v773_v22 = vsub.f32 %v7060_v8, %v8214_v17 }
 0x115   :  { %v865_v60 = vmul.f32 %v6967_v63, %v769_v15  ;;  %v864_v36 = vmul.f32 %v6967_v63, %v768_v13  ;;  %v866_v14 = vmul.f32 %v6967_v63, %v770_v45  ;;  %v861_v51 = vmul.f32 %v6965_v0, %v765_v7  ;;  %v7061_v0 = vld [vmem:[%s10863_s0 + $0x2a8] sm:$0xff]  ;;  %v7062_v13 = vld [vmem:[%s10863_s0 + $0x2b8] sm:$0xff]  ;;  %v7063_v45 = vld [vmem:[%s10863_s0 + $0x2c0] sm:$0xff] }
 0x116   :  { %v653_v26 = vadd.f32 1e-05, %v621_v23  ;;  %v622_v39 = vmax.f32 %v590_v25, 0.0  ;;  %v772_v57 = vsub.f32 %v7061_v0, %v8214_v17  ;;  %v774_v15 = vsub.f32 %v7062_v13, %v8218_v32  ;;  %v7064_v63 = vld [vmem:[%s10863_s0 + $0x2c8] sm:$0xff]  ;;  %v7065_v23 = vld [vmem:[%s10863_s0 + $0x2a0] sm:$0xff]  ;;  %v7067_v0 = vld [vmem:[%s10863_s0 + $0x2d8] sm:$0xff] }
 0x117   :  { %v8300_v34 = vpack.c.bf16 %v865_v60, %v862_v56  ;;  %v8302_v5 = vpack.c.bf16 %v866_v14, %v863_v50  ;;  %v8310_v58 = vpack.c.bf16 %v864_v36, %v861_v51  ;;  %v775_v50 = vsub.f32 %v7063_v45, %v8218_v32  ;;  %v7066_v51 = vld [vmem:[%s10863_s0 + $0x2e0] sm:$0xff] }
 0x118   :  { %6972 = vrsqrt.f32 %v653_v26  ;;  %v654_v18 = vadd.f32 1e-05, %v622_v39  ;;  %v776_v2 = vsub.f32 %v7064_v63, %v8218_v32  ;;  %v771_v25 = vsub.f32 %v7065_v23, %v8214_v17 }
 0x119   :  { %2881 = vmatprep.mubr.bf16.mxu0 %v8300_v34  ;;  %3267 = vmatprep.mubr.bf16.mxu1 %v8300_v34  ;;  %v779_v8 = vsub.f32 %v7066_v51, %v8256_v20 }
 0x11a   :  { %v6969_v27 = vpop.eup %6968  ;;  %6974 = vrsqrt.f32 %v654_v18 }
 0x11b   :  { %v869_v7 = vmul.f32 %v6969_v27, %v773_v22  ;;  %v868_v56 = vmul.f32 %v6969_v27, %v772_v57  ;;  %2882 = vmatmul.mubr.bf16.gmra.mrb[52].mxu0 %v8310_v58  ;;  %v867_v39 = vmul.f32 %v6969_v27, %v771_v25  ;;  %v778_v27 = vsub.f32 %v7067_v0, %v8256_v20  ;;  %v7068_v57 = vld [vmem:[%s10863_s0 + $0x2e8] sm:$0xff]  ;;  %v6632_v0 = vld [vmem:[%s10864_s1 + $0x74] ss:$48 sps:$4 sm:$0xff]  }
 0x11c   :  { %v6971_v18 = vpop.eup %6970  ;;  %3268 = vmatmul.mubr.bf16.gmra.mrb[52].mxu1 %v8310_v58  ;;  %v780_v13 = vsub.f32 %v7068_v57, %v8260_v62  ;;  %v6630_v57 = vld [vmem:[%s10864_s1 + $0x70] ss:$48 sps:$4 sm:$0xff]  }
 0x11d   :  { %v871_v60 = vmul.f32 %v6971_v18, %v775_v50  ;;  %v870_v36 = vmul.f32 %v6971_v18, %v774_v15  ;;  %v872_v14 = vmul.f32 %v6971_v18, %v776_v2  ;;  %v7069_v15 = vld [vmem:[%s10863_s0 + $0x2f0] sm:$0xff]  ;;  %v7070_v50 = vld [vmem:[%s10863_s0 + $0x2f8] sm:$0xff] }
 0x11e   :  { %v781_v45 = vsub.f32 %v7069_v15, %v8260_v62  ;;  %v782_v63 = vsub.f32 %v7070_v50, %v8260_v62  ;;  %v7071_v18 = vld [vmem:[%s10863_s0 + $0x2d0] sm:$0xff] }
 0x11f   :  { %v8334_v26 = vpack.c.bf16 %v871_v60, %v868_v56  ;;  %v8336_v32 = vpack.c.bf16 %v872_v14, %v869_v7  ;;  %v8344_v17 = vpack.c.bf16 %v870_v36, %v867_v39  ;;  %v777_v23 = vsub.f32 %v7071_v18, %v8256_v20  ;;  %v6638_v15 = vld [vmem:[%s10864_s1 + $0xd4] ss:$48 sps:$4 sm:$0xff]   ;;  %v6636_v50 = vld [vmem:[%s10864_s1 + $0xd0] ss:$48 sps:$4 sm:$0xff]  }
 0x120   :  { %v10877_v20 = vmov 0   ;;  %v6642_v18 = vld [vmem:[%s10864_s1 + $0x130] ss:$48 sps:$4 sm:$0xff]  }
 0x121   :  { %10897 = vst [vmem:[#allocation7_spill] sm:$0xff] %v8334_v26  ;;  %2891 = vmatprep.mubr.bf16.mxu0 %v8334_v26  ;;  %3277 = vmatprep.mubr.bf16.mxu1 %v8334_v26  ;;  %10898 = vst [vmem:[#allocation8_spill] sm:$0xff] %v8344_v17 }
 0x122   :  { %v6973_v22 = vpop.eup %6972 }
 0x123   :  { %v875_v2 = vmul.f32 %v6973_v22, %v779_v8  ;;  %v874_v25 = vmul.f32 %v6973_v22, %v778_v27  ;;  %2892 = vmatmul.mubr.bf16.gmra.mrb[56].mxu0 %v8344_v17  ;;  %v873_v39 = vmul.f32 %v6973_v22, %v777_v23  ;;  %v6624_v8 = vld [vmem:[%s10864_s1 + $0x10] ss:$48 sps:$4 sm:$0xff]   ;;  %v6627_v22 = vld [vmem:[%s10864_s1 + $0x18] ss:$48 sps:$4 sm:$0xff]   ;;  %v6635_v27 = vld [vmem:[%s10864_s1 + $0x7c] ss:$48 sps:$4 sm:$0xff]  }
 0x124   :  { %v6975_v7 = vpop.eup %6974  ;;  %3278 = vmatmul.mubr.bf16.gmra.mrb[56].mxu1 %v8344_v17  ;;  %v6645_v23 = vld [vmem:[%s10864_s1 + $0x138] ss:$48 sps:$4 sm:$0xff]  }
 0x125   :  { %v877_v56 = vmul.f32 %v6975_v7, %v781_v45  ;;  %v876_v60 = vmul.f32 %v6975_v7, %v780_v13  ;;  %v878_v36 = vmul.f32 %v6975_v7, %v782_v63  ;;  %v6633_v13 = vld [vmem:[%s10864_s1 + $0x78] ss:$48 sps:$4 sm:$0xff]   ;;  %v6641_v45 = vld [vmem:[%s10864_s1 + $0xdc] ss:$48 sps:$4 sm:$0xff]  }
 0x126   :  { %v6639_v63 = vld [vmem:[%s10864_s1 + $0xd8] ss:$48 sps:$4 sm:$0xff]   ;;  %v6647_v7 = vld [vmem:[%s10864_s1 + $0x13c] ss:$48 sps:$4 sm:$0xff]  }
 0x127   :  { %v8368_v14 = vpack.c.bf16 %v877_v56, %v874_v25  ;;  %v8370_v62 = vpack.c.bf16 %v878_v36, %v875_v2  ;;  %v8374_v51 = vpack.c.bf16 %v876_v60, %v873_v39  ;;  %v6644_v2 = vld [vmem:[%s10864_s1 + $0x134] ss:$48 sps:$4 sm:$0xff]   ;;  %v6653_v56 = vld [vmem:[%s10864_s1 + $0x19c] ss:$48 sps:$4 sm:$0xff]   ;;  %v6648_v60 = vld [vmem:[%s10864_s1 + $0x190] ss:$48 sps:$4 sm:$0xff]  }
 0x128   :  { %v6650_v25 = vld [vmem:[%s10864_s1 + $0x194] ss:$48 sps:$4 sm:$0xff]   ;;  %v6651_v36 = vld [vmem:[%s10864_s1 + $0x198] ss:$48 sps:$4 sm:$0xff]  }
 0x129   :  { %10899 = vst [vmem:[#allocation9_spill] sm:$0xff] %v8368_v14  ;;  %2901 = vmatprep.mubr.bf16.mxu0 %v8368_v14  ;;  %3287 = vmatprep.mubr.bf16.mxu1 %v8368_v14  ;;  %10900 = vst [vmem:[#allocation10_spill] sm:$0xff] %v8374_v51  ;;  %v6656_v39 = vld [vmem:[%s10864_s1 + $0x1f4] ss:$48 sps:$4 sm:$0xff]  }
 0x12b   :  { %2902 = vmatmul.mubr.bf16.gmra.mrb[60].mxu0 %v8374_v51 }
 0x12c   :  { %3288 = vmatmul.mubr.bf16.gmra.mrb[60].mxu1 %v8374_v51  ;;  %2944 = vmatprep.mubr.bf16.mxu0 %v10877_v20 }
 0x12d   :  { %3330 = vmatprep.mubr.bf16.mxu1 %v10877_v20 }
 0x133   :  { %2945 = vmatmul.mubr.bf16.vlgmr.msra.gmra.mrb[0].mxu0 %v7688_v49 }
 0x134   :  { %3331 = vmatmul.mubr.bf16.vlgmr.msra.gmra.mrb[0].mxu1 %v7688_v49  ;;  %3492 = vmatpush1.bf16.msra.mxu0 %v6624_v8  ;;  %v6659_v8 = vld [vmem:[%s10864_s1 + $0x1fc] ss:$48 sps:$4 sm:$0xff]  }
 0x135   :  { %3878 = vmatpush1.bf16.msra.mxu1 %v6627_v22  ;;  %2954 = vmatprep.mubr.bf16.mxu0 %v10877_v20  ;;  %v6654_v22 = vld [vmem:[%s10864_s1 + $0x1f0] ss:$48 sps:$4 sm:$0xff]  }
 0x136   :  { %3340 = vmatprep.mubr.bf16.mxu1 %v10877_v20  ;;  %3493 = vmatprep.subr.bf16.mxu0 %v6632_v0  ;;  %v6657_v0 = vld [vmem:[%s10864_s1 + $0x1f8] ss:$48 sps:$4 sm:$0xff]  }
 0x137   :  { %3879 = vmatprep.subr.bf16.mxu1 %v6635_v27  ;;  %v6662_v27 = vld [vmem:[%s10864_s1 + $0x254] ss:$48 sps:$4 sm:$0xff]  }
 0x138   :  { %3494 = vmatpush1.bf16.msra.mxu0 %v6630_v57  ;;  %v6665_v57 = vld [vmem:[%s10864_s1 + $0x25c] ss:$48 sps:$4 sm:$0xff]  }
 0x139   :  { %3880 = vmatpush1.bf16.msra.mxu1 %v6633_v13  ;;  %3495 = vmatprep.subr.bf16.mxu0 %v6638_v15  ;;  %v6660_v13 = vld [vmem:[%s10864_s1 + $0x250] ss:$48 sps:$4 sm:$0xff]   ;;  %v6663_v15 = vld [vmem:[%s10864_s1 + $0x258] ss:$48 sps:$4 sm:$0xff]  }
 0x13a   :  { %3881 = vmatprep.subr.bf16.mxu1 %v6641_v45  ;;  %v6668_v45 = vld [vmem:[%s10864_s1 + $0x2b4] ss:$48 sps:$4 sm:$0xff]  }
 0x13b   :  { %2955 = vmatmul.mubr.bf16.gmra.mrb[4].mxu0 %v7758_v33 }
 0x13c   :  { %3341 = vmatmul.mubr.bf16.gmra.mrb[4].mxu1 %v7758_v33  ;;  %2964 = vmatprep.mubr.bf16.mxu0 %v10877_v20 }
 0x13d   :  { %3350 = vmatprep.mubr.bf16.mxu1 %v10877_v20  ;;  %3496 = vmatpush1.bf16.msra.mxu0 %v6636_v50  ;;  %v6671_v50 = vld [vmem:[%s10864_s1 + $0x2bc] ss:$48 sps:$4 sm:$0xff]  }
 0x13e   :  { %3882 = vmatpush1.bf16.msra.mxu1 %v6639_v63  ;;  %3497 = vmatprep.subr.bf16.mxu0 %v6644_v2  ;;  %v6666_v63 = vld [vmem:[%s10864_s1 + $0x2b0] ss:$48 sps:$4 sm:$0xff]   ;;  %v6669_v2 = vld [vmem:[%s10864_s1 + $0x2b8] ss:$48 sps:$4 sm:$0xff]  }
 0x13f   :  { %3883 = vmatprep.subr.bf16.mxu1 %v6647_v7  ;;  %v6674_v7 = vld [vmem:[%s10864_s1 + $0x314] ss:$48 sps:$4 sm:$0xff]  }
 0x141   :  { %3498 = vmatpush1.bf16.msra.mxu0 %v6642_v18  ;;  %v6677_v18 = vld [vmem:[%s10864_s1 + $0x31c] ss:$48 sps:$4 sm:$0xff]  }
 0x142   :  { %3884 = vmatpush1.bf16.msra.mxu1 %v6645_v23  ;;  %3499 = vmatprep.subr.bf16.mxu0 %v6650_v25  ;;  %v6672_v23 = vld [vmem:[%s10864_s1 + $0x310] ss:$48 sps:$4 sm:$0xff]   ;;  %v6675_v25 = vld [vmem:[%s10864_s1 + $0x318] ss:$48 sps:$4 sm:$0xff]  }
 0x143   :  { %3885 = vmatprep.subr.bf16.mxu1 %v6653_v56  ;;  %2965 = vmatmul.mubr.bf16.gmra.mrb[8].mxu0 %v7811_v6  ;;  %v6680_v56 = vld [vmem:[%s10864_s1 + $0x374] ss:$48 sps:$4 sm:$0xff]  }
 0x144   :  { %3351 = vmatmul.mubr.bf16.gmra.mrb[8].mxu1 %v7811_v6  ;;  %2974 = vmatprep.mubr.bf16.mxu0 %v10877_v20 }
 0x145   :  { %3360 = vmatprep.mubr.bf16.mxu1 %v10877_v20  ;;  %3500 = vmatpush1.bf16.msra.mxu0 %v6648_v60  ;;  %v6683_v60 = vld [vmem:[%s10864_s1 + $0x37c] ss:$48 sps:$4 sm:$0xff]  }
 0x146   :  { %3886 = vmatpush1.bf16.msra.mxu1 %v6651_v36  ;;  %3501 = vmatprep.subr.bf16.mxu0 %v6656_v39  ;;  %v6678_v36 = vld [vmem:[%s10864_s1 + $0x370] ss:$48 sps:$4 sm:$0xff]   ;;  %v6681_v39 = vld [vmem:[%s10864_s1 + $0x378] ss:$48 sps:$4 sm:$0xff]  }
 0x147   :  { %3887 = vmatprep.subr.bf16.mxu1 %v6659_v8  ;;  %v6686_v8 = vld [vmem:[%s10864_s1 + $0x3d4] ss:$48 sps:$4 sm:$0xff]  }
 0x149   :  { %3502 = vmatpush1.bf16.msra.mxu0 %v6654_v22  ;;  %v6689_v22 = vld [vmem:[%s10864_s1 + $0x3dc] ss:$48 sps:$4 sm:$0xff]  }
 0x14a   :  { %3888 = vmatpush1.bf16.msra.mxu1 %v6657_v0  ;;  %3503 = vmatprep.subr.bf16.mxu0 %v6662_v27  ;;  %v6684_v0 = vld [vmem:[%s10864_s1 + $0x3d0] ss:$48 sps:$4 sm:$0xff]   ;;  %v6687_v27 = vld [vmem:[%s10864_s1 + $0x3d8] ss:$48 sps:$4 sm:$0xff]  }
 0x14b   :  { %3889 = vmatprep.subr.bf16.mxu1 %v6665_v57  ;;  %2975 = vmatmul.mubr.bf16.gmra.mrb[12].mxu0 %v7883_v3  ;;  %v6692_v57 = vld [vmem:[%s10864_s1 + $0x434] ss:$48 sps:$4 sm:$0xff]  }
 0x14c   :  { %3361 = vmatmul.mubr.bf16.gmra.mrb[12].mxu1 %v7883_v3  ;;  %2984 = vmatprep.mubr.bf16.mxu0 %v10877_v20 }
 0x14d   :  { %3370 = vmatprep.mubr.bf16.mxu1 %v10877_v20  ;;  %3504 = vmatpush1.bf16.msra.mxu0 %v6660_v13  ;;  %v6695_v13 = vld [vmem:[%s10864_s1 + $0x43c] ss:$48 sps:$4 sm:$0xff]  }
 0x14e   :  { %3890 = vmatpush1.bf16.msra.mxu1 %v6663_v15  ;;  %3505 = vmatprep.subr.bf16.mxu0 %v6668_v45  ;;  %v6690_v15 = vld [vmem:[%s10864_s1 + $0x430] ss:$48 sps:$4 sm:$0xff]   ;;  %v6693_v45 = vld [vmem:[%s10864_s1 + $0x438] ss:$48 sps:$4 sm:$0xff]  }
 0x14f   :  { %3891 = vmatprep.subr.bf16.mxu1 %v6671_v50  ;;  %v6698_v50 = vld [vmem:[%s10864_s1 + $0x494] ss:$48 sps:$4 sm:$0xff]  }
 0x151   :  { %3506 = vmatpush1.bf16.msra.mxu0 %v6666_v63  ;;  %v6701_v63 = vld [vmem:[%s10864_s1 + $0x49c] ss:$48 sps:$4 sm:$0xff]  }
 0x152   :  { %3892 = vmatpush1.bf16.msra.mxu1 %v6669_v2  ;;  %3507 = vmatprep.subr.bf16.mxu0 %v6674_v7  ;;  %v6696_v2 = vld [vmem:[%s10864_s1 + $0x490] ss:$48 sps:$4 sm:$0xff]   ;;  %v6699_v7 = vld [vmem:[%s10864_s1 + $0x498] ss:$48 sps:$4 sm:$0xff]  }
 0x153   :  { %3893 = vmatprep.subr.bf16.mxu1 %v6677_v18  ;;  %2985 = vmatmul.mubr.bf16.gmra.mrb[16].mxu0 %v7952_v30  ;;  %v6704_v18 = vld [vmem:[%s10864_s1 + $0x4f4] ss:$48 sps:$4 sm:$0xff]  }
 0x154   :  { %3371 = vmatmul.mubr.bf16.gmra.mrb[16].mxu1 %v7952_v30  ;;  %2994 = vmatprep.mubr.bf16.mxu0 %v10877_v20 }
 0x155   :  { %3380 = vmatprep.mubr.bf16.mxu1 %v10877_v20  ;;  %3508 = vmatpush1.bf16.msra.mxu0 %v6672_v23  ;;  %v6707_v23 = vld [vmem:[%s10864_s1 + $0x4fc] ss:$48 sps:$4 sm:$0xff]  }
 0x156   :  { %3894 = vmatpush1.bf16.msra.mxu1 %v6675_v25  ;;  %3509 = vmatprep.subr.bf16.mxu0 %v6680_v56  ;;  %v6702_v25 = vld [vmem:[%s10864_s1 + $0x4f0] ss:$48 sps:$4 sm:$0xff]   ;;  %v6705_v56 = vld [vmem:[%s10864_s1 + $0x4f8] ss:$48 sps:$4 sm:$0xff]  }
 0x157   :  { %3895 = vmatprep.subr.bf16.mxu1 %v6683_v60  ;;  %v6710_v60 = vld [vmem:[%s10864_s1 + $0x554] ss:$48 sps:$4 sm:$0xff]  }
 0x159   :  { %3510 = vmatpush1.bf16.msra.mxu0 %v6678_v36  ;;  %v6713_v36 = vld [vmem:[%s10864_s1 + $0x55c] ss:$48 sps:$4 sm:$0xff]  }
 0x15a   :  { %3896 = vmatpush1.bf16.msra.mxu1 %v6681_v39  ;;  %3511 = vmatprep.subr.bf16.mxu0 %v6686_v8  ;;  %v6708_v39 = vld [vmem:[%s10864_s1 + $0x550] ss:$48 sps:$4 sm:$0xff]   ;;  %v6711_v8 = vld [vmem:[%s10864_s1 + $0x558] ss:$48 sps:$4 sm:$0xff]  }
 0x15b   :  { %3897 = vmatprep.subr.bf16.mxu1 %v6689_v22  ;;  %2995 = vmatmul.mubr.bf16.gmra.mrb[20].mxu0 %v7990_v29  ;;  %v6716_v22 = vld [vmem:[%s10864_s1 + $0x5b4] ss:$48 sps:$4 sm:$0xff]  }
 0x15c   :  { %3381 = vmatmul.mubr.bf16.gmra.mrb[20].mxu1 %v7990_v29  ;;  %3004 = vmatprep.mubr.bf16.mxu0 %v10877_v20 }
 0x15d   :  { %3390 = vmatprep.mubr.bf16.mxu1 %v10877_v20  ;;  %3512 = vmatpush1.bf16.msra.mxu0 %v6684_v0  ;;  %v6719_v0 = vld [vmem:[%s10864_s1 + $0x5bc] ss:$48 sps:$4 sm:$0xff]  }
 0x15e   :  { %3898 = vmatpush1.bf16.msra.mxu1 %v6687_v27  ;;  %3513 = vmatprep.subr.bf16.mxu0 %v6692_v57  ;;  %v6714_v27 = vld [vmem:[%s10864_s1 + $0x5b0] ss:$48 sps:$4 sm:$0xff]   ;;  %v6717_v57 = vld [vmem:[%s10864_s1 + $0x5b8] ss:$48 sps:$4 sm:$0xff]  }
 0x15f   :  { %3899 = vmatprep.subr.bf16.mxu1 %v6695_v13  ;;  %v6722_v13 = vld [vmem:[%s10864_s1 + $0x614] ss:$48 sps:$4 sm:$0xff]  }
 0x161   :  { %3514 = vmatpush1.bf16.msra.mxu0 %v6690_v15  ;;  %v6725_v15 = vld [vmem:[%s10864_s1 + $0x61c] ss:$48 sps:$4 sm:$0xff]  }
 0x162   :  { %3900 = vmatpush1.bf16.msra.mxu1 %v6693_v45  ;;  %3515 = vmatprep.subr.bf16.mxu0 %v6698_v50  ;;  %v6720_v45 = vld [vmem:[%s10864_s1 + $0x610] ss:$48 sps:$4 sm:$0xff]   ;;  %v6723_v50 = vld [vmem:[%s10864_s1 + $0x618] ss:$48 sps:$4 sm:$0xff]  }
 0x163   :  { %3901 = vmatprep.subr.bf16.mxu1 %v6701_v63  ;;  %3005 = vmatmul.mubr.bf16.gmra.mrb[24].mxu0 %v8032_v53  ;;  %v6728_v63 = vld [vmem:[%s10864_s1 + $0x674] ss:$48 sps:$4 sm:$0xff]  }
 0x164   :  { %3391 = vmatmul.mubr.bf16.gmra.mrb[24].mxu1 %v8032_v53  ;;  %3014 = vmatprep.mubr.bf16.mxu0 %v10877_v20 }
 0x165   :  { %3400 = vmatprep.mubr.bf16.mxu1 %v10877_v20  ;;  %3516 = vmatpush1.bf16.msra.mxu0 %v6696_v2  ;;  %v6731_v2 = vld [vmem:[%s10864_s1 + $0x67c] ss:$48 sps:$4 sm:$0xff]  }
 0x166   :  { %3902 = vmatpush1.bf16.msra.mxu1 %v6699_v7  ;;  %3517 = vmatprep.subr.bf16.mxu0 %v6704_v18  ;;  %v6726_v7 = vld [vmem:[%s10864_s1 + $0x670] ss:$48 sps:$4 sm:$0xff]   ;;  %v6729_v18 = vld [vmem:[%s10864_s1 + $0x678] ss:$48 sps:$4 sm:$0xff]  }
 0x167   :  { %3903 = vmatprep.subr.bf16.mxu1 %v6707_v23  ;;  %v6734_v23 = vld [vmem:[%s10864_s1 + $0x6d4] ss:$48 sps:$4 sm:$0xff]  }
 0x169   :  { %3518 = vmatpush1.bf16.msra.mxu0 %v6702_v25  ;;  %v6737_v25 = vld [vmem:[%s10864_s1 + $0x6dc] ss:$48 sps:$4 sm:$0xff]  }
 0x16a   :  { %3904 = vmatpush1.bf16.msra.mxu1 %v6705_v56  ;;  %3519 = vmatprep.subr.bf16.mxu0 %v6710_v60  ;;  %v6732_v56 = vld [vmem:[%s10864_s1 + $0x6d0] ss:$48 sps:$4 sm:$0xff]   ;;  %v6735_v60 = vld [vmem:[%s10864_s1 + $0x6d8] ss:$48 sps:$4 sm:$0xff]  }
 0x16b   :  { %3905 = vmatprep.subr.bf16.mxu1 %v6713_v36  ;;  %3015 = vmatmul.mubr.bf16.gmra.mrb[28].mxu0 %v8074_v47  ;;  %v6740_v36 = vld [vmem:[%s10864_s1 + $0x734] ss:$48 sps:$4 sm:$0xff]  }
 0x16c   :  { %3401 = vmatmul.mubr.bf16.gmra.mrb[28].mxu1 %v8074_v47  ;;  %3024 = vmatprep.mubr.bf16.mxu0 %v10877_v20 }
 0x16d   :  { %3410 = vmatprep.mubr.bf16.mxu1 %v10877_v20  ;;  %3520 = vmatpush1.bf16.msra.mxu0 %v6708_v39  ;;  %v6743_v39 = vld [vmem:[%s10864_s1 + $0x73c] ss:$48 sps:$4 sm:$0xff]  }
 0x16e   :  { %3906 = vmatpush1.bf16.msra.mxu1 %v6711_v8  ;;  %3521 = vmatprep.subr.bf16.mxu0 %v6716_v22  ;;  %v6738_v8 = vld [vmem:[%s10864_s1 + $0x730] ss:$48 sps:$4 sm:$0xff]   ;;  %v6741_v22 = vld [vmem:[%s10864_s1 + $0x738] ss:$48 sps:$4 sm:$0xff]  }
 0x16f   :  { %3907 = vmatprep.subr.bf16.mxu1 %v6719_v0  ;;  %v6746_v0 = vld [vmem:[%s10864_s1 + $0x794] ss:$48 sps:$4 sm:$0xff]  }
 0x171   :  { %3522 = vmatpush1.bf16.msra.mxu0 %v6714_v27  ;;  %v6749_v27 = vld [vmem:[%s10864_s1 + $0x79c] ss:$48 sps:$4 sm:$0xff]  }
 0x172   :  { %3908 = vmatpush1.bf16.msra.mxu1 %v6717_v57  ;;  %3684 = vmatprep.subr.bf16.mxu0 %v6722_v13  ;;  %v6744_v57 = vld [vmem:[%s10864_s1 + $0x790] ss:$48 sps:$4 sm:$0xff]   ;;  %v6747_v13 = vld [vmem:[%s10864_s1 + $0x798] ss:$48 sps:$4 sm:$0xff]  }
 0x173   :  { %4070 = vmatprep.subr.bf16.mxu1 %v6725_v15  ;;  %3025 = vmatmul.mubr.bf16.gmra.mrb[32].mxu0 %v8116_v55  ;;  %v6752_v15 = vld [vmem:[%s10864_s1 + $0x7f4] ss:$48 sps:$4 sm:$0xff]  }
 0x174   :  { %3411 = vmatmul.mubr.bf16.gmra.mrb[32].mxu1 %v8116_v55  ;;  %3034 = vmatprep.mubr.bf16.mxu0 %v10877_v20 }
 0x175   :  { %3420 = vmatprep.mubr.bf16.mxu1 %v10877_v20 }
 0x17b   :  { %3035 = vmatmul.mubr.bf16.gmra.mrb[36].mxu0 %v8158_v41 }
 0x17c   :  { %3421 = vmatmul.mubr.bf16.gmra.mrb[36].mxu1 %v8158_v41  ;;  %3044 = vmatprep.mubr.bf16.mxu0 %v10877_v20 }
 0x17d   :  { %3430 = vmatprep.mubr.bf16.mxu1 %v10877_v20 }
 0x183   :  { %3045 = vmatmul.mubr.bf16.gmra.mrb[40].mxu0 %v8200_v1 }
 0x184   :  { %3431 = vmatmul.mubr.bf16.gmra.mrb[40].mxu1 %v8200_v1  ;;  %3054 = vmatprep.mubr.bf16.mxu0 %v10877_v20 }
 0x185   :  { %3440 = vmatprep.mubr.bf16.mxu1 %v10877_v20 }
 0x18b   :  { %3055 = vmatmul.mubr.bf16.gmra.mrb[44].mxu0 %v8242_v10 }
 0x18c   :  { %3441 = vmatmul.mubr.bf16.gmra.mrb[44].mxu1 %v8242_v10  ;;  %3064 = vmatprep.mubr.bf16.mxu0 %v10877_v20 }
 0x18d   :  { %3450 = vmatprep.mubr.bf16.mxu1 %v10877_v20 }
 0x193   :  { %3065 = vmatmul.mubr.bf16.gmra.mrb[48].mxu0 %v8280_v40 }
 0x194   :  { %3451 = vmatmul.mubr.bf16.gmra.mrb[48].mxu1 %v8280_v40  ;;  %3074 = vmatprep.mubr.bf16.mxu0 %v10877_v20 }
 0x195   :  { %3460 = vmatprep.mubr.bf16.mxu1 %v10877_v20 }
 0x19b   :  { %3075 = vmatmul.mubr.bf16.gmra.mrb[52].mxu0 %v8302_v5 }
 0x19c   :  { %3461 = vmatmul.mubr.bf16.gmra.mrb[52].mxu1 %v8302_v5  ;;  %3084 = vmatprep.mubr.bf16.mxu0 %v10877_v20 }
 0x19d   :  { %3470 = vmatprep.mubr.bf16.mxu1 %v10877_v20 }
 0x1a3   :  { %3085 = vmatmul.mubr.bf16.gmra.mrb[56].mxu0 %v8336_v32 }
 0x1a4   :  { %3471 = vmatmul.mubr.bf16.gmra.mrb[56].mxu1 %v8336_v32  ;;  %3094 = vmatprep.mubr.bf16.mxu0 %v10877_v20 }
 0x1a5   :  { %3480 = vmatprep.mubr.bf16.mxu1 %v10877_v20 }
 0x1ab   :  { %3095 = vmatmul.mubr.bf16.gmra.mrb[60].mxu0 %v8370_v62 }
 0x1ac   :  { %3481 = vmatmul.mubr.bf16.gmra.mrb[60].mxu1 %v8370_v62  ;;  %3523 = vmatprep.mubr.bf16.mxu0 %v7667_v31 }
 0x1ad   :  { %3909 = vmatprep.mubr.bf16.mxu1 %v7667_v31 }
 0x1b3   :  { %3524 = vmatmul.mubr.bf16.vlgmr.msra.gmra.mrb[64].mxu0 %v7673_v35 }
 0x1b4   :  { %3910 = vmatmul.mubr.bf16.vlgmr.msra.gmra.mrb[64].mxu1 %v7673_v35  ;;  %3685 = vmatpush1.bf16.msra.mxu0 %v6720_v45  ;;  %v6755_v45 = vld [vmem:[%s10864_s1 + $0x7fc] ss:$48 sps:$4 sm:$0xff]  }
 0x1b5   :  { %4071 = vmatpush1.bf16.msra.mxu1 %v6723_v50  ;;  %3533 = vmatprep.mubr.bf16.mxu0 %v7708_v61  ;;  %v6750_v50 = vld [vmem:[%s10864_s1 + $0x7f0] ss:$48 sps:$4 sm:$0xff]  }
 0x1b6   :  { %3919 = vmatprep.mubr.bf16.mxu1 %v7708_v61  ;;  %3686 = vmatprep.subr.bf16.mxu0 %v6728_v63  ;;  %v6753_v63 = vld [vmem:[%s10864_s1 + $0x7f8] ss:$48 sps:$4 sm:$0xff]  }
 0x1b7   :  { %4072 = vmatprep.subr.bf16.mxu1 %v6731_v2  ;;  %v6758_v2 = vld [vmem:[%s10864_s1 + $0x854] ss:$48 sps:$4 sm:$0xff]  }
 0x1b8   :  { %3687 = vmatpush1.bf16.msra.mxu0 %v6726_v7  ;;  %v6761_v7 = vld [vmem:[%s10864_s1 + $0x85c] ss:$48 sps:$4 sm:$0xff]  }
 0x1b9   :  { %4073 = vmatpush1.bf16.msra.mxu1 %v6729_v18  ;;  %3688 = vmatprep.subr.bf16.mxu0 %v6734_v23  ;;  %v6756_v18 = vld [vmem:[%s10864_s1 + $0x850] ss:$48 sps:$4 sm:$0xff]   ;;  %v6759_v23 = vld [vmem:[%s10864_s1 + $0x858] ss:$48 sps:$4 sm:$0xff]  }
 0x1ba   :  { %4074 = vmatprep.subr.bf16.mxu1 %v6737_v25  ;;  %v6764_v25 = vld [vmem:[%s10864_s1 + $0x8b4] ss:$48 sps:$4 sm:$0xff]  }
 0x1bb   :  { %3534 = vmatmul.mubr.bf16.gmra.mrb[68].mxu0 %v7737_v12 }
 0x1bc   :  { %3920 = vmatmul.mubr.bf16.gmra.mrb[68].mxu1 %v7737_v12  ;;  %3543 = vmatprep.mubr.bf16.mxu0 %v7776_v48 }
 0x1bd   :  { %3929 = vmatprep.mubr.bf16.mxu1 %v7776_v48  ;;  %3689 = vmatpush1.bf16.msra.mxu0 %v6732_v56  ;;  %v6767_v56 = vld [vmem:[%s10864_s1 + $0x8bc] ss:$48 sps:$4 sm:$0xff]  }
 0x1be   :  { %4075 = vmatpush1.bf16.msra.mxu1 %v6735_v60  ;;  %3690 = vmatprep.subr.bf16.mxu0 %v6740_v36  ;;  %v6762_v60 = vld [vmem:[%s10864_s1 + $0x8b0] ss:$48 sps:$4 sm:$0xff]   ;;  %v6765_v36 = vld [vmem:[%s10864_s1 + $0x8b8] ss:$48 sps:$4 sm:$0xff]  }
 0x1bf   :  { %4076 = vmatprep.subr.bf16.mxu1 %v6743_v39  ;;  %v6770_v39 = vld [vmem:[%s10864_s1 + $0x24] ss:$48 sps:$4 sm:$0xff]  }
 0x1c1   :  { %3691 = vmatpush1.bf16.msra.mxu0 %v6738_v8  ;;  %v6773_v8 = vld [vmem:[%s10864_s1 + $0x2c] ss:$48 sps:$4 sm:$0xff]  }
 0x1c2   :  { %4077 = vmatpush1.bf16.msra.mxu1 %v6741_v22  ;;  %3692 = vmatprep.subr.bf16.mxu0 %v6746_v0  ;;  %v1219_v22 = vlaneseq }
 0x1c3   :  { %4078 = vmatprep.subr.bf16.mxu1 %v6749_v27  ;;  %3544 = vmatmul.mubr.bf16.gmra.mrb[72].mxu0 %v7805_v4 }
 0x1c4   :  { %3930 = vmatmul.mubr.bf16.gmra.mrb[72].mxu1 %v7805_v4  ;;  %3553 = vmatprep.mubr.bf16.mxu0 %v7848_v43  ;;  %v8770_v0 = vshrl.u32 %v1219_v22, 7 }
 0x1c5   :  { %3939 = vmatprep.mubr.bf16.mxu1 %v7848_v43  ;;  %3693 = vmatpush1.bf16.msra.mxu0 %v6744_v57 }
 0x1c6   :  { %4079 = vmatpush1.bf16.msra.mxu1 %v6747_v13  ;;  %3694 = vmatprep.subr.bf16.mxu0 %v6752_v15  ;;  %v10876_v27 = vsub.s32 0, %v8770_v0  ;;  %v10875_v57 = vsub.s32 2, %v8770_v0  ;;  %v1215_v13 = vld [vmem:[%s10865_s2] sm:$0xff]  ;;  %v10880_v15 = vsub.s32 1, %v8770_v0 }
 0x1c7   :  { %4080 = vmatprep.subr.bf16.mxu1 %v6755_v45  ;;  %v10879_v45 = vsub.s32 3, %v8770_v0 }
 0x1c9   :  { %3695 = vmatpush1.bf16.msra.mxu0 %v6750_v50  ;;  %v10901_v50 = vld [vmem:[#allocation3_spill] sm:$0xff] }
 0x1ca   :  { %4081 = vmatpush1.bf16.msra.mxu1 %v6753_v63  ;;  %3696 = vmatprep.subr.bf16.mxu0 %v6758_v2  ;;  %v8785_v63 = vrot.slane %v1215_v13, %v10876_v27  ;;  %v8789_v2 = vrot.slane %v1215_v13, %v10875_v57 }
 0x1cb   :  { %4082 = vmatprep.subr.bf16.mxu1 %v6761_v7  ;;  %3554 = vmatmul.mubr.bf16.gmra.mrb[76].mxu0 %v7877_v52  ;;  %v10902_v7 = vld [vmem:[#allocation4_spill] sm:$0xff] }
 0x1cc   :  { %3940 = vmatmul.mubr.bf16.gmra.mrb[76].mxu1 %v7877_v52  ;;  %3563 = vmatprep.mubr.bf16.mxu0 %v7920_v42 }
 0x1cd   :  { %3949 = vmatprep.mubr.bf16.mxu1 %v7920_v42  ;;  %3697 = vmatpush1.bf16.msra.mxu0 %v6756_v18  ;;  %v8795_v18 = vrot.slane %v1215_v13, %v10880_v15 }
 0x1ce   :  { %4083 = vmatpush1.bf16.msra.mxu1 %v6759_v23  ;;  %3698 = vmatprep.subr.bf16.mxu0 %v6764_v25  ;;  %v8799_v23 = vrot.slane %v1215_v13, %v10879_v45 }
 0x1cf   :  { %4084 = vmatprep.subr.bf16.mxu1 %v6767_v56 }
 0x1d1   :  { %3699 = vmatpush1.bf16.msra.mxu0 %v6762_v60 }
 0x1d2   :  { %4085 = vmatpush1.bf16.msra.mxu1 %v6765_v36  ;;  %4263 = vmatprep.subr.bf16.mxu0 %v6770_v39 }
 0x1d3   :  { %4649 = vmatprep.subr.bf16.mxu1 %v6773_v8  ;;  %3564 = vmatmul.mubr.bf16.gmra.mrb[80].mxu0 %v7949_v59 }
 0x1d4   :  { %3950 = vmatmul.mubr.bf16.gmra.mrb[80].mxu1 %v7949_v59  ;;  %3573 = vmatprep.mubr.bf16.mxu0 %v7970_v9 }
 0x1d5   :  { %3959 = vmatprep.mubr.bf16.mxu1 %v7970_v9 }
 0x1db   :  { %3574 = vmatmul.mubr.bf16.gmra.mrb[84].mxu0 %v7987_v54 }
 0x1dc   :  { %3960 = vmatmul.mubr.bf16.gmra.mrb[84].mxu1 %v7987_v54  ;;  %3583 = vmatprep.mubr.bf16.mxu0 %v8012_v16 }
 0x1dd   :  { %3969 = vmatprep.mubr.bf16.mxu1 %v8012_v16 }
 0x1e3   :  { %3584 = vmatmul.mubr.bf16.gmra.mrb[88].mxu0 %v8029_v44 }
 0x1e4   :  { %3970 = vmatmul.mubr.bf16.gmra.mrb[88].mxu1 %v8029_v44  ;;  %3593 = vmatprep.mubr.bf16.mxu0 %v8054_v11 }
 0x1e5   :  { %3979 = vmatprep.mubr.bf16.mxu1 %v8054_v11 }
 0x1eb   :  { %3594 = vmatmul.mubr.bf16.gmra.mrb[92].mxu0 %v8071_v37 }
 0x1ec   :  { %3980 = vmatmul.mubr.bf16.gmra.mrb[92].mxu1 %v8071_v37  ;;  %3603 = vmatprep.mubr.bf16.mxu0 %v8096_v38 }
 0x1ed   :  { %3989 = vmatprep.mubr.bf16.mxu1 %v8096_v38 }
 0x1f3   :  { %3604 = vmatmul.mubr.bf16.gmra.mrb[96].mxu0 %v8113_v46 }
 0x1f4   :  { %3990 = vmatmul.mubr.bf16.gmra.mrb[96].mxu1 %v8113_v46  ;;  %3613 = vmatprep.mubr.bf16.mxu0 %v8138_v24 }
 0x1f5   :  { %3999 = vmatprep.mubr.bf16.mxu1 %v8138_v24 }
 0x1fb   :  { %3614 = vmatmul.mubr.bf16.gmra.mrb[100].mxu0 %v8155_v19 }
 0x1fc   :  { %4000 = vmatmul.mubr.bf16.gmra.mrb[100].mxu1 %v8155_v19  ;;  %3623 = vmatprep.mubr.bf16.mxu0 %v8180_v21 }
 0x1fd   :  { %4009 = vmatprep.mubr.bf16.mxu1 %v8180_v21 }
 0x203   :  { %3624 = vmatmul.mubr.bf16.gmra.mrb[104].mxu0 %v10901_v50 }
 0x204   :  { %4010 = vmatmul.mubr.bf16.gmra.mrb[104].mxu1 %v10901_v50  ;;  %3633 = vmatprep.mubr.bf16.mxu0 %v10902_v7 }
 0x205   :  { %4019 = vmatprep.mubr.bf16.mxu1 %v10902_v7 }
 0x206   :  { %v2946_v25 = vpop.f32.mrb[0].mxu0 }
 0x207   :  { %v3332_v56 = vpop.f32.mrb[0].mxu1  ;;  %v5711_v60 = vadd.f32 %v2946_v25, %v8785_v63  ;;  %v2948_v39 = vpop.f32.mrb[1].mxu0 }
 0x208   :  { %v5775_v36 = vadd.f32 %v3332_v56, %v8789_v2  ;;  %v3334_v8 = vpop.f32.mrb[1].mxu1  ;;  %v5712_v22 = vadd.f32 %v2948_v39, %v8795_v18  ;;  %v2950_v27 = vpop.f32.mrb[2].mxu0 }
 0x209   :  { %v5776_v57 = vadd.f32 %v3334_v8, %v8799_v23  ;;  %v3336_v20 = vpop.f32.mrb[2].mxu1  ;;  %5035 = vst [vmem:[%s10866_s3] sm:$0xff] %v5711_v60  ;;  %v5713_v13 = vadd.f32 %v2950_v27, %v8785_v63  ;;  %v2952_v56 = vpop.f32.mrb[3].mxu0  ;;  %v10904_v27 = vld [vmem:[#allocation6_spill] sm:$0xff] }
 0x20a   :  { %5037 = vst [vmem:[%s10866_s3 + $0x10] sm:$0xff] %v5775_v36  ;;  %v5777_v25 = vadd.f32 %v3336_v20, %v8789_v2  ;;  %v3338_v45 = vpop.f32.mrb[3].mxu1  ;;  %5036 = vst [vmem:[%s10866_s3 + $0x8] sm:$0xff] %v5712_v22  ;;  %v5714_v60 = vadd.f32 %v2952_v56, %v8795_v18  ;;  %v10903_v20 = vld [vmem:[#allocation5_spill] sm:$0xff] }
 0x20b   :  { %5038 = vst [vmem:[%s10866_s3 + $0x18] sm:$0xff] %v5776_v57  ;;  %v5778_v39 = vadd.f32 %v3338_v45, %v8799_v23  ;;  %5047 = vst [vmem:[%s10866_s3 + $0x60] sm:$0xff] %v5713_v13  ;;  %3634 = vmatmul.mubr.bf16.gmra.mrb[108].mxu0 %v10903_v20 }
 0x20c   :  { %5049 = vst [vmem:[%s10866_s3 + $0x70] sm:$0xff] %v5777_v25  ;;  %4020 = vmatmul.mubr.bf16.gmra.mrb[108].mxu1 %v10903_v20  ;;  %5048 = vst [vmem:[%s10866_s3 + $0x68] sm:$0xff] %v5714_v60  ;;  %3643 = vmatprep.mubr.bf16.mxu0 %v10904_v27 }
 0x20d   :  { %5050 = vst [vmem:[%s10866_s3 + $0x78] sm:$0xff] %v5778_v39  ;;  %4029 = vmatprep.mubr.bf16.mxu1 %v10904_v27 }
 0x20e   :  { %v2956_v57 = vpop.f32.mrb[4].mxu0 }
 0x20f   :  { %v3342_v45 = vpop.f32.mrb[4].mxu1  ;;  %v5715_v36 = vadd.f32 %v2956_v57, %v8785_v63  ;;  %v2958_v22 = vpop.f32.mrb[5].mxu0 }
 0x210   :  { %v5779_v8 = vadd.f32 %v3342_v45, %v8789_v2  ;;  %v3344_v13 = vpop.f32.mrb[5].mxu1  ;;  %v5716_v25 = vadd.f32 %v2958_v22, %v8795_v18  ;;  %v2960_v60 = vpop.f32.mrb[6].mxu0 }
 0x211   :  { %v5780_v56 = vadd.f32 %v3344_v13, %v8799_v23  ;;  %v3346_v15 = vpop.f32.mrb[6].mxu1  ;;  %5059 = vst [vmem:[%s10866_s3 + $0xc0] sm:$0xff] %v5715_v36  ;;  %v5717_v39 = vadd.f32 %v2960_v60, %v8785_v63  ;;  %v2962_v45 = vpop.f32.mrb[7].mxu0 }
 0x212   :  { %5061 = vst [vmem:[%s10866_s3 + $0xd0] sm:$0xff] %v5779_v8  ;;  %v5781_v57 = vadd.f32 %v3346_v15, %v8789_v2  ;;  %v3348_v27 = vpop.f32.mrb[7].mxu1  ;;  %5060 = vst [vmem:[%s10866_s3 + $0xc8] sm:$0xff] %v5716_v25  ;;  %v5718_v36 = vadd.f32 %v2962_v45, %v8795_v18 }
 0x213   :  { %5062 = vst [vmem:[%s10866_s3 + $0xd8] sm:$0xff] %v5780_v56  ;;  %v5782_v22 = vadd.f32 %v3348_v27, %v8799_v23  ;;  %5071 = vst [vmem:[%s10866_s3 + $0x120] sm:$0xff] %v5717_v39  ;;  %3644 = vmatmul.mubr.bf16.gmra.mrb[112].mxu0 %v8277_v28 }
 0x214   :  { %5073 = vst [vmem:[%s10866_s3 + $0x130] sm:$0xff] %v5781_v57  ;;  %4030 = vmatmul.mubr.bf16.gmra.mrb[112].mxu1 %v8277_v28  ;;  %5072 = vst [vmem:[%s10866_s3 + $0x128] sm:$0xff] %v5718_v36  ;;  %3653 = vmatprep.mubr.bf16.mxu0 %v8300_v34 }
 0x215   :  { %5074 = vst [vmem:[%s10866_s3 + $0x138] sm:$0xff] %v5782_v22  ;;  %4039 = vmatprep.mubr.bf16.mxu1 %v8300_v34 }
 0x216   :  { %v2966_v15 = vpop.f32.mrb[8].mxu0 }
 0x217   :  { %v3352_v27 = vpop.f32.mrb[8].mxu1  ;;  %v5719_v8 = vadd.f32 %v2966_v15, %v8785_v63  ;;  %v2968_v25 = vpop.f32.mrb[9].mxu0 }
 0x218   :  { %v5783_v13 = vadd.f32 %v3352_v27, %v8789_v2  ;;  %v3354_v56 = vpop.f32.mrb[9].mxu1  ;;  %v5720_v60 = vadd.f32 %v2968_v25, %v8795_v18  ;;  %v2970_v57 = vpop.f32.mrb[10].mxu0 }
 0x219   :  { %v5784_v39 = vadd.f32 %v3354_v56, %v8799_v23  ;;  %v3356_v45 = vpop.f32.mrb[10].mxu1  ;;  %5083 = vst [vmem:[%s10866_s3 + $0x180] sm:$0xff] %v5719_v8  ;;  %v5721_v36 = vadd.f32 %v2970_v57, %v8785_v63  ;;  %v2972_v15 = vpop.f32.mrb[11].mxu0 }
 0x21a   :  { %5085 = vst [vmem:[%s10866_s3 + $0x190] sm:$0xff] %v5783_v13  ;;  %v5785_v22 = vadd.f32 %v3356_v45, %v8789_v2  ;;  %v3358_v27 = vpop.f32.mrb[11].mxu1  ;;  %5084 = vst [vmem:[%s10866_s3 + $0x188] sm:$0xff] %v5720_v60  ;;  %v5722_v8 = vadd.f32 %v2972_v15, %v8795_v18 }
 0x21b   :  { %5086 = vst [vmem:[%s10866_s3 + $0x198] sm:$0xff] %v5784_v39  ;;  %v5786_v25 = vadd.f32 %v3358_v27, %v8799_v23  ;;  %5095 = vst [vmem:[%s10866_s3 + $0x1e0] sm:$0xff] %v5721_v36  ;;  %3654 = vmatmul.mubr.bf16.gmra.mrb[116].mxu0 %v8310_v58 }
 0x21c   :  { %5097 = vst [vmem:[%s10866_s3 + $0x1f0] sm:$0xff] %v5785_v22  ;;  %4040 = vmatmul.mubr.bf16.gmra.mrb[116].mxu1 %v8310_v58  ;;  %5096 = vst [vmem:[%s10866_s3 + $0x1e8] sm:$0xff] %v5722_v8  ;;  %3663 = vmatprep.mubr.bf16.mxu0 %v8334_v26 }
 0x21d   :  { %5098 = vst [vmem:[%s10866_s3 + $0x1f8] sm:$0xff] %v5786_v25  ;;  %4049 = vmatprep.mubr.bf16.mxu1 %v8334_v26 }
 0x21e   :  { %v2976_v13 = vpop.f32.mrb[12].mxu0 }
 0x21f   :  { %v3362_v56 = vpop.f32.mrb[12].mxu1  ;;  %v5723_v60 = vadd.f32 %v2976_v13, %v8785_v63  ;;  %v2978_v57 = vpop.f32.mrb[13].mxu0 }
 0x220   :  { %v5787_v39 = vadd.f32 %v3362_v56, %v8789_v2  ;;  %v3364_v45 = vpop.f32.mrb[13].mxu1  ;;  %v5724_v36 = vadd.f32 %v2978_v57, %v8795_v18  ;;  %v2980_v15 = vpop.f32.mrb[14].mxu0 }
 0x221   :  { %v5788_v22 = vadd.f32 %v3364_v45, %v8799_v23  ;;  %v3366_v27 = vpop.f32.mrb[14].mxu1  ;;  %5107 = vst [vmem:[%s10866_s3 + $0x240] sm:$0xff] %v5723_v60  ;;  %v5725_v8 = vadd.f32 %v2980_v15, %v8785_v63  ;;  %v2982_v13 = vpop.f32.mrb[15].mxu0 }
 0x222   :  { %5109 = vst [vmem:[%s10866_s3 + $0x250] sm:$0xff] %v5787_v39  ;;  %v5789_v25 = vadd.f32 %v3366_v27, %v8789_v2  ;;  %v3368_v56 = vpop.f32.mrb[15].mxu1  ;;  %5108 = vst [vmem:[%s10866_s3 + $0x248] sm:$0xff] %v5724_v36  ;;  %v5726_v60 = vadd.f32 %v2982_v13, %v8795_v18 }
 0x223   :  { %5110 = vst [vmem:[%s10866_s3 + $0x258] sm:$0xff] %v5788_v22  ;;  %v5790_v57 = vadd.f32 %v3368_v56, %v8799_v23  ;;  %5119 = vst [vmem:[%s10866_s3 + $0x2a0] sm:$0xff] %v5725_v8  ;;  %3664 = vmatmul.mubr.bf16.gmra.mrb[120].mxu0 %v8344_v17 }
 0x224   :  { %5121 = vst [vmem:[%s10866_s3 + $0x2b0] sm:$0xff] %v5789_v25  ;;  %4050 = vmatmul.mubr.bf16.gmra.mrb[120].mxu1 %v8344_v17  ;;  %5120 = vst [vmem:[%s10866_s3 + $0x2a8] sm:$0xff] %v5726_v60  ;;  %3673 = vmatprep.mubr.bf16.mxu0 %v8368_v14 }
 0x225   :  { %5122 = vst [vmem:[%s10866_s3 + $0x2b8] sm:$0xff] %v5790_v57  ;;  %4059 = vmatprep.mubr.bf16.mxu1 %v8368_v14 }
 0x226   :  { %v2986_v39 = vpop.f32.mrb[16].mxu0 }
 0x227   :  { %v3372_v45 = vpop.f32.mrb[16].mxu1  ;;  %v5727_v36 = vadd.f32 %v2986_v39, %v8785_v63  ;;  %v2988_v15 = vpop.f32.mrb[17].mxu0 }
 0x228   :  { %v5791_v22 = vadd.f32 %v3372_v45, %v8789_v2  ;;  %v3374_v27 = vpop.f32.mrb[17].mxu1  ;;  %v5728_v8 = vadd.f32 %v2988_v15, %v8795_v18  ;;  %v2990_v13 = vpop.f32.mrb[18].mxu0 }
 0x229   :  { %v5792_v25 = vadd.f32 %v3374_v27, %v8799_v23  ;;  %v3376_v56 = vpop.f32.mrb[18].mxu1  ;;  %5131 = vst [vmem:[%s10866_s3 + $0x300] sm:$0xff] %v5727_v36  ;;  %v5729_v60 = vadd.f32 %v2990_v13, %v8785_v63  ;;  %v2992_v39 = vpop.f32.mrb[19].mxu0 }
 0x22a   :  { %5133 = vst [vmem:[%s10866_s3 + $0x310] sm:$0xff] %v5791_v22  ;;  %v5793_v57 = vadd.f32 %v3376_v56, %v8789_v2  ;;  %v3378_v45 = vpop.f32.mrb[19].mxu1  ;;  %5132 = vst [vmem:[%s10866_s3 + $0x308] sm:$0xff] %v5728_v8  ;;  %v5730_v36 = vadd.f32 %v2992_v39, %v8795_v18  ;;  %v10905_v22 = vmov 0  }
 0x22b   :  { %5134 = vst [vmem:[%s10866_s3 + $0x318] sm:$0xff] %v5792_v25  ;;  %v5794_v15 = vadd.f32 %v3378_v45, %v8799_v23  ;;  %5143 = vst [vmem:[%s10866_s3 + $0x360] sm:$0xff] %v5729_v60  ;;  %3674 = vmatmul.mubr.bf16.gmra.mrb[124].mxu0 %v8374_v51 }
 0x22c   :  { %5145 = vst [vmem:[%s10866_s3 + $0x370] sm:$0xff] %v5793_v57  ;;  %4060 = vmatmul.mubr.bf16.gmra.mrb[124].mxu1 %v8374_v51  ;;  %5144 = vst [vmem:[%s10866_s3 + $0x368] sm:$0xff] %v5730_v36  ;;  %3716 = vmatprep.mubr.bf16.mxu0 %v10905_v22  ;;  %v6771_v51 = vld [vmem:[%s10864_s1 + $0x28] ss:$48 sps:$4 sm:$0xff]  }
 0x22d   :  { %5146 = vst [vmem:[%s10866_s3 + $0x378] sm:$0xff] %v5794_v15  ;;  %4102 = vmatprep.mubr.bf16.mxu1 %v10905_v22  ;;  %v6768_v15 = vld [vmem:[%s10864_s1 + $0x20] ss:$48 sps:$4 sm:$0xff]  }
 0x22e   :  { %v2996_v27 = vpop.f32.mrb[20].mxu0 }
 0x22f   :  { %v3382_v8 = vpop.f32.mrb[20].mxu1  ;;  %v5731_v25 = vadd.f32 %v2996_v27, %v8785_v63  ;;  %v2998_v56 = vpop.f32.mrb[21].mxu0 }
 0x230   :  { %v5795_v13 = vadd.f32 %v3382_v8, %v8789_v2  ;;  %v3384_v60 = vpop.f32.mrb[21].mxu1  ;;  %v5732_v57 = vadd.f32 %v2998_v56, %v8795_v18  ;;  %v3000_v45 = vpop.f32.mrb[22].mxu0 }
 0x231   :  { %v5796_v39 = vadd.f32 %v3384_v60, %v8799_v23  ;;  %v3386_v36 = vpop.f32.mrb[22].mxu1  ;;  %5155 = vst [vmem:[%s10866_s3 + $0x3c0] sm:$0xff] %v5731_v25  ;;  %v5733_v27 = vadd.f32 %v3000_v45, %v8785_v63  ;;  %v3002_v56 = vpop.f32.mrb[23].mxu0  ;;  %v6779_v45 = vld [vmem:[%s10864_s1 + $0x8c] ss:$48 sps:$4 sm:$0xff]  }
 0x232   :  { %5157 = vst [vmem:[%s10866_s3 + $0x3d0] sm:$0xff] %v5795_v13  ;;  %v5797_v8 = vadd.f32 %v3386_v36, %v8789_v2  ;;  %v3388_v60 = vpop.f32.mrb[23].mxu1  ;;  %5156 = vst [vmem:[%s10866_s3 + $0x3c8] sm:$0xff] %v5732_v57  ;;  %v5734_v25 = vadd.f32 %v3002_v56, %v8795_v18  ;;  %v6776_v13 = vld [vmem:[%s10864_s1 + $0x84] ss:$48 sps:$4 sm:$0xff]  }
 0x233   :  { %5158 = vst [vmem:[%s10866_s3 + $0x3d8] sm:$0xff] %v5796_v39  ;;  %v5798_v14 = vadd.f32 %v3388_v60, %v8799_v23  ;;  %5167 = vst [vmem:[%s10866_s3 + $0x420] sm:$0xff] %v5733_v27  ;;  %3717 = vmatmul.mubr.bf16.vlgmr.msra.gmra.mrb[64].mxu0 %v7688_v49  ;;  %v6774_v57 = vld [vmem:[%s10864_s1 + $0x80] ss:$48 sps:$4 sm:$0xff]   ;;  %v6777_v39 = vld [vmem:[%s10864_s1 + $0x88] ss:$48 sps:$4 sm:$0xff]  }
 0x234   :  { %5169 = vst [vmem:[%s10866_s3 + $0x430] sm:$0xff] %v5797_v8  ;;  %4103 = vmatmul.mubr.bf16.vlgmr.msra.gmra.mrb[64].mxu1 %v7688_v49  ;;  %5168 = vst [vmem:[%s10866_s3 + $0x428] sm:$0xff] %v5734_v25  ;;  %4264 = vmatpush1.bf16.msra.mxu0 %v6768_v15  ;;  %v6782_v36 = vld [vmem:[%s10864_s1 + $0xe4] ss:$48 sps:$4 sm:$0xff]  }
 0x235   :  { %5170 = vst [vmem:[%s10866_s3 + $0x438] sm:$0xff] %v5798_v14  ;;  %4650 = vmatpush1.bf16.msra.mxu1 %v6771_v51  ;;  %3726 = vmatprep.mubr.bf16.mxu0 %v10905_v22  ;;  %v6785_v14 = vld [vmem:[%s10864_s1 + $0xec] ss:$48 sps:$4 sm:$0xff]  }
 0x236   :  { %4112 = vmatprep.mubr.bf16.mxu1 %v10905_v22  ;;  %v3006_v51 = vpop.f32.mrb[24].mxu0  ;;  %4265 = vmatprep.subr.bf16.mxu0 %v6776_v13 }
 0x237   :  { %v3392_v15 = vpop.f32.mrb[24].mxu1  ;;  %4651 = vmatprep.subr.bf16.mxu1 %v6779_v45  ;;  %v5735_v27 = vadd.f32 %v3006_v51, %v8785_v63  ;;  %v3008_v56 = vpop.f32.mrb[25].mxu0 }
 0x238   :  { %v5799_v8 = vadd.f32 %v3392_v15, %v8789_v2  ;;  %v3394_v60 = vpop.f32.mrb[25].mxu1  ;;  %v5736_v25 = vadd.f32 %v3008_v56, %v8795_v18  ;;  %v3010_v17 = vpop.f32.mrb[26].mxu0  ;;  %4266 = vmatpush1.bf16.msra.mxu0 %v6774_v57  ;;  %v6780_v56 = vld [vmem:[%s10864_s1 + $0xe0] ss:$48 sps:$4 sm:$0xff]   ;;  %v6783_v57 = vld [vmem:[%s10864_s1 + $0xe8] ss:$48 sps:$4 sm:$0xff]  }
 0x239   :  { %v5800_v49 = vadd.f32 %v3394_v60, %v8799_v23  ;;  %v3396_v26 = vpop.f32.mrb[26].mxu1  ;;  %4652 = vmatpush1.bf16.msra.mxu1 %v6777_v39  ;;  %5179 = vst [vmem:[%s10866_s3 + $0x480] sm:$0xff] %v5735_v27  ;;  %v5737_v13 = vadd.f32 %v3010_v17, %v8785_v63  ;;  %v3012_v51 = vpop.f32.mrb[27].mxu0  ;;  %4267 = vmatprep.subr.bf16.mxu0 %v6782_v36  ;;  %v6788_v39 = vld [vmem:[%s10864_s1 + $0x144] ss:$48 sps:$4 sm:$0xff]  }
 0x23a   :  { %5181 = vst [vmem:[%s10866_s3 + $0x490] sm:$0xff] %v5799_v8  ;;  %v5801_v45 = vadd.f32 %v3396_v26, %v8789_v2  ;;  %v3398_v15 = vpop.f32.mrb[27].mxu1  ;;  %4653 = vmatprep.subr.bf16.mxu1 %v6785_v14  ;;  %5180 = vst [vmem:[%s10866_s3 + $0x488] sm:$0xff] %v5736_v25  ;;  %v5738_v26 = vadd.f32 %v3012_v51, %v8795_v18  ;;  %v6791_v36 = vld [vmem:[%s10864_s1 + $0x14c] ss:$48 sps:$4 sm:$0xff]  }
 0x23b   :  { %5182 = vst [vmem:[%s10866_s3 + $0x498] sm:$0xff] %v5800_v49  ;;  %v5802_v17 = vadd.f32 %v3398_v15, %v8799_v23  ;;  %5191 = vst [vmem:[%s10866_s3 + $0x4e0] sm:$0xff] %v5737_v13  ;;  %3727 = vmatmul.mubr.bf16.gmra.mrb[68].mxu0 %v7758_v33  ;;  %v6786_v49 = vld [vmem:[%s10864_s1 + $0x140] ss:$48 sps:$4 sm:$0xff]   ;;  %v6789_v14 = vld [vmem:[%s10864_s1 + $0x148] ss:$48 sps:$4 sm:$0xff]  }
 0x23c   :  { %5193 = vst [vmem:[%s10866_s3 + $0x4f0] sm:$0xff] %v5801_v45  ;;  %4113 = vmatmul.mubr.bf16.gmra.mrb[68].mxu1 %v7758_v33  ;;  %5192 = vst [vmem:[%s10866_s3 + $0x4e8] sm:$0xff] %v5738_v26  ;;  %3736 = vmatprep.mubr.bf16.mxu0 %v10905_v22  ;;  %v6794_v60 = vld [vmem:[%s10864_s1 + $0x1a4] ss:$48 sps:$4 sm:$0xff]   ;;  %v6797_v25 = vld [vmem:[%s10864_s1 + $0x1ac] ss:$48 sps:$4 sm:$0xff]  }
 0x23d   :  { %5194 = vst [vmem:[%s10866_s3 + $0x4f8] sm:$0xff] %v5802_v17  ;;  %4122 = vmatprep.mubr.bf16.mxu1 %v10905_v22  ;;  %4268 = vmatpush1.bf16.msra.mxu0 %v6780_v56 }
 0x23e   :  { %4654 = vmatpush1.bf16.msra.mxu1 %v6783_v57  ;;  %v3016_v27 = vpop.f32.mrb[28].mxu0  ;;  %4269 = vmatprep.subr.bf16.mxu0 %v6788_v39 }
 0x23f   :  { %v3402_v8 = vpop.f32.mrb[28].mxu1  ;;  %4655 = vmatprep.subr.bf16.mxu1 %v6791_v36  ;;  %v5739_v13 = vadd.f32 %v3016_v27, %v8785_v63  ;;  %v3018_v51 = vpop.f32.mrb[29].mxu0 }
 0x240   :  { %v5803_v45 = vadd.f32 %v3402_v8, %v8789_v2  ;;  %v3404_v15 = vpop.f32.mrb[29].mxu1  ;;  %v5740_v56 = vadd.f32 %v3018_v51, %v8795_v18  ;;  %v3020_v26 = vpop.f32.mrb[30].mxu0  ;;  %v6792_v51 = vld [vmem:[%s10864_s1 + $0x1a0] ss:$48 sps:$4 sm:$0xff]  }
 0x241   :  { %v5804_v57 = vadd.f32 %v3404_v15, %v8799_v23  ;;  %v3406_v17 = vpop.f32.mrb[30].mxu1  ;;  %5203 = vst [vmem:[%s10866_s3 + $0x540] sm:$0xff] %v5739_v13  ;;  %v5741_v39 = vadd.f32 %v3020_v26, %v8785_v63  ;;  %v3022_v27 = vpop.f32.mrb[31].mxu0  ;;  %4270 = vmatpush1.bf16.msra.mxu0 %v6786_v49  ;;  %v6795_v13 = vld [vmem:[%s10864_s1 + $0x1a8] ss:$48 sps:$4 sm:$0xff]  }
 0x242   :  { %5205 = vst [vmem:[%s10866_s3 + $0x550] sm:$0xff] %v5803_v45  ;;  %v5805_v36 = vadd.f32 %v3406_v17, %v8789_v2  ;;  %v3408_v8 = vpop.f32.mrb[31].mxu1  ;;  %4656 = vmatpush1.bf16.msra.mxu1 %v6789_v14  ;;  %5204 = vst [vmem:[%s10866_s3 + $0x548] sm:$0xff] %v5740_v56  ;;  %v5742_v45 = vadd.f32 %v3022_v27, %v8795_v18  ;;  %4271 = vmatprep.subr.bf16.mxu0 %v6794_v60  ;;  %v6800_v14 = vld [vmem:[%s10864_s1 + $0x204] ss:$48 sps:$4 sm:$0xff]  }
 0x243   :  { %5206 = vst [vmem:[%s10866_s3 + $0x558] sm:$0xff] %v5804_v57  ;;  %v5806_v49 = vadd.f32 %v3408_v8, %v8799_v23  ;;  %4657 = vmatprep.subr.bf16.mxu1 %v6797_v25  ;;  %v6803_v15 = vld [vmem:[%s10864_s1 + $0x20c] ss:$48 sps:$4 sm:$0xff]   ;;  %5215 = vst [vmem:[%s10866_s3 + $0x5a0] sm:$0xff] %v5741_v39  ;;  %3737 = vmatmul.mubr.bf16.gmra.mrb[72].mxu0 %v7811_v6  ;;  %v6798_v60 = vld [vmem:[%s10864_s1 + $0x200] ss:$48 sps:$4 sm:$0xff]  }
 0x244   :  { %5217 = vst [vmem:[%s10866_s3 + $0x5b0] sm:$0xff] %v5805_v36  ;;  %4123 = vmatmul.mubr.bf16.gmra.mrb[72].mxu1 %v7811_v6  ;;  %5216 = vst [vmem:[%s10866_s3 + $0x5a8] sm:$0xff] %v5742_v45  ;;  %3746 = vmatprep.mubr.bf16.mxu0 %v10905_v22  ;;  %v6801_v25 = vld [vmem:[%s10864_s1 + $0x208] ss:$48 sps:$4 sm:$0xff]   ;;  %v6806_v26 = vld [vmem:[%s10864_s1 + $0x264] ss:$48 sps:$4 sm:$0xff]  }
 0x245   :  { %5218 = vst [vmem:[%s10866_s3 + $0x5b8] sm:$0xff] %v5806_v49  ;;  %4132 = vmatprep.mubr.bf16.mxu1 %v10905_v22  ;;  %4272 = vmatpush1.bf16.msra.mxu0 %v6792_v51  ;;  %v6809_v17 = vld [vmem:[%s10864_s1 + $0x26c] ss:$48 sps:$4 sm:$0xff]  }
 0x246   :  { %4658 = vmatpush1.bf16.msra.mxu1 %v6795_v13  ;;  %v3026_v56 = vpop.f32.mrb[32].mxu0  ;;  %4273 = vmatprep.subr.bf16.mxu0 %v6800_v14 }
 0x247   :  { %v3412_v57 = vpop.f32.mrb[32].mxu1  ;;  %4659 = vmatprep.subr.bf16.mxu1 %v6803_v15  ;;  %v5743_v39 = vadd.f32 %v3026_v56, %v8785_v63  ;;  %v3028_v27 = vpop.f32.mrb[33].mxu0 }
 0x248   :  { %v5807_v36 = vadd.f32 %v3412_v57, %v8789_v2  ;;  %v3414_v8 = vpop.f32.mrb[33].mxu1  ;;  %v5744_v51 = vadd.f32 %v3028_v27, %v8795_v18  ;;  %v3030_v45 = vpop.f32.mrb[34].mxu0  ;;  %v6804_v27 = vld [vmem:[%s10864_s1 + $0x260] ss:$48 sps:$4 sm:$0xff]  }
 0x249   :  { %v5808_v13 = vadd.f32 %v3414_v8, %v8799_v23  ;;  %v3416_v49 = vpop.f32.mrb[34].mxu1  ;;  %5227 = vst [vmem:[%s10866_s3 + $0x600] sm:$0xff] %v5743_v39  ;;  %v5745_v14 = vadd.f32 %v3030_v45, %v8785_v63  ;;  %v3032_v56 = vpop.f32.mrb[35].mxu0  ;;  %4274 = vmatpush1.bf16.msra.mxu0 %v6798_v60  ;;  %v6807_v39 = vld [vmem:[%s10864_s1 + $0x268] ss:$48 sps:$4 sm:$0xff]  }
 0x24a   :  { %5229 = vst [vmem:[%s10866_s3 + $0x610] sm:$0xff] %v5807_v36  ;;  %v5809_v15 = vadd.f32 %v3416_v49, %v8789_v2  ;;  %v3418_v57 = vpop.f32.mrb[35].mxu1  ;;  %4660 = vmatpush1.bf16.msra.mxu1 %v6801_v25  ;;  %5228 = vst [vmem:[%s10866_s3 + $0x608] sm:$0xff] %v5744_v51  ;;  %v5746_v36 = vadd.f32 %v3032_v56, %v8795_v18  ;;  %4275 = vmatprep.subr.bf16.mxu0 %v6806_v26  ;;  %v6812_v25 = vld [vmem:[%s10864_s1 + $0x2c4] ss:$48 sps:$4 sm:$0xff]  }
 0x24b   :  { %5230 = vst [vmem:[%s10866_s3 + $0x618] sm:$0xff] %v5808_v13  ;;  %v5810_v60 = vadd.f32 %v3418_v57, %v8799_v23  ;;  %4661 = vmatprep.subr.bf16.mxu1 %v6809_v17  ;;  %v6815_v8 = vld [vmem:[%s10864_s1 + $0x2cc] ss:$48 sps:$4 sm:$0xff]   ;;  %5239 = vst [vmem:[%s10866_s3 + $0x660] sm:$0xff] %v5745_v14  ;;  %3747 = vmatmul.mubr.bf16.gmra.mrb[76].mxu0 %v7883_v3  ;;  %v6810_v26 = vld [vmem:[%s10864_s1 + $0x2c0] ss:$48 sps:$4 sm:$0xff]  }
 0x24c   :  { %5241 = vst [vmem:[%s10866_s3 + $0x670] sm:$0xff] %v5809_v15  ;;  %4133 = vmatmul.mubr.bf16.gmra.mrb[76].mxu1 %v7883_v3  ;;  %5240 = vst [vmem:[%s10866_s3 + $0x668] sm:$0xff] %v5746_v36  ;;  %3756 = vmatprep.mubr.bf16.mxu0 %v10905_v22  ;;  %v6813_v17 = vld [vmem:[%s10864_s1 + $0x2c8] ss:$48 sps:$4 sm:$0xff]   ;;  %v6818_v45 = vld [vmem:[%s10864_s1 + $0x324] ss:$48 sps:$4 sm:$0xff]  }
 0x24d   :  { %5242 = vst [vmem:[%s10866_s3 + $0x678] sm:$0xff] %v5810_v60  ;;  %4142 = vmatprep.mubr.bf16.mxu1 %v10905_v22  ;;  %4276 = vmatpush1.bf16.msra.mxu0 %v6804_v27  ;;  %v6821_v49 = vld [vmem:[%s10864_s1 + $0x32c] ss:$48 sps:$4 sm:$0xff]  }
 0x24e   :  { %4662 = vmatpush1.bf16.msra.mxu1 %v6807_v39  ;;  %v3036_v51 = vpop.f32.mrb[36].mxu0  ;;  %4277 = vmatprep.subr.bf16.mxu0 %v6812_v25 }
 0x24f   :  { %v3422_v13 = vpop.f32.mrb[36].mxu1  ;;  %4663 = vmatprep.subr.bf16.mxu1 %v6815_v8  ;;  %v5747_v14 = vadd.f32 %v3036_v51, %v8785_v63  ;;  %v3038_v56 = vpop.f32.mrb[37].mxu0 }
 0x250   :  { %v5811_v15 = vadd.f32 %v3422_v13, %v8789_v2  ;;  %v3424_v57 = vpop.f32.mrb[37].mxu1  ;;  %v5748_v27 = vadd.f32 %v3038_v56, %v8795_v18  ;;  %v3040_v36 = vpop.f32.mrb[38].mxu0  ;;  %v6816_v56 = vld [vmem:[%s10864_s1 + $0x320] ss:$48 sps:$4 sm:$0xff]  }
 0x251   :  { %v5812_v39 = vadd.f32 %v3424_v57, %v8799_v23  ;;  %v3426_v60 = vpop.f32.mrb[38].mxu1  ;;  %5251 = vst [vmem:[%s10866_s3 + $0x6c0] sm:$0xff] %v5747_v14  ;;  %v5749_v25 = vadd.f32 %v3040_v36, %v8785_v63  ;;  %v3042_v51 = vpop.f32.mrb[39].mxu0  ;;  %4278 = vmatpush1.bf16.msra.mxu0 %v6810_v26  ;;  %v6819_v14 = vld [vmem:[%s10864_s1 + $0x328] ss:$48 sps:$4 sm:$0xff]  }
 0x252   :  { %5253 = vst [vmem:[%s10866_s3 + $0x6d0] sm:$0xff] %v5811_v15  ;;  %v5813_v8 = vadd.f32 %v3426_v60, %v8789_v2  ;;  %v3428_v13 = vpop.f32.mrb[39].mxu1  ;;  %4664 = vmatpush1.bf16.msra.mxu1 %v6813_v17  ;;  %5252 = vst [vmem:[%s10866_s3 + $0x6c8] sm:$0xff] %v5748_v27  ;;  %v5750_v15 = vadd.f32 %v3042_v51, %v8795_v18  ;;  %4279 = vmatprep.subr.bf16.mxu0 %v6818_v45  ;;  %v6824_v17 = vld [vmem:[%s10864_s1 + $0x384] ss:$48 sps:$4 sm:$0xff]  }
 0x253   :  { %5254 = vst [vmem:[%s10866_s3 + $0x6d8] sm:$0xff] %v5812_v39  ;;  %v5814_v26 = vadd.f32 %v3428_v13, %v8799_v23  ;;  %4665 = vmatprep.subr.bf16.mxu1 %v6821_v49  ;;  %v6827_v57 = vld [vmem:[%s10864_s1 + $0x38c] ss:$48 sps:$4 sm:$0xff]   ;;  %5263 = vst [vmem:[%s10866_s3 + $0x720] sm:$0xff] %v5749_v25  ;;  %3757 = vmatmul.mubr.bf16.gmra.mrb[80].mxu0 %v7952_v30  ;;  %v6822_v45 = vld [vmem:[%s10864_s1 + $0x380] ss:$48 sps:$4 sm:$0xff]  }
 0x254   :  { %5265 = vst [vmem:[%s10866_s3 + $0x730] sm:$0xff] %v5813_v8  ;;  %4143 = vmatmul.mubr.bf16.gmra.mrb[80].mxu1 %v7952_v30  ;;  %5264 = vst [vmem:[%s10866_s3 + $0x728] sm:$0xff] %v5750_v15  ;;  %3766 = vmatprep.mubr.bf16.mxu0 %v10905_v22  ;;  %v6825_v49 = vld [vmem:[%s10864_s1 + $0x388] ss:$48 sps:$4 sm:$0xff]   ;;  %v6830_v36 = vld [vmem:[%s10864_s1 + $0x3e4] ss:$48 sps:$4 sm:$0xff]  }
 0x255   :  { %5266 = vst [vmem:[%s10866_s3 + $0x738] sm:$0xff] %v5814_v26  ;;  %4152 = vmatprep.mubr.bf16.mxu1 %v10905_v22  ;;  %4280 = vmatpush1.bf16.msra.mxu0 %v6816_v56  ;;  %v6833_v60 = vld [vmem:[%s10864_s1 + $0x3ec] ss:$48 sps:$4 sm:$0xff]  }
 0x256   :  { %4666 = vmatpush1.bf16.msra.mxu1 %v6819_v14  ;;  %v3046_v27 = vpop.f32.mrb[40].mxu0  ;;  %4281 = vmatprep.subr.bf16.mxu0 %v6824_v17 }
 0x257   :  { %v3432_v39 = vpop.f32.mrb[40].mxu1  ;;  %4667 = vmatprep.subr.bf16.mxu1 %v6827_v57  ;;  %v5751_v25 = vadd.f32 %v3046_v27, %v8785_v63  ;;  %v3048_v51 = vpop.f32.mrb[41].mxu0 }
 0x258   :  { %v5815_v8 = vadd.f32 %v3432_v39, %v8789_v2  ;;  %v3434_v13 = vpop.f32.mrb[41].mxu1  ;;  %v5752_v56 = vadd.f32 %v3048_v51, %v8795_v18  ;;  %v3050_v15 = vpop.f32.mrb[42].mxu0  ;;  %v6828_v51 = vld [vmem:[%s10864_s1 + $0x3e0] ss:$48 sps:$4 sm:$0xff]  }
 0x259   :  { %v5816_v14 = vadd.f32 %v3434_v13, %v8799_v23  ;;  %v3436_v26 = vpop.f32.mrb[42].mxu1  ;;  %5275 = vst [vmem:[%s10866_s3 + $0x780] sm:$0xff] %v5751_v25  ;;  %v5753_v17 = vadd.f32 %v3050_v15, %v8785_v63  ;;  %v3052_v27 = vpop.f32.mrb[43].mxu0  ;;  %4282 = vmatpush1.bf16.msra.mxu0 %v6822_v45  ;;  %v6831_v25 = vld [vmem:[%s10864_s1 + $0x3e8] ss:$48 sps:$4 sm:$0xff]  }
 0x25a   :  { %5277 = vst [vmem:[%s10866_s3 + $0x790] sm:$0xff] %v5815_v8  ;;  %v5817_v57 = vadd.f32 %v3436_v26, %v8789_v2  ;;  %v3438_v39 = vpop.f32.mrb[43].mxu1  ;;  %4668 = vmatpush1.bf16.msra.mxu1 %v6825_v49  ;;  %5276 = vst [vmem:[%s10866_s3 + $0x788] sm:$0xff] %v5752_v56  ;;  %v5754_v8 = vadd.f32 %v3052_v27, %v8795_v18  ;;  %4283 = vmatprep.subr.bf16.mxu0 %v6830_v36  ;;  %v6836_v49 = vld [vmem:[%s10864_s1 + $0x444] ss:$48 sps:$4 sm:$0xff]  }
 0x25b   :  { %5278 = vst [vmem:[%s10866_s3 + $0x798] sm:$0xff] %v5816_v14  ;;  %v5818_v45 = vadd.f32 %v3438_v39, %v8799_v23  ;;  %4669 = vmatprep.subr.bf16.mxu1 %v6833_v60  ;;  %v6839_v13 = vld [vmem:[%s10864_s1 + $0x44c] ss:$48 sps:$4 sm:$0xff]   ;;  %5287 = vst [vmem:[%s10866_s3 + $0x7e0] sm:$0xff] %v5753_v17  ;;  %3767 = vmatmul.mubr.bf16.gmra.mrb[84].mxu0 %v7990_v29  ;;  %v6834_v36 = vld [vmem:[%s10864_s1 + $0x440] ss:$48 sps:$4 sm:$0xff]  }
 0x25c   :  { %5289 = vst [vmem:[%s10866_s3 + $0x7f0] sm:$0xff] %v5817_v57  ;;  %4153 = vmatmul.mubr.bf16.gmra.mrb[84].mxu1 %v7990_v29  ;;  %5288 = vst [vmem:[%s10866_s3 + $0x7e8] sm:$0xff] %v5754_v8  ;;  %3776 = vmatprep.mubr.bf16.mxu0 %v10905_v22  ;;  %v6837_v60 = vld [vmem:[%s10864_s1 + $0x448] ss:$48 sps:$4 sm:$0xff]   ;;  %v6842_v15 = vld [vmem:[%s10864_s1 + $0x4a4] ss:$48 sps:$4 sm:$0xff]  }
 0x25d   :  { %5290 = vst [vmem:[%s10866_s3 + $0x7f8] sm:$0xff] %v5818_v45  ;;  %4162 = vmatprep.mubr.bf16.mxu1 %v10905_v22  ;;  %4284 = vmatpush1.bf16.msra.mxu0 %v6828_v51  ;;  %v6845_v26 = vld [vmem:[%s10864_s1 + $0x4ac] ss:$48 sps:$4 sm:$0xff]  }
 0x25e   :  { %4670 = vmatpush1.bf16.msra.mxu1 %v6831_v25  ;;  %v3056_v56 = vpop.f32.mrb[44].mxu0  ;;  %4285 = vmatprep.subr.bf16.mxu0 %v6836_v49 }
 0x25f   :  { %v3442_v14 = vpop.f32.mrb[44].mxu1  ;;  %4671 = vmatprep.subr.bf16.mxu1 %v6839_v13  ;;  %v5755_v17 = vadd.f32 %v3056_v56, %v8785_v63  ;;  %v3058_v27 = vpop.f32.mrb[45].mxu0 }
 0x260   :  { %v5819_v57 = vadd.f32 %v3442_v14, %v8789_v2  ;;  %v3444_v39 = vpop.f32.mrb[45].mxu1  ;;  %v5756_v51 = vadd.f32 %v3058_v27, %v8795_v18  ;;  %v3060_v8 = vpop.f32.mrb[46].mxu0  ;;  %v6840_v27 = vld [vmem:[%s10864_s1 + $0x4a0] ss:$48 sps:$4 sm:$0xff]  }
 0x261   :  { %v5820_v25 = vadd.f32 %v3444_v39, %v8799_v23  ;;  %v3446_v45 = vpop.f32.mrb[46].mxu1  ;;  %5299 = vst [vmem:[%s10866_s3 + $0x840] sm:$0xff] %v5755_v17  ;;  %v5757_v49 = vadd.f32 %v3060_v8, %v8785_v63  ;;  %v3062_v56 = vpop.f32.mrb[47].mxu0  ;;  %4286 = vmatpush1.bf16.msra.mxu0 %v6834_v36  ;;  %v6843_v17 = vld [vmem:[%s10864_s1 + $0x4a8] ss:$48 sps:$4 sm:$0xff]  }
 0x262   :  { %5301 = vst [vmem:[%s10866_s3 + $0x850] sm:$0xff] %v5819_v57  ;;  %v5821_v13 = vadd.f32 %v3446_v45, %v8789_v2  ;;  %v3448_v14 = vpop.f32.mrb[47].mxu1  ;;  %4672 = vmatpush1.bf16.msra.mxu1 %v6837_v60  ;;  %5300 = vst [vmem:[%s10866_s3 + $0x848] sm:$0xff] %v5756_v51  ;;  %v5758_v57 = vadd.f32 %v3062_v56, %v8795_v18  ;;  %4287 = vmatprep.subr.bf16.mxu0 %v6842_v15  ;;  %v6848_v60 = vld [vmem:[%s10864_s1 + $0x504] ss:$48 sps:$4 sm:$0xff]  }
 0x263   :  { %5302 = vst [vmem:[%s10866_s3 + $0x858] sm:$0xff] %v5820_v25  ;;  %v5822_v36 = vadd.f32 %v3448_v14, %v8799_v23  ;;  %4673 = vmatprep.subr.bf16.mxu1 %v6845_v26  ;;  %v6851_v39 = vld [vmem:[%s10864_s1 + $0x50c] ss:$48 sps:$4 sm:$0xff]   ;;  %5311 = vst [vmem:[%s10866_s3 + $0x8a0] sm:$0xff] %v5757_v49  ;;  %3777 = vmatmul.mubr.bf16.gmra.mrb[88].mxu0 %v8032_v53  ;;  %v6846_v15 = vld [vmem:[%s10864_s1 + $0x500] ss:$48 sps:$4 sm:$0xff]  }
 0x264   :  { %5313 = vst [vmem:[%s10866_s3 + $0x8b0] sm:$0xff] %v5821_v13  ;;  %4163 = vmatmul.mubr.bf16.gmra.mrb[88].mxu1 %v8032_v53  ;;  %5312 = vst [vmem:[%s10866_s3 + $0x8a8] sm:$0xff] %v5758_v57  ;;  %3786 = vmatprep.mubr.bf16.mxu0 %v10905_v22  ;;  %v6849_v26 = vld [vmem:[%s10864_s1 + $0x508] ss:$48 sps:$4 sm:$0xff]   ;;  %v6854_v8 = vld [vmem:[%s10864_s1 + $0x564] ss:$48 sps:$4 sm:$0xff]  }
 0x265   :  { %5314 = vst [vmem:[%s10866_s3 + $0x8b8] sm:$0xff] %v5822_v36  ;;  %4172 = vmatprep.mubr.bf16.mxu1 %v10905_v22  ;;  %4288 = vmatpush1.bf16.msra.mxu0 %v6840_v27  ;;  %v6857_v45 = vld [vmem:[%s10864_s1 + $0x56c] ss:$48 sps:$4 sm:$0xff]  }
 0x266   :  { %4674 = vmatpush1.bf16.msra.mxu1 %v6843_v17  ;;  %v3066_v51 = vpop.f32.mrb[48].mxu0  ;;  %4289 = vmatprep.subr.bf16.mxu0 %v6848_v60 }
 0x267   :  { %v3452_v25 = vpop.f32.mrb[48].mxu1  ;;  %4675 = vmatprep.subr.bf16.mxu1 %v6851_v39  ;;  %v5759_v49 = vadd.f32 %v3066_v51, %v8785_v63  ;;  %v3068_v56 = vpop.f32.mrb[49].mxu0 }
 0x268   :  { %v5823_v13 = vadd.f32 %v3452_v25, %v8789_v2  ;;  %v3454_v14 = vpop.f32.mrb[49].mxu1  ;;  %v5760_v27 = vadd.f32 %v3068_v56, %v8795_v18  ;;  %v3070_v57 = vpop.f32.mrb[50].mxu0  ;;  %v6852_v56 = vld [vmem:[%s10864_s1 + $0x560] ss:$48 sps:$4 sm:$0xff]  }
 0x269   :  { %v5824_v17 = vadd.f32 %v3454_v14, %v8799_v23  ;;  %v3456_v36 = vpop.f32.mrb[50].mxu1  ;;  %5323 = vst [vmem:[%s10866_s3 + $0x900] sm:$0xff] %v5759_v49  ;;  %v5761_v60 = vadd.f32 %v3070_v57, %v8785_v63  ;;  %v3072_v51 = vpop.f32.mrb[51].mxu0  ;;  %4290 = vmatpush1.bf16.msra.mxu0 %v6846_v15  ;;  %v6855_v49 = vld [vmem:[%s10864_s1 + $0x568] ss:$48 sps:$4 sm:$0xff]  }
 0x26a   :  { %5325 = vst [vmem:[%s10866_s3 + $0x910] sm:$0xff] %v5823_v13  ;;  %v5825_v39 = vadd.f32 %v3456_v36, %v8789_v2  ;;  %v3458_v25 = vpop.f32.mrb[51].mxu1  ;;  %4676 = vmatpush1.bf16.msra.mxu1 %v6849_v26  ;;  %5324 = vst [vmem:[%s10866_s3 + $0x908] sm:$0xff] %v5760_v27  ;;  %v5762_v13 = vadd.f32 %v3072_v51, %v8795_v18  ;;  %4291 = vmatprep.subr.bf16.mxu0 %v6854_v8  ;;  %v6860_v26 = vld [vmem:[%s10864_s1 + $0x5c4] ss:$48 sps:$4 sm:$0xff]  }
 0x26b   :  { %5326 = vst [vmem:[%s10866_s3 + $0x918] sm:$0xff] %v5824_v17  ;;  %v5826_v15 = vadd.f32 %v3458_v25, %v8799_v23  ;;  %4677 = vmatprep.subr.bf16.mxu1 %v6857_v45  ;;  %v6863_v14 = vld [vmem:[%s10864_s1 + $0x5cc] ss:$48 sps:$4 sm:$0xff]   ;;  %5335 = vst [vmem:[%s10866_s3 + $0x960] sm:$0xff] %v5761_v60  ;;  %3787 = vmatmul.mubr.bf16.gmra.mrb[92].mxu0 %v8074_v47  ;;  %v6858_v8 = vld [vmem:[%s10864_s1 + $0x5c0] ss:$48 sps:$4 sm:$0xff]  }
 0x26c   :  { %5337 = vst [vmem:[%s10866_s3 + $0x970] sm:$0xff] %v5825_v39  ;;  %4173 = vmatmul.mubr.bf16.gmra.mrb[92].mxu1 %v8074_v47  ;;  %5336 = vst [vmem:[%s10866_s3 + $0x968] sm:$0xff] %v5762_v13  ;;  %3796 = vmatprep.mubr.bf16.mxu0 %v10905_v22  ;;  %v6861_v45 = vld [vmem:[%s10864_s1 + $0x5c8] ss:$48 sps:$4 sm:$0xff]   ;;  %v6866_v57 = vld [vmem:[%s10864_s1 + $0x624] ss:$48 sps:$4 sm:$0xff]  }
 0x26d   :  { %5338 = vst [vmem:[%s10866_s3 + $0x978] sm:$0xff] %v5826_v15  ;;  %4182 = vmatprep.mubr.bf16.mxu1 %v10905_v22  ;;  %4292 = vmatpush1.bf16.msra.mxu0 %v6852_v56  ;;  %v6869_v36 = vld [vmem:[%s10864_s1 + $0x62c] ss:$48 sps:$4 sm:$0xff]  }
 0x26e   :  { %4678 = vmatpush1.bf16.msra.mxu1 %v6855_v49  ;;  %v3076_v27 = vpop.f32.mrb[52].mxu0  ;;  %4293 = vmatprep.subr.bf16.mxu0 %v6860_v26 }
 0x26f   :  { %v3462_v17 = vpop.f32.mrb[52].mxu1  ;;  %4679 = vmatprep.subr.bf16.mxu1 %v6863_v14  ;;  %v5763_v60 = vadd.f32 %v3076_v27, %v8785_v63  ;;  %v3078_v51 = vpop.f32.mrb[53].mxu0 }
 0x270   :  { %v5827_v39 = vadd.f32 %v3462_v17, %v8789_v2  ;;  %v3464_v25 = vpop.f32.mrb[53].mxu1  ;;  %v5764_v56 = vadd.f32 %v3078_v51, %v8795_v18  ;;  %v3080_v13 = vpop.f32.mrb[54].mxu0 }
 0x271   :  { %v5828_v49 = vadd.f32 %v3464_v25, %v8799_v23  ;;  %v3466_v15 = vpop.f32.mrb[54].mxu1  ;;  %5347 = vst [vmem:[%s10866_s3 + $0x9c0] sm:$0xff] %v5763_v60  ;;  %v5765_v26 = vadd.f32 %v3080_v13, %v8785_v63  ;;  %v3082_v27 = vpop.f32.mrb[55].mxu0  ;;  %4294 = vmatpush1.bf16.msra.mxu0 %v6858_v8 }
 0x272   :  { %5349 = vst [vmem:[%s10866_s3 + $0x9d0] sm:$0xff] %v5827_v39  ;;  %v5829_v14 = vadd.f32 %v3466_v15, %v8789_v2  ;;  %v3468_v17 = vpop.f32.mrb[55].mxu1  ;;  %4680 = vmatpush1.bf16.msra.mxu1 %v6861_v45  ;;  %5348 = vst [vmem:[%s10866_s3 + $0x9c8] sm:$0xff] %v5764_v56  ;;  %v5766_v60 = vadd.f32 %v3082_v27, %v8795_v18  ;;  %4456 = vmatprep.subr.bf16.mxu0 %v6866_v57 }
 0x273   :  { %5350 = vst [vmem:[%s10866_s3 + $0x9d8] sm:$0xff] %v5828_v49  ;;  %v5830_v39 = vadd.f32 %v3468_v17, %v8799_v23  ;;  %4842 = vmatprep.subr.bf16.mxu1 %v6869_v36  ;;  %5359 = vst [vmem:[%s10866_s3 + $0xa20] sm:$0xff] %v5765_v26  ;;  %3797 = vmatmul.mubr.bf16.gmra.mrb[96].mxu0 %v8116_v55 }
 0x274   :  { %5361 = vst [vmem:[%s10866_s3 + $0xa30] sm:$0xff] %v5829_v14  ;;  %4183 = vmatmul.mubr.bf16.gmra.mrb[96].mxu1 %v8116_v55  ;;  %5360 = vst [vmem:[%s10866_s3 + $0xa28] sm:$0xff] %v5766_v60  ;;  %3806 = vmatprep.mubr.bf16.mxu0 %v10905_v22 }
 0x275   :  { %5362 = vst [vmem:[%s10866_s3 + $0xa38] sm:$0xff] %v5830_v39  ;;  %4192 = vmatprep.mubr.bf16.mxu1 %v10905_v22 }
 0x276   :  { %v3086_v8 = vpop.f32.mrb[56].mxu0 }
 0x277   :  { %v3472_v45 = vpop.f32.mrb[56].mxu1  ;;  %v5767_v57 = vadd.f32 %v3086_v8, %v8785_v63  ;;  %v3088_v51 = vpop.f32.mrb[57].mxu0 }
 0x278   :  { %v5831_v36 = vadd.f32 %v3472_v45, %v8789_v2  ;;  %v3474_v25 = vpop.f32.mrb[57].mxu1  ;;  %v5768_v56 = vadd.f32 %v3088_v51, %v8795_v18  ;;  %v3090_v13 = vpop.f32.mrb[58].mxu0 }
 0x279   :  { %v5832_v49 = vadd.f32 %v3474_v25, %v8799_v23  ;;  %v3476_v15 = vpop.f32.mrb[58].mxu1  ;;  %5371 = vst [vmem:[%s10866_s3 + $0xa80] sm:$0xff] %v5767_v57  ;;  %v5769_v26 = vadd.f32 %v3090_v13, %v8785_v63  ;;  %v3092_v27 = vpop.f32.mrb[59].mxu0 }
 0x27a   :  { %5373 = vst [vmem:[%s10866_s3 + $0xa90] sm:$0xff] %v5831_v36  ;;  %v5833_v14 = vadd.f32 %v3476_v15, %v8789_v2  ;;  %v3478_v17 = vpop.f32.mrb[59].mxu1  ;;  %5372 = vst [vmem:[%s10866_s3 + $0xa88] sm:$0xff] %v5768_v56  ;;  %v5770_v60 = vadd.f32 %v3092_v27, %v8795_v18 }
 0x27b   :  { %5374 = vst [vmem:[%s10866_s3 + $0xa98] sm:$0xff] %v5832_v49  ;;  %v5834_v39 = vadd.f32 %v3478_v17, %v8799_v23  ;;  %5383 = vst [vmem:[%s10866_s3 + $0xae0] sm:$0xff] %v5769_v26  ;;  %3807 = vmatmul.mubr.bf16.gmra.mrb[100].mxu0 %v8158_v41 }
 0x27c   :  { %5385 = vst [vmem:[%s10866_s3 + $0xaf0] sm:$0xff] %v5833_v14  ;;  %4193 = vmatmul.mubr.bf16.gmra.mrb[100].mxu1 %v8158_v41  ;;  %5384 = vst [vmem:[%s10866_s3 + $0xae8] sm:$0xff] %v5770_v60  ;;  %3816 = vmatprep.mubr.bf16.mxu0 %v10905_v22 }
 0x27d   :  { %5386 = vst [vmem:[%s10866_s3 + $0xaf8] sm:$0xff] %v5834_v39  ;;  %4202 = vmatprep.mubr.bf16.mxu1 %v10905_v22 }
 0x27e   :  { %v3096_v8 = vpop.f32.mrb[60].mxu0 }
 0x27f   :  { %v3482_v45 = vpop.f32.mrb[60].mxu1  ;;  %v5771_v57 = vadd.f32 %v3096_v8, %v8785_v63  ;;  %v3098_v51 = vpop.f32.mrb[61].mxu0  ;;  %v6873_v8 = vld [vmem:[%s10864_s1 + $0x688] ss:$48 sps:$4 sm:$0xff]  }
 0x280   :  { %v5835_v36 = vadd.f32 %v3482_v45, %v8789_v2  ;;  %v3484_v25 = vpop.f32.mrb[61].mxu1  ;;  %v5772_v56 = vadd.f32 %v3098_v51, %v8795_v18  ;;  %v3100_v13 = vpop.f32.mrb[62].mxu0  ;;  %v6878_v45 = vld [vmem:[%s10864_s1 + $0x6e4] ss:$48 sps:$4 sm:$0xff]   ;;  %v6887_v51 = vld [vmem:[%s10864_s1 + $0x74c] ss:$48 sps:$4 sm:$0xff]  }
 0x281   :  { %v5836_v49 = vadd.f32 %v3484_v25, %v8799_v23  ;;  %v3486_v15 = vpop.f32.mrb[62].mxu1  ;;  %5395 = vst [vmem:[%s10866_s3 + $0xb40] sm:$0xff] %v5771_v57  ;;  %v5773_v26 = vadd.f32 %v3100_v13, %v8785_v63  ;;  %v3102_v27 = vpop.f32.mrb[63].mxu0  ;;  %v6864_v63 = vld [vmem:[%s10864_s1 + $0x620] ss:$48 sps:$4 sm:$0xff]  }
 0x282   :  { %5397 = vst [vmem:[%s10866_s3 + $0xb50] sm:$0xff] %v5835_v36  ;;  %v5837_v14 = vadd.f32 %v3486_v15, %v8789_v2  ;;  %v3488_v17 = vpop.f32.mrb[63].mxu1  ;;  %5396 = vst [vmem:[%s10866_s3 + $0xb48] sm:$0xff] %v5772_v56  ;;  %v5774_v60 = vadd.f32 %v3102_v27, %v8795_v18  ;;  %v6867_v2 = vld [vmem:[%s10864_s1 + $0x628] ss:$48 sps:$4 sm:$0xff]  }
 0x283   :  { %5398 = vst [vmem:[%s10866_s3 + $0xb58] sm:$0xff] %v5836_v49  ;;  %v5838_v39 = vadd.f32 %v3488_v17, %v8799_v23  ;;  %5407 = vst [vmem:[%s10866_s3 + $0xba0] sm:$0xff] %v5773_v26  ;;  %3817 = vmatmul.mubr.bf16.gmra.mrb[104].mxu0 %v8200_v1  ;;  %v6872_v18 = vld [vmem:[%s10864_s1 + $0x684] ss:$48 sps:$4 sm:$0xff]   ;;  %v6875_v23 = vld [vmem:[%s10864_s1 + $0x68c] ss:$48 sps:$4 sm:$0xff]  }
 0x284   :  { %5409 = vst [vmem:[%s10866_s3 + $0xbb0] sm:$0xff] %v5837_v14  ;;  %4203 = vmatmul.mubr.bf16.gmra.mrb[104].mxu1 %v8200_v1  ;;  %5408 = vst [vmem:[%s10866_s3 + $0xba8] sm:$0xff] %v5774_v60  ;;  %3826 = vmatprep.mubr.bf16.mxu0 %v10905_v22  ;;  %v6876_v57 = vld [vmem:[%s10864_s1 + $0x6e0] ss:$48 sps:$4 sm:$0xff]   ;;  %v6884_v36 = vld [vmem:[%s10864_s1 + $0x744] ss:$48 sps:$4 sm:$0xff]  }
 0x285   :  { %5410 = vst [vmem:[%s10866_s3 + $0xbb8] sm:$0xff] %v5838_v39  ;;  %4212 = vmatprep.mubr.bf16.mxu1 %v10905_v22  ;;  %v6882_v25 = vld [vmem:[%s10864_s1 + $0x740] ss:$48 sps:$4 sm:$0xff]   ;;  %v6885_v56 = vld [vmem:[%s10864_s1 + $0x748] ss:$48 sps:$4 sm:$0xff]  }
 0x286   :  { %v6888_v49 = vld [vmem:[%s10864_s1 + $0x7a0] ss:$48 sps:$4 sm:$0xff]   ;;  %v6891_v13 = vld [vmem:[%s10864_s1 + $0x7a8] ss:$48 sps:$4 sm:$0xff]   ;;  %v6896_v15 = vld [vmem:[%s10864_s1 + $0x804] ss:$48 sps:$4 sm:$0xff]  }
 0x287   :  { %v6899_v26 = vld [vmem:[%s10864_s1 + $0x80c] ss:$48 sps:$4 sm:$0xff]   ;;  %v6894_v14 = vld [vmem:[%s10864_s1 + $0x800] ss:$48 sps:$4 sm:$0xff]   ;;  %v6897_v27 = vld [vmem:[%s10864_s1 + $0x808] ss:$48 sps:$4 sm:$0xff]  }
 0x288   :  { %v6900_v17 = vld [vmem:[%s10864_s1 + $0x860] ss:$48 sps:$4 sm:$0xff]   ;;  %v6903_v60 = vld [vmem:[%s10864_s1 + $0x868] ss:$48 sps:$4 sm:$0xff]   ;;  %v6908_v39 = vld [vmem:[%s10864_s1 + $0x8c4] ss:$48 sps:$4 sm:$0xff]  }
 0x28b   :  { %3827 = vmatmul.mubr.bf16.gmra.mrb[108].mxu0 %v8242_v10 }
 0x28c   :  { %4213 = vmatmul.mubr.bf16.gmra.mrb[108].mxu1 %v8242_v10  ;;  %3836 = vmatprep.mubr.bf16.mxu0 %v10905_v22 }
 0x28d   :  { %4222 = vmatprep.mubr.bf16.mxu1 %v10905_v22 }
 0x293   :  { %3837 = vmatmul.mubr.bf16.gmra.mrb[112].mxu0 %v8280_v40 }
 0x294   :  { %4223 = vmatmul.mubr.bf16.gmra.mrb[112].mxu1 %v8280_v40  ;;  %3846 = vmatprep.mubr.bf16.mxu0 %v10905_v22 }
 0x295   :  { %4232 = vmatprep.mubr.bf16.mxu1 %v10905_v22 }
 0x29b   :  { %3847 = vmatmul.mubr.bf16.gmra.mrb[116].mxu0 %v8302_v5 }
 0x29c   :  { %4233 = vmatmul.mubr.bf16.gmra.mrb[116].mxu1 %v8302_v5  ;;  %3856 = vmatprep.mubr.bf16.mxu0 %v10905_v22 }
 0x29d   :  { %4242 = vmatprep.mubr.bf16.mxu1 %v10905_v22 }
 0x2a3   :  { %3857 = vmatmul.mubr.bf16.gmra.mrb[120].mxu0 %v8336_v32 }
 0x2a4   :  { %4243 = vmatmul.mubr.bf16.gmra.mrb[120].mxu1 %v8336_v32  ;;  %3866 = vmatprep.mubr.bf16.mxu0 %v10905_v22 }
 0x2a5   :  { %4252 = vmatprep.mubr.bf16.mxu1 %v10905_v22 }
 0x2ab   :  { %3867 = vmatmul.mubr.bf16.gmra.mrb[124].mxu0 %v8370_v62 }
 0x2ac   :  { %4253 = vmatmul.mubr.bf16.gmra.mrb[124].mxu1 %v8370_v62  ;;  %4295 = vmatprep.mubr.bf16.mxu0 %v7667_v31 }
 0x2ad   :  { %4681 = vmatprep.mubr.bf16.mxu1 %v7667_v31  ;;  %v6870_v31 = vld [vmem:[%s10864_s1 + $0x680] ss:$48 sps:$4 sm:$0xff]  }
 0x2b3   :  { %4296 = vmatmul.mubr.bf16.vlgmr.msra.gmra.mrb[128].mxu0 %v7673_v35 }
 0x2b4   :  { %4682 = vmatmul.mubr.bf16.vlgmr.msra.gmra.mrb[128].mxu1 %v7673_v35  ;;  %4457 = vmatpush1.bf16.msra.mxu0 %v6864_v63  ;;  %v6881_v35 = vld [vmem:[%s10864_s1 + $0x6ec] ss:$48 sps:$4 sm:$0xff]  }
 0x2b5   :  { %4843 = vmatpush1.bf16.msra.mxu1 %v6867_v2  ;;  %4305 = vmatprep.mubr.bf16.mxu0 %v7708_v61  ;;  %v6911_v63 = vld [vmem:[%s10864_s1 + $0x8cc] ss:$48 sps:$4 sm:$0xff]   ;;  %v6906_v2 = vld [vmem:[%s10864_s1 + $0x8c0] ss:$48 sps:$4 sm:$0xff]  }
 0x2b6   :  { %4691 = vmatprep.mubr.bf16.mxu1 %v7708_v61  ;;  %4458 = vmatprep.subr.bf16.mxu0 %v6872_v18  ;;  %v6879_v61 = vld [vmem:[%s10864_s1 + $0x6e8] ss:$48 sps:$4 sm:$0xff]  }
 0x2b7   :  { %4844 = vmatprep.subr.bf16.mxu1 %v6875_v23  ;;  %v6909_v18 = vld [vmem:[%s10864_s1 + $0x8c8] ss:$48 sps:$4 sm:$0xff]  }
 0x2b8   :  { %4459 = vmatpush1.bf16.msra.mxu0 %v6870_v31 }
 0x2b9   :  { %4845 = vmatpush1.bf16.msra.mxu1 %v6873_v8  ;;  %4460 = vmatprep.subr.bf16.mxu0 %v6878_v45 }
 0x2ba   :  { %4846 = vmatprep.subr.bf16.mxu1 %v6881_v35 }
 0x2bb   :  { %4306 = vmatmul.mubr.bf16.gmra.mrb[132].mxu0 %v7737_v12 }
 0x2bc   :  { %4692 = vmatmul.mubr.bf16.gmra.mrb[132].mxu1 %v7737_v12  ;;  %4315 = vmatprep.mubr.bf16.mxu0 %v7776_v48  ;;  %v6890_v12 = vld [vmem:[%s10864_s1 + $0x7a4] ss:$48 sps:$4 sm:$0xff]  }
 0x2bd   :  { %4701 = vmatprep.mubr.bf16.mxu1 %v7776_v48  ;;  %4461 = vmatpush1.bf16.msra.mxu0 %v6876_v57  ;;  %v6893_v48 = vld [vmem:[%s10864_s1 + $0x7ac] ss:$48 sps:$4 sm:$0xff]  }
 0x2be   :  { %4847 = vmatpush1.bf16.msra.mxu1 %v6879_v61  ;;  %4462 = vmatprep.subr.bf16.mxu0 %v6884_v36 }
 0x2bf   :  { %4848 = vmatprep.subr.bf16.mxu1 %v6887_v51 }
 0x2c1   :  { %4463 = vmatpush1.bf16.msra.mxu0 %v6882_v25  ;;  %v10906_v25 = vld [vmem:[#allocation6_spill] sm:$0xff] }
 0x2c2   :  { %4849 = vmatpush1.bf16.msra.mxu1 %v6885_v56  ;;  %4464 = vmatprep.subr.bf16.mxu0 %v6890_v12 }
 0x2c3   :  { %4850 = vmatprep.subr.bf16.mxu1 %v6893_v48  ;;  %4316 = vmatmul.mubr.bf16.gmra.mrb[136].mxu0 %v7805_v4 }
 0x2c4   :  { %4702 = vmatmul.mubr.bf16.gmra.mrb[136].mxu1 %v7805_v4  ;;  %4325 = vmatprep.mubr.bf16.mxu0 %v7848_v43  ;;  %v6902_v4 = vld [vmem:[%s10864_s1 + $0x864] ss:$48 sps:$4 sm:$0xff]  }
 0x2c5   :  { %4711 = vmatprep.mubr.bf16.mxu1 %v7848_v43  ;;  %4465 = vmatpush1.bf16.msra.mxu0 %v6888_v49  ;;  %v6905_v43 = vld [vmem:[%s10864_s1 + $0x86c] ss:$48 sps:$4 sm:$0xff]  }
 0x2c6   :  { %4851 = vmatpush1.bf16.msra.mxu1 %v6891_v13  ;;  %4466 = vmatprep.subr.bf16.mxu0 %v6896_v15 }
 0x2c7   :  { %4852 = vmatprep.subr.bf16.mxu1 %v6899_v26 }
 0x2c9   :  { %4467 = vmatpush1.bf16.msra.mxu0 %v6894_v14 }
 0x2ca   :  { %4853 = vmatpush1.bf16.msra.mxu1 %v6897_v27  ;;  %4468 = vmatprep.subr.bf16.mxu0 %v6902_v4 }
 0x2cb   :  { %4854 = vmatprep.subr.bf16.mxu1 %v6905_v43  ;;  %4326 = vmatmul.mubr.bf16.gmra.mrb[140].mxu0 %v7877_v52 }
 0x2cc   :  { %4712 = vmatmul.mubr.bf16.gmra.mrb[140].mxu1 %v7877_v52  ;;  %4335 = vmatprep.mubr.bf16.mxu0 %v7920_v42  ;;  %v1237_v52 = vsub.s32 4, %v8770_v0 }
 0x2cd   :  { %4721 = vmatprep.mubr.bf16.mxu1 %v7920_v42  ;;  %4469 = vmatpush1.bf16.msra.mxu0 %v6900_v17  ;;  %v1245_v42 = vsub.s32 6, %v8770_v0 }
 0x2ce   :  { %4855 = vmatpush1.bf16.msra.mxu1 %v6903_v60  ;;  %4470 = vmatprep.subr.bf16.mxu0 %v6908_v39 }
 0x2cf   :  { %4856 = vmatprep.subr.bf16.mxu1 %v6911_v63 }
 0x2d1   :  { %4471 = vmatpush1.bf16.msra.mxu0 %v6906_v2 }
 0x2d2   :  { %4857 = vmatpush1.bf16.msra.mxu1 %v6909_v18 }
 0x2d3   :  { %4336 = vmatmul.mubr.bf16.gmra.mrb[144].mxu0 %v7949_v59 }
 0x2d4   :  { %4722 = vmatmul.mubr.bf16.gmra.mrb[144].mxu1 %v7949_v59  ;;  %4345 = vmatprep.mubr.bf16.mxu0 %v7970_v9  ;;  %v1241_v59 = vsub.s32 5, %v8770_v0 }
 0x2d5   :  { %4731 = vmatprep.mubr.bf16.mxu1 %v7970_v9  ;;  %v1249_v9 = vsub.s32 7, %v8770_v0 }
 0x2db   :  { %4346 = vmatmul.mubr.bf16.gmra.mrb[148].mxu0 %v7987_v54 }
 0x2dc   :  { %4732 = vmatmul.mubr.bf16.gmra.mrb[148].mxu1 %v7987_v54  ;;  %4355 = vmatprep.mubr.bf16.mxu0 %v8012_v16  ;;  %v7072_v54 = vld [vmem:[%s10865_s2] sm:$0xff] }
 0x2dd   :  { %4741 = vmatprep.mubr.bf16.mxu1 %v8012_v16  ;;  %v9728_v16 = vrot.slane %v7072_v54, %v1237_v52 }
 0x2e3   :  { %4356 = vmatmul.mubr.bf16.gmra.mrb[152].mxu0 %v8029_v44 }
 0x2e4   :  { %4742 = vmatmul.mubr.bf16.gmra.mrb[152].mxu1 %v8029_v44  ;;  %4365 = vmatprep.mubr.bf16.mxu0 %v8054_v11  ;;  %v9730_v44 = vrot.slane %v7072_v54, %v1245_v42 }
 0x2e5   :  { %4751 = vmatprep.mubr.bf16.mxu1 %v8054_v11  ;;  %v9734_v11 = vrot.slane %v7072_v54, %v1241_v59 }
 0x2eb   :  { %4366 = vmatmul.mubr.bf16.gmra.mrb[156].mxu0 %v8071_v37 }
 0x2ec   :  { %4752 = vmatmul.mubr.bf16.gmra.mrb[156].mxu1 %v8071_v37  ;;  %4375 = vmatprep.mubr.bf16.mxu0 %v8096_v38  ;;  %v9736_v37 = vrot.slane %v7072_v54, %v1249_v9 }
 0x2ed   :  { %4761 = vmatprep.mubr.bf16.mxu1 %v8096_v38 }
 0x2f3   :  { %4376 = vmatmul.mubr.bf16.gmra.mrb[160].mxu0 %v8113_v46 }
 0x2f4   :  { %4762 = vmatmul.mubr.bf16.gmra.mrb[160].mxu1 %v8113_v46  ;;  %4385 = vmatprep.mubr.bf16.mxu0 %v8138_v24 }
 0x2f5   :  { %4771 = vmatprep.mubr.bf16.mxu1 %v8138_v24 }
 0x2fb   :  { %4386 = vmatmul.mubr.bf16.gmra.mrb[164].mxu0 %v8155_v19 }
 0x2fc   :  { %4772 = vmatmul.mubr.bf16.gmra.mrb[164].mxu1 %v8155_v19  ;;  %4395 = vmatprep.mubr.bf16.mxu0 %v8180_v21 }
 0x2fd   :  { %4781 = vmatprep.mubr.bf16.mxu1 %v8180_v21 }
 0x303   :  { %4396 = vmatmul.mubr.bf16.gmra.mrb[168].mxu0 %v10901_v50 }
 0x304   :  { %4782 = vmatmul.mubr.bf16.gmra.mrb[168].mxu1 %v10901_v50  ;;  %4405 = vmatprep.mubr.bf16.mxu0 %v10902_v7 }
 0x305   :  { %4791 = vmatprep.mubr.bf16.mxu1 %v10902_v7 }
 0x306   :  { %v3718_v38 = vpop.f32.mrb[64].mxu0 }
 0x307   :  { %v4104_v46 = vpop.f32.mrb[64].mxu1  ;;  %v5839_v24 = vadd.f32 %v3718_v38, %v9728_v16  ;;  %v3720_v21 = vpop.f32.mrb[65].mxu0 }
 0x308   :  { %v5903_v19 = vadd.f32 %v4104_v46, %v9730_v44  ;;  %v4106_v50 = vpop.f32.mrb[65].mxu1  ;;  %v5840_v23 = vadd.f32 %v3720_v21, %v9734_v11  ;;  %v3722_v8 = vpop.f32.mrb[66].mxu0 }
 0x309   :  { %v5904_v31 = vadd.f32 %v4106_v50, %v9736_v37  ;;  %v4108_v45 = vpop.f32.mrb[66].mxu1  ;;  %5039 = vst [vmem:[%s10866_s3 + $0x20] sm:$0xff] %v5839_v24  ;;  %v5841_v7 = vadd.f32 %v3722_v8, %v9728_v16  ;;  %v3724_v57 = vpop.f32.mrb[67].mxu0 }
 0x30a   :  { %5041 = vst [vmem:[%s10866_s3 + $0x30] sm:$0xff] %v5903_v19  ;;  %v5905_v35 = vadd.f32 %v4108_v45, %v9730_v44  ;;  %v4110_v61 = vpop.f32.mrb[67].mxu1  ;;  %5040 = vst [vmem:[%s10866_s3 + $0x28] sm:$0xff] %v5840_v23  ;;  %v5842_v36 = vadd.f32 %v3724_v57, %v9734_v11 }
 0x30b   :  { %5042 = vst [vmem:[%s10866_s3 + $0x38] sm:$0xff] %v5904_v31  ;;  %v5906_v51 = vadd.f32 %v4110_v61, %v9736_v37  ;;  %5051 = vst [vmem:[%s10866_s3 + $0x80] sm:$0xff] %v5841_v7  ;;  %4406 = vmatmul.mubr.bf16.gmra.mrb[172].mxu0 %v10903_v20  ;;  %v10907_v31 = vld [vmem:[#allocation7_spill] sm:$0xff] }
 0x30c   :  { %5053 = vst [vmem:[%s10866_s3 + $0x90] sm:$0xff] %v5905_v35  ;;  %4792 = vmatmul.mubr.bf16.gmra.mrb[172].mxu1 %v10903_v20  ;;  %5052 = vst [vmem:[%s10866_s3 + $0x88] sm:$0xff] %v5842_v36  ;;  %4415 = vmatprep.mubr.bf16.mxu0 %v10906_v25 }
 0x30d   :  { %5054 = vst [vmem:[%s10866_s3 + $0x98] sm:$0xff] %v5906_v51  ;;  %4801 = vmatprep.mubr.bf16.mxu1 %v10906_v25 }
 0x30e   :  { %v3728_v56 = vpop.f32.mrb[68].mxu0 }
 0x30f   :  { %v4114_v12 = vpop.f32.mrb[68].mxu1  ;;  %v5843_v48 = vadd.f32 %v3728_v56, %v9728_v16  ;;  %v3730_v13 = vpop.f32.mrb[69].mxu0 }
 0x310   :  { %v5907_v49 = vadd.f32 %v4114_v12, %v9730_v44  ;;  %v4116_v20 = vpop.f32.mrb[69].mxu1  ;;  %v5844_v15 = vadd.f32 %v3730_v13, %v9734_v11  ;;  %v3732_v14 = vpop.f32.mrb[70].mxu0 }
 0x311   :  { %v5908_v26 = vadd.f32 %v4116_v20, %v9736_v37  ;;  %v4118_v27 = vpop.f32.mrb[70].mxu1  ;;  %5063 = vst [vmem:[%s10866_s3 + $0xe0] sm:$0xff] %v5843_v48  ;;  %v5845_v4 = vadd.f32 %v3732_v14, %v9728_v16  ;;  %v3734_v17 = vpop.f32.mrb[71].mxu0 }
 0x312   :  { %5065 = vst [vmem:[%s10866_s3 + $0xf0] sm:$0xff] %v5907_v49  ;;  %v5909_v43 = vadd.f32 %v4118_v27, %v9730_v44  ;;  %v4120_v60 = vpop.f32.mrb[71].mxu1  ;;  %5064 = vst [vmem:[%s10866_s3 + $0xe8] sm:$0xff] %v5844_v15  ;;  %v5846_v39 = vadd.f32 %v3734_v17, %v9734_v11  ;;  %v10908_v15 = vld [vmem:[#allocation8_spill] sm:$0xff] }
 0x313   :  { %5066 = vst [vmem:[%s10866_s3 + $0xf8] sm:$0xff] %v5908_v26  ;;  %v5910_v63 = vadd.f32 %v4120_v60, %v9736_v37  ;;  %5075 = vst [vmem:[%s10866_s3 + $0x140] sm:$0xff] %v5845_v4  ;;  %4416 = vmatmul.mubr.bf16.gmra.mrb[176].mxu0 %v8277_v28  ;;  %v10909_v26 = vld [vmem:[#allocation9_spill] sm:$0xff] }
 0x314   :  { %5077 = vst [vmem:[%s10866_s3 + $0x150] sm:$0xff] %v5909_v43  ;;  %4802 = vmatmul.mubr.bf16.gmra.mrb[176].mxu1 %v8277_v28  ;;  %5076 = vst [vmem:[%s10866_s3 + $0x148] sm:$0xff] %v5846_v39  ;;  %4425 = vmatprep.mubr.bf16.mxu0 %v8300_v34 }
 0x315   :  { %5078 = vst [vmem:[%s10866_s3 + $0x158] sm:$0xff] %v5910_v63  ;;  %4811 = vmatprep.mubr.bf16.mxu1 %v8300_v34 }
 0x316   :  { %v3738_v2 = vpop.f32.mrb[72].mxu0 }
 0x317   :  { %v4124_v18 = vpop.f32.mrb[72].mxu1  ;;  %v5847_v52 = vadd.f32 %v3738_v2, %v9728_v16  ;;  %v3740_v59 = vpop.f32.mrb[73].mxu0 }
 0x318   :  { %v5911_v42 = vadd.f32 %v4124_v18, %v9730_v44  ;;  %v4126_v28 = vpop.f32.mrb[73].mxu1  ;;  %v5848_v9 = vadd.f32 %v3740_v59, %v9734_v11  ;;  %v3742_v38 = vpop.f32.mrb[74].mxu0 }
 0x319   :  { %v5912_v54 = vadd.f32 %v4126_v28, %v9736_v37  ;;  %v4128_v46 = vpop.f32.mrb[74].mxu1  ;;  %5087 = vst [vmem:[%s10866_s3 + $0x1a0] sm:$0xff] %v5847_v52  ;;  %v5849_v34 = vadd.f32 %v3742_v38, %v9728_v16  ;;  %v3744_v19 = vpop.f32.mrb[75].mxu0  ;;  %v10910_v38 = vld [vmem:[#allocation10_spill] sm:$0xff] }
 0x31a   :  { %5089 = vst [vmem:[%s10866_s3 + $0x1b0] sm:$0xff] %v5911_v42  ;;  %v5913_v24 = vadd.f32 %v4128_v46, %v9730_v44  ;;  %v4130_v21 = vpop.f32.mrb[75].mxu1  ;;  %5088 = vst [vmem:[%s10866_s3 + $0x1a8] sm:$0xff] %v5848_v9  ;;  %v5850_v50 = vadd.f32 %v3744_v19, %v9734_v11 }
 0x31b   :  { %5090 = vst [vmem:[%s10866_s3 + $0x1b8] sm:$0xff] %v5912_v54  ;;  %v5914_v23 = vadd.f32 %v4130_v21, %v9736_v37  ;;  %5099 = vst [vmem:[%s10866_s3 + $0x200] sm:$0xff] %v5849_v34  ;;  %4426 = vmatmul.mubr.bf16.gmra.mrb[180].mxu0 %v8310_v58 }
 0x31c   :  { %5101 = vst [vmem:[%s10866_s3 + $0x210] sm:$0xff] %v5913_v24  ;;  %4812 = vmatmul.mubr.bf16.gmra.mrb[180].mxu1 %v8310_v58  ;;  %5100 = vst [vmem:[%s10866_s3 + $0x208] sm:$0xff] %v5850_v50  ;;  %4435 = vmatprep.mubr.bf16.mxu0 %v10907_v31 }
 0x31d   :  { %5102 = vst [vmem:[%s10866_s3 + $0x218] sm:$0xff] %v5914_v23  ;;  %4821 = vmatprep.mubr.bf16.mxu1 %v10907_v31 }
 0x31e   :  { %v3748_v8 = vpop.f32.mrb[76].mxu0 }
 0x31f   :  { %v4134_v45 = vpop.f32.mrb[76].mxu1  ;;  %v5851_v7 = vadd.f32 %v3748_v8, %v9728_v16  ;;  %v3750_v57 = vpop.f32.mrb[77].mxu0 }
 0x320   :  { %v5915_v35 = vadd.f32 %v4134_v45, %v9730_v44  ;;  %v4136_v58 = vpop.f32.mrb[77].mxu1  ;;  %v5852_v61 = vadd.f32 %v3750_v57, %v9734_v11  ;;  %v3752_v51 = vpop.f32.mrb[78].mxu0 }
 0x321   :  { %v5916_v36 = vadd.f32 %v4136_v58, %v9736_v37  ;;  %v4138_v25 = vpop.f32.mrb[78].mxu1  ;;  %5111 = vst [vmem:[%s10866_s3 + $0x260] sm:$0xff] %v5851_v7  ;;  %v5853_v56 = vadd.f32 %v3752_v51, %v9728_v16  ;;  %v3754_v48 = vpop.f32.mrb[79].mxu0  ;;  %v10911_v51 = vld [vmem:[#allocation2_spill] sm:$0xff] }
 0x322   :  { %5113 = vst [vmem:[%s10866_s3 + $0x270] sm:$0xff] %v5915_v35  ;;  %v5917_v12 = vadd.f32 %v4138_v25, %v9730_v44  ;;  %v4140_v49 = vpop.f32.mrb[79].mxu1  ;;  %5112 = vst [vmem:[%s10866_s3 + $0x268] sm:$0xff] %v5852_v61  ;;  %v5854_v13 = vadd.f32 %v3754_v48, %v9734_v11 }
 0x323   :  { %5114 = vst [vmem:[%s10866_s3 + $0x278] sm:$0xff] %v5916_v36  ;;  %v5918_v20 = vadd.f32 %v4140_v49, %v9736_v37  ;;  %5123 = vst [vmem:[%s10866_s3 + $0x2c0] sm:$0xff] %v5853_v56  ;;  %4436 = vmatmul.mubr.bf16.gmra.mrb[184].mxu0 %v10908_v15 }
 0x324   :  { %5125 = vst [vmem:[%s10866_s3 + $0x2d0] sm:$0xff] %v5917_v12  ;;  %4822 = vmatmul.mubr.bf16.gmra.mrb[184].mxu1 %v10908_v15  ;;  %5124 = vst [vmem:[%s10866_s3 + $0x2c8] sm:$0xff] %v5854_v13  ;;  %4445 = vmatprep.mubr.bf16.mxu0 %v10909_v26 }
 0x325   :  { %5126 = vst [vmem:[%s10866_s3 + $0x2d8] sm:$0xff] %v5918_v20  ;;  %4831 = vmatprep.mubr.bf16.mxu1 %v10909_v26 }
 0x326   :  { %v3758_v14 = vpop.f32.mrb[80].mxu0 }
 0x327   :  { %v4144_v27 = vpop.f32.mrb[80].mxu1  ;;  %v5855_v4 = vadd.f32 %v3758_v14, %v9728_v16  ;;  %v3760_v17 = vpop.f32.mrb[81].mxu0 }
 0x328   :  { %v5919_v43 = vadd.f32 %v4144_v27, %v9730_v44  ;;  %v4146_v60 = vpop.f32.mrb[81].mxu1  ;;  %v5856_v39 = vadd.f32 %v3760_v17, %v9734_v11  ;;  %v3762_v2 = vpop.f32.mrb[82].mxu0 }
 0x329   :  { %v5920_v63 = vadd.f32 %v4146_v60, %v9736_v37  ;;  %v4148_v18 = vpop.f32.mrb[82].mxu1  ;;  %5135 = vst [vmem:[%s10866_s3 + $0x320] sm:$0xff] %v5855_v4  ;;  %v5857_v52 = vadd.f32 %v3762_v2, %v9728_v16  ;;  %v3764_v59 = vpop.f32.mrb[83].mxu0 }
 0x32a   :  { %5137 = vst [vmem:[%s10866_s3 + $0x330] sm:$0xff] %v5919_v43  ;;  %v5921_v42 = vadd.f32 %v4148_v18, %v9730_v44  ;;  %v4150_v28 = vpop.f32.mrb[83].mxu1  ;;  %5136 = vst [vmem:[%s10866_s3 + $0x328] sm:$0xff] %v5856_v39  ;;  %v5858_v9 = vadd.f32 %v3764_v59, %v9734_v11 }
 0x32b   :  { %5138 = vst [vmem:[%s10866_s3 + $0x338] sm:$0xff] %v5920_v63  ;;  %v5922_v54 = vadd.f32 %v4150_v28, %v9736_v37  ;;  %5147 = vst [vmem:[%s10866_s3 + $0x380] sm:$0xff] %v5857_v52  ;;  %4446 = vmatmul.mubr.bf16.gmra.mrb[188].mxu0 %v10910_v38 }
 0x32c   :  { %5149 = vst [vmem:[%s10866_s3 + $0x390] sm:$0xff] %v5921_v42  ;;  %4832 = vmatmul.mubr.bf16.gmra.mrb[188].mxu1 %v10910_v38  ;;  %5148 = vst [vmem:[%s10866_s3 + $0x388] sm:$0xff] %v5858_v9  ;;  %4488 = vmatprep.mubr.bf16.mxu0 %v10905_v22 }
 0x32d   :  { %5150 = vst [vmem:[%s10866_s3 + $0x398] sm:$0xff] %v5922_v54  ;;  %4874 = vmatprep.mubr.bf16.mxu1 %v10905_v22 }
 0x32e   :  { %v3768_v46 = vpop.f32.mrb[84].mxu0 }
 0x32f   :  { %v4154_v34 = vpop.f32.mrb[84].mxu1  ;;  %v5859_v24 = vadd.f32 %v3768_v46, %v9728_v16  ;;  %v3770_v21 = vpop.f32.mrb[85].mxu0 }
 0x330   :  { %v5923_v19 = vadd.f32 %v4154_v34, %v9730_v44  ;;  %v4156_v50 = vpop.f32.mrb[85].mxu1  ;;  %v5860_v23 = vadd.f32 %v3770_v21, %v9734_v11  ;;  %v3772_v8 = vpop.f32.mrb[86].mxu0 }
 0x331   :  { %v5924_v31 = vadd.f32 %v4156_v50, %v9736_v37  ;;  %v4158_v45 = vpop.f32.mrb[86].mxu1  ;;  %5159 = vst [vmem:[%s10866_s3 + $0x3e0] sm:$0xff] %v5859_v24  ;;  %v5861_v7 = vadd.f32 %v3772_v8, %v9728_v16  ;;  %v3774_v57 = vpop.f32.mrb[87].mxu0 }
 0x332   :  { %5161 = vst [vmem:[%s10866_s3 + $0x3f0] sm:$0xff] %v5923_v19  ;;  %v5925_v35 = vadd.f32 %v4158_v45, %v9730_v44  ;;  %v4160_v58 = vpop.f32.mrb[87].mxu1  ;;  %5160 = vst [vmem:[%s10866_s3 + $0x3e8] sm:$0xff] %v5860_v23  ;;  %v5862_v61 = vadd.f32 %v3774_v57, %v9734_v11 }
 0x333   :  { %5162 = vst [vmem:[%s10866_s3 + $0x3f8] sm:$0xff] %v5924_v31  ;;  %v5926_v36 = vadd.f32 %v4160_v58, %v9736_v37  ;;  %5171 = vst [vmem:[%s10866_s3 + $0x440] sm:$0xff] %v5861_v7  ;;  %4489 = vmatmul.mubr.bf16.vlgmr.msra.gmra.mrb[128].mxu0 %v10911_v51 }
 0x334   :  { %5173 = vst [vmem:[%s10866_s3 + $0x450] sm:$0xff] %v5925_v35  ;;  %4875 = vmatmul.mubr.bf16.vlgmr.msra.gmra.mrb[128].mxu1 %v10911_v51  ;;  %5172 = vst [vmem:[%s10866_s3 + $0x448] sm:$0xff] %v5862_v61  ;;  %4498 = vmatprep.mubr.bf16.mxu0 %v10905_v22 }
 0x335   :  { %5174 = vst [vmem:[%s10866_s3 + $0x458] sm:$0xff] %v5926_v36  ;;  %4884 = vmatprep.mubr.bf16.mxu1 %v10905_v22 }
 0x336   :  { %v3778_v25 = vpop.f32.mrb[88].mxu0 }
 0x337   :  { %v4164_v56 = vpop.f32.mrb[88].mxu1  ;;  %v5863_v12 = vadd.f32 %v3778_v25, %v9728_v16  ;;  %v3780_v49 = vpop.f32.mrb[89].mxu0 }
 0x338   :  { %v5927_v48 = vadd.f32 %v4164_v56, %v9730_v44  ;;  %v4166_v13 = vpop.f32.mrb[89].mxu1  ;;  %v5864_v20 = vadd.f32 %v3780_v49, %v9734_v11  ;;  %v3782_v26 = vpop.f32.mrb[90].mxu0 }
 0x339   :  { %v5928_v15 = vadd.f32 %v4166_v13, %v9736_v37  ;;  %v4168_v14 = vpop.f32.mrb[90].mxu1  ;;  %5183 = vst [vmem:[%s10866_s3 + $0x4a0] sm:$0xff] %v5863_v12  ;;  %v5865_v27 = vadd.f32 %v3782_v26, %v9728_v16  ;;  %v3784_v43 = vpop.f32.mrb[91].mxu0 }
 0x33a   :  { %5185 = vst [vmem:[%s10866_s3 + $0x4b0] sm:$0xff] %v5927_v48  ;;  %v5929_v4 = vadd.f32 %v4168_v14, %v9730_v44  ;;  %v4170_v17 = vpop.f32.mrb[91].mxu1  ;;  %5184 = vst [vmem:[%s10866_s3 + $0x4a8] sm:$0xff] %v5864_v20  ;;  %v5866_v60 = vadd.f32 %v3784_v43, %v9734_v11 }
 0x33b   :  { %5186 = vst [vmem:[%s10866_s3 + $0x4b8] sm:$0xff] %v5928_v15  ;;  %v5930_v39 = vadd.f32 %v4170_v17, %v9736_v37  ;;  %5195 = vst [vmem:[%s10866_s3 + $0x500] sm:$0xff] %v5865_v27  ;;  %4499 = vmatmul.mubr.bf16.gmra.mrb[132].mxu0 %v7758_v33 }
 0x33c   :  { %5197 = vst [vmem:[%s10866_s3 + $0x510] sm:$0xff] %v5929_v4  ;;  %4885 = vmatmul.mubr.bf16.gmra.mrb[132].mxu1 %v7758_v33  ;;  %5196 = vst [vmem:[%s10866_s3 + $0x508] sm:$0xff] %v5866_v60  ;;  %4508 = vmatprep.mubr.bf16.mxu0 %v10905_v22 }
 0x33d   :  { %5198 = vst [vmem:[%s10866_s3 + $0x518] sm:$0xff] %v5930_v39  ;;  %4894 = vmatprep.mubr.bf16.mxu1 %v10905_v22 }
 0x33e   :  { %v3788_v63 = vpop.f32.mrb[92].mxu0 }
 0x33f   :  { %v4174_v2 = vpop.f32.mrb[92].mxu1  ;;  %v5867_v18 = vadd.f32 %v3788_v63, %v9728_v16  ;;  %v3790_v42 = vpop.f32.mrb[93].mxu0 }
 0x340   :  { %v5931_v52 = vadd.f32 %v4174_v2, %v9730_v44  ;;  %v4176_v33 = vpop.f32.mrb[93].mxu1  ;;  %v5868_v59 = vadd.f32 %v3790_v42, %v9734_v11  ;;  %v3792_v9 = vpop.f32.mrb[94].mxu0 }
 0x341   :  { %v5932_v28 = vadd.f32 %v4176_v33, %v9736_v37  ;;  %v4178_v54 = vpop.f32.mrb[94].mxu1  ;;  %5207 = vst [vmem:[%s10866_s3 + $0x560] sm:$0xff] %v5867_v18  ;;  %v5869_v38 = vadd.f32 %v3792_v9, %v9728_v16  ;;  %v3794_v34 = vpop.f32.mrb[95].mxu0 }
 0x342   :  { %5209 = vst [vmem:[%s10866_s3 + $0x570] sm:$0xff] %v5931_v52  ;;  %v5933_v46 = vadd.f32 %v4178_v54, %v9730_v44  ;;  %v4180_v24 = vpop.f32.mrb[95].mxu1  ;;  %5208 = vst [vmem:[%s10866_s3 + $0x568] sm:$0xff] %v5868_v59  ;;  %v5870_v19 = vadd.f32 %v3794_v34, %v9734_v11 }
 0x343   :  { %5210 = vst [vmem:[%s10866_s3 + $0x578] sm:$0xff] %v5932_v28  ;;  %v5934_v21 = vadd.f32 %v4180_v24, %v9736_v37  ;;  %5219 = vst [vmem:[%s10866_s3 + $0x5c0] sm:$0xff] %v5869_v38  ;;  %4509 = vmatmul.mubr.bf16.gmra.mrb[136].mxu0 %v7811_v6 }
 0x344   :  { %5221 = vst [vmem:[%s10866_s3 + $0x5d0] sm:$0xff] %v5933_v46  ;;  %4895 = vmatmul.mubr.bf16.gmra.mrb[136].mxu1 %v7811_v6  ;;  %5220 = vst [vmem:[%s10866_s3 + $0x5c8] sm:$0xff] %v5870_v19  ;;  %4518 = vmatprep.mubr.bf16.mxu0 %v10905_v22 }
 0x345   :  { %5222 = vst [vmem:[%s10866_s3 + $0x5d8] sm:$0xff] %v5934_v21  ;;  %4904 = vmatprep.mubr.bf16.mxu1 %v10905_v22 }
 0x346   :  { %v3798_v50 = vpop.f32.mrb[96].mxu0 }
 0x347   :  { %v4184_v23 = vpop.f32.mrb[96].mxu1  ;;  %v5871_v31 = vadd.f32 %v3798_v50, %v9728_v16  ;;  %v3800_v45 = vpop.f32.mrb[97].mxu0 }
 0x348   :  { %v5935_v8 = vadd.f32 %v4184_v23, %v9730_v44  ;;  %v4186_v6 = vpop.f32.mrb[97].mxu1  ;;  %v5872_v7 = vadd.f32 %v3800_v45, %v9734_v11  ;;  %v3802_v57 = vpop.f32.mrb[98].mxu0 }
 0x349   :  { %v5936_v35 = vadd.f32 %v4186_v6, %v9736_v37  ;;  %v4188_v58 = vpop.f32.mrb[98].mxu1  ;;  %5231 = vst [vmem:[%s10866_s3 + $0x620] sm:$0xff] %v5871_v31  ;;  %v5873_v61 = vadd.f32 %v3802_v57, %v9728_v16  ;;  %v3804_v51 = vpop.f32.mrb[99].mxu0 }
 0x34a   :  { %5233 = vst [vmem:[%s10866_s3 + $0x630] sm:$0xff] %v5935_v8  ;;  %v5937_v36 = vadd.f32 %v4188_v58, %v9730_v44  ;;  %v4190_v25 = vpop.f32.mrb[99].mxu1  ;;  %5232 = vst [vmem:[%s10866_s3 + $0x628] sm:$0xff] %v5872_v7  ;;  %v5874_v56 = vadd.f32 %v3804_v51, %v9734_v11 }
 0x34b   :  { %5234 = vst [vmem:[%s10866_s3 + $0x638] sm:$0xff] %v5936_v35  ;;  %v5938_v12 = vadd.f32 %v4190_v25, %v9736_v37  ;;  %5243 = vst [vmem:[%s10866_s3 + $0x680] sm:$0xff] %v5873_v61  ;;  %4519 = vmatmul.mubr.bf16.gmra.mrb[140].mxu0 %v7883_v3 }
 0x34c   :  { %5245 = vst [vmem:[%s10866_s3 + $0x690] sm:$0xff] %v5937_v36  ;;  %4905 = vmatmul.mubr.bf16.gmra.mrb[140].mxu1 %v7883_v3  ;;  %5244 = vst [vmem:[%s10866_s3 + $0x688] sm:$0xff] %v5874_v56  ;;  %4528 = vmatprep.mubr.bf16.mxu0 %v10905_v22 }
 0x34d   :  { %5246 = vst [vmem:[%s10866_s3 + $0x698] sm:$0xff] %v5938_v12  ;;  %4914 = vmatprep.mubr.bf16.mxu1 %v10905_v22 }
 0x34e   :  { %v3808_v48 = vpop.f32.mrb[100].mxu0 }
 0x34f   :  { %v4194_v49 = vpop.f32.mrb[100].mxu1  ;;  %v5875_v13 = vadd.f32 %v3808_v48, %v9728_v16  ;;  %v3810_v15 = vpop.f32.mrb[101].mxu0 }
 0x350   :  { %v5939_v20 = vadd.f32 %v4194_v49, %v9730_v44  ;;  %v4196_v3 = vpop.f32.mrb[101].mxu1  ;;  %v5876_v26 = vadd.f32 %v3810_v15, %v9734_v11  ;;  %v3812_v27 = vpop.f32.mrb[102].mxu0 }
 0x351   :  { %v5940_v14 = vadd.f32 %v4196_v3, %v9736_v37  ;;  %v4198_v4 = vpop.f32.mrb[102].mxu1  ;;  %5255 = vst [vmem:[%s10866_s3 + $0x6e0] sm:$0xff] %v5875_v13  ;;  %v5877_v43 = vadd.f32 %v3812_v27, %v9728_v16  ;;  %v3814_v60 = vpop.f32.mrb[103].mxu0 }
 0x352   :  { %5257 = vst [vmem:[%s10866_s3 + $0x6f0] sm:$0xff] %v5939_v20  ;;  %v5941_v17 = vadd.f32 %v4198_v4, %v9730_v44  ;;  %v4200_v39 = vpop.f32.mrb[103].mxu1  ;;  %5256 = vst [vmem:[%s10866_s3 + $0x6e8] sm:$0xff] %v5876_v26  ;;  %v5878_v63 = vadd.f32 %v3814_v60, %v9734_v11 }
 0x353   :  { %5258 = vst [vmem:[%s10866_s3 + $0x6f8] sm:$0xff] %v5940_v14  ;;  %v5942_v2 = vadd.f32 %v4200_v39, %v9736_v37  ;;  %5267 = vst [vmem:[%s10866_s3 + $0x740] sm:$0xff] %v5877_v43  ;;  %4529 = vmatmul.mubr.bf16.gmra.mrb[144].mxu0 %v7952_v30 }
 0x354   :  { %5269 = vst [vmem:[%s10866_s3 + $0x750] sm:$0xff] %v5941_v17  ;;  %4915 = vmatmul.mubr.bf16.gmra.mrb[144].mxu1 %v7952_v30  ;;  %5268 = vst [vmem:[%s10866_s3 + $0x748] sm:$0xff] %v5878_v63  ;;  %4538 = vmatprep.mubr.bf16.mxu0 %v10905_v22 }
 0x355   :  { %5270 = vst [vmem:[%s10866_s3 + $0x758] sm:$0xff] %v5942_v2  ;;  %4924 = vmatprep.mubr.bf16.mxu1 %v10905_v22 }
 0x356   :  { %v3818_v18 = vpop.f32.mrb[104].mxu0 }
 0x357   :  { %v4204_v52 = vpop.f32.mrb[104].mxu1  ;;  %v5879_v42 = vadd.f32 %v3818_v18, %v9728_v16  ;;  %v3820_v59 = vpop.f32.mrb[105].mxu0 }
 0x358   :  { %v5943_v33 = vadd.f32 %v4204_v52, %v9730_v44  ;;  %v4206_v30 = vpop.f32.mrb[105].mxu1  ;;  %v5880_v28 = vadd.f32 %v3820_v59, %v9734_v11  ;;  %v3822_v54 = vpop.f32.mrb[106].mxu0 }
 0x359   :  { %v5944_v9 = vadd.f32 %v4206_v30, %v9736_v37  ;;  %v4208_v38 = vpop.f32.mrb[106].mxu1  ;;  %5279 = vst [vmem:[%s10866_s3 + $0x7a0] sm:$0xff] %v5879_v42  ;;  %v5881_v46 = vadd.f32 %v3822_v54, %v9728_v16  ;;  %v3824_v24 = vpop.f32.mrb[107].mxu0 }
 0x35a   :  { %5281 = vst [vmem:[%s10866_s3 + $0x7b0] sm:$0xff] %v5943_v33  ;;  %v5945_v34 = vadd.f32 %v4208_v38, %v9730_v44  ;;  %v4210_v19 = vpop.f32.mrb[107].mxu1  ;;  %5280 = vst [vmem:[%s10866_s3 + $0x7a8] sm:$0xff] %v5880_v28  ;;  %v5882_v21 = vadd.f32 %v3824_v24, %v9734_v11 }
 0x35b   :  { %5282 = vst [vmem:[%s10866_s3 + $0x7b8] sm:$0xff] %v5944_v9  ;;  %v5946_v50 = vadd.f32 %v4210_v19, %v9736_v37  ;;  %5291 = vst [vmem:[%s10866_s3 + $0x800] sm:$0xff] %v5881_v46  ;;  %4539 = vmatmul.mubr.bf16.gmra.mrb[148].mxu0 %v7990_v29 }
 0x35c   :  { %5293 = vst [vmem:[%s10866_s3 + $0x810] sm:$0xff] %v5945_v34  ;;  %4925 = vmatmul.mubr.bf16.gmra.mrb[148].mxu1 %v7990_v29  ;;  %5292 = vst [vmem:[%s10866_s3 + $0x808] sm:$0xff] %v5882_v21  ;;  %4548 = vmatprep.mubr.bf16.mxu0 %v10905_v22 }
 0x35d   :  { %5294 = vst [vmem:[%s10866_s3 + $0x818] sm:$0xff] %v5946_v50  ;;  %4934 = vmatprep.mubr.bf16.mxu1 %v10905_v22 }
 0x35e   :  { %v3828_v23 = vpop.f32.mrb[108].mxu0 }
 0x35f   :  { %v4214_v31 = vpop.f32.mrb[108].mxu1  ;;  %v5883_v8 = vadd.f32 %v3828_v23, %v9728_v16  ;;  %v3830_v6 = vpop.f32.mrb[109].mxu0 }
 0x360   :  { %v5947_v45 = vadd.f32 %v4214_v31, %v9730_v44  ;;  %v4216_v29 = vpop.f32.mrb[109].mxu1  ;;  %v5884_v7 = vadd.f32 %v3830_v6, %v9734_v11  ;;  %v3832_v57 = vpop.f32.mrb[110].mxu0 }
 0x361   :  { %v5948_v35 = vadd.f32 %v4216_v29, %v9736_v37  ;;  %v4218_v58 = vpop.f32.mrb[110].mxu1  ;;  %5303 = vst [vmem:[%s10866_s3 + $0x860] sm:$0xff] %v5883_v8  ;;  %v5885_v61 = vadd.f32 %v3832_v57, %v9728_v16  ;;  %v3834_v51 = vpop.f32.mrb[111].mxu0 }
 0x362   :  { %5305 = vst [vmem:[%s10866_s3 + $0x870] sm:$0xff] %v5947_v45  ;;  %v5949_v36 = vadd.f32 %v4218_v58, %v9730_v44  ;;  %v4220_v25 = vpop.f32.mrb[111].mxu1  ;;  %5304 = vst [vmem:[%s10866_s3 + $0x868] sm:$0xff] %v5884_v7  ;;  %v5886_v56 = vadd.f32 %v3834_v51, %v9734_v11 }
 0x363   :  { %5306 = vst [vmem:[%s10866_s3 + $0x878] sm:$0xff] %v5948_v35  ;;  %v5950_v12 = vadd.f32 %v4220_v25, %v9736_v37  ;;  %5315 = vst [vmem:[%s10866_s3 + $0x8c0] sm:$0xff] %v5885_v61  ;;  %4549 = vmatmul.mubr.bf16.gmra.mrb[152].mxu0 %v8032_v53 }
 0x364   :  { %5317 = vst [vmem:[%s10866_s3 + $0x8d0] sm:$0xff] %v5949_v36  ;;  %4935 = vmatmul.mubr.bf16.gmra.mrb[152].mxu1 %v8032_v53  ;;  %5316 = vst [vmem:[%s10866_s3 + $0x8c8] sm:$0xff] %v5886_v56  ;;  %4558 = vmatprep.mubr.bf16.mxu0 %v10905_v22 }
 0x365   :  { %5318 = vst [vmem:[%s10866_s3 + $0x8d8] sm:$0xff] %v5950_v12  ;;  %4944 = vmatprep.mubr.bf16.mxu1 %v10905_v22 }
 0x366   :  { %v3838_v48 = vpop.f32.mrb[112].mxu0 }
 0x367   :  { %v4224_v49 = vpop.f32.mrb[112].mxu1  ;;  %v5887_v13 = vadd.f32 %v3838_v48, %v9728_v16  ;;  %v3840_v15 = vpop.f32.mrb[113].mxu0 }
 0x368   :  { %v5951_v20 = vadd.f32 %v4224_v49, %v9730_v44  ;;  %v4226_v53 = vpop.f32.mrb[113].mxu1  ;;  %v5888_v3 = vadd.f32 %v3840_v15, %v9734_v11  ;;  %v3842_v14 = vpop.f32.mrb[114].mxu0 }
 0x369   :  { %v5952_v26 = vadd.f32 %v4226_v53, %v9736_v37  ;;  %v4228_v27 = vpop.f32.mrb[114].mxu1  ;;  %5327 = vst [vmem:[%s10866_s3 + $0x920] sm:$0xff] %v5887_v13  ;;  %v5889_v4 = vadd.f32 %v3842_v14, %v9728_v16  ;;  %v3844_v17 = vpop.f32.mrb[115].mxu0 }
 0x36a   :  { %5329 = vst [vmem:[%s10866_s3 + $0x930] sm:$0xff] %v5951_v20  ;;  %v5953_v43 = vadd.f32 %v4228_v27, %v9730_v44  ;;  %v4230_v60 = vpop.f32.mrb[115].mxu1  ;;  %5328 = vst [vmem:[%s10866_s3 + $0x928] sm:$0xff] %v5888_v3  ;;  %v5890_v39 = vadd.f32 %v3844_v17, %v9734_v11 }
 0x36b   :  { %5330 = vst [vmem:[%s10866_s3 + $0x938] sm:$0xff] %v5952_v26  ;;  %v5954_v63 = vadd.f32 %v4230_v60, %v9736_v37  ;;  %5339 = vst [vmem:[%s10866_s3 + $0x980] sm:$0xff] %v5889_v4  ;;  %4559 = vmatmul.mubr.bf16.gmra.mrb[156].mxu0 %v8074_v47 }
 0x36c   :  { %5341 = vst [vmem:[%s10866_s3 + $0x990] sm:$0xff] %v5953_v43  ;;  %4945 = vmatmul.mubr.bf16.gmra.mrb[156].mxu1 %v8074_v47  ;;  %5340 = vst [vmem:[%s10866_s3 + $0x988] sm:$0xff] %v5890_v39  ;;  %4568 = vmatprep.mubr.bf16.mxu0 %v10905_v22 }
 0x36d   :  { %5342 = vst [vmem:[%s10866_s3 + $0x998] sm:$0xff] %v5954_v63  ;;  %4954 = vmatprep.mubr.bf16.mxu1 %v10905_v22 }
 0x36e   :  { %v3848_v2 = vpop.f32.mrb[116].mxu0 }
 0x36f   :  { %v4234_v18 = vpop.f32.mrb[116].mxu1  ;;  %v5891_v52 = vadd.f32 %v3848_v2, %v9728_v16  ;;  %v3850_v33 = vpop.f32.mrb[117].mxu0 }
 0x370   :  { %v5955_v42 = vadd.f32 %v4234_v18, %v9730_v44  ;;  %v4236_v47 = vpop.f32.mrb[117].mxu1  ;;  %v5892_v59 = vadd.f32 %v3850_v33, %v9734_v11  ;;  %v3852_v28 = vpop.f32.mrb[118].mxu0 }
 0x371   :  { %v5956_v30 = vadd.f32 %v4236_v47, %v9736_v37  ;;  %v4238_v9 = vpop.f32.mrb[118].mxu1  ;;  %5351 = vst [vmem:[%s10866_s3 + $0x9e0] sm:$0xff] %v5891_v52  ;;  %v5893_v54 = vadd.f32 %v3852_v28, %v9728_v16  ;;  %v3854_v46 = vpop.f32.mrb[119].mxu0 }
 0x372   :  { %5353 = vst [vmem:[%s10866_s3 + $0x9f0] sm:$0xff] %v5955_v42  ;;  %v5957_v38 = vadd.f32 %v4238_v9, %v9730_v44  ;;  %v4240_v34 = vpop.f32.mrb[119].mxu1  ;;  %5352 = vst [vmem:[%s10866_s3 + $0x9e8] sm:$0xff] %v5892_v59  ;;  %v5894_v24 = vadd.f32 %v3854_v46, %v9734_v11 }
 0x373   :  { %5354 = vst [vmem:[%s10866_s3 + $0x9f8] sm:$0xff] %v5956_v30  ;;  %v5958_v19 = vadd.f32 %v4240_v34, %v9736_v37  ;;  %5363 = vst [vmem:[%s10866_s3 + $0xa40] sm:$0xff] %v5893_v54  ;;  %4569 = vmatmul.mubr.bf16.gmra.mrb[160].mxu0 %v8116_v55 }
 0x374   :  { %5365 = vst [vmem:[%s10866_s3 + $0xa50] sm:$0xff] %v5957_v38  ;;  %4955 = vmatmul.mubr.bf16.gmra.mrb[160].mxu1 %v8116_v55  ;;  %5364 = vst [vmem:[%s10866_s3 + $0xa48] sm:$0xff] %v5894_v24  ;;  %4578 = vmatprep.mubr.bf16.mxu0 %v10905_v22 }
 0x375   :  { %5366 = vst [vmem:[%s10866_s3 + $0xa58] sm:$0xff] %v5958_v19  ;;  %4964 = vmatprep.mubr.bf16.mxu1 %v10905_v22 }
 0x376   :  { %v3858_v21 = vpop.f32.mrb[120].mxu0 }
 0x377   :  { %v4244_v50 = vpop.f32.mrb[120].mxu1  ;;  %v5895_v23 = vadd.f32 %v3858_v21, %v9728_v16  ;;  %v3860_v8 = vpop.f32.mrb[121].mxu0 }
 0x378   :  { %v5959_v31 = vadd.f32 %v4244_v50, %v9730_v44  ;;  %v4246_v55 = vpop.f32.mrb[121].mxu1  ;;  %v5896_v45 = vadd.f32 %v3860_v8, %v9734_v11  ;;  %v3862_v29 = vpop.f32.mrb[122].mxu0 }
 0x379   :  { %v5960_v6 = vadd.f32 %v4246_v55, %v9736_v37  ;;  %v4248_v7 = vpop.f32.mrb[122].mxu1  ;;  %5375 = vst [vmem:[%s10866_s3 + $0xaa0] sm:$0xff] %v5895_v23  ;;  %v5897_v35 = vadd.f32 %v3862_v29, %v9728_v16  ;;  %v3864_v58 = vpop.f32.mrb[123].mxu0 }
 0x37a   :  { %5377 = vst [vmem:[%s10866_s3 + $0xab0] sm:$0xff] %v5959_v31  ;;  %v5961_v57 = vadd.f32 %v4248_v7, %v9730_v44  ;;  %v4250_v61 = vpop.f32.mrb[123].mxu1  ;;  %5376 = vst [vmem:[%s10866_s3 + $0xaa8] sm:$0xff] %v5896_v45  ;;  %v5898_v36 = vadd.f32 %v3864_v58, %v9734_v11 }
 0x37b   :  { %5378 = vst [vmem:[%s10866_s3 + $0xab8] sm:$0xff] %v5960_v6  ;;  %v5962_v51 = vadd.f32 %v4250_v61, %v9736_v37  ;;  %5387 = vst [vmem:[%s10866_s3 + $0xb00] sm:$0xff] %v5897_v35  ;;  %4579 = vmatmul.mubr.bf16.gmra.mrb[164].mxu0 %v8158_v41 }
 0x37c   :  { %5389 = vst [vmem:[%s10866_s3 + $0xb10] sm:$0xff] %v5961_v57  ;;  %4965 = vmatmul.mubr.bf16.gmra.mrb[164].mxu1 %v8158_v41  ;;  %5388 = vst [vmem:[%s10866_s3 + $0xb08] sm:$0xff] %v5898_v36  ;;  %4588 = vmatprep.mubr.bf16.mxu0 %v10905_v22 }
 0x37d   :  { %5390 = vst [vmem:[%s10866_s3 + $0xb18] sm:$0xff] %v5962_v51  ;;  %4974 = vmatprep.mubr.bf16.mxu1 %v10905_v22 }
 0x37e   :  { %v3868_v25 = vpop.f32.mrb[124].mxu0 }
 0x37f   :  { %v4254_v56 = vpop.f32.mrb[124].mxu1  ;;  %v5899_v12 = vadd.f32 %v3868_v25, %v9728_v16  ;;  %v3870_v49 = vpop.f32.mrb[125].mxu0 }
 0x380   :  { %v5963_v48 = vadd.f32 %v4254_v56, %v9730_v44  ;;  %v4256_v41 = vpop.f32.mrb[125].mxu1  ;;  %v5900_v13 = vadd.f32 %v3870_v49, %v9734_v11  ;;  %v3872_v15 = vpop.f32.mrb[126].mxu0 }
 0x381   :  { %v5964_v20 = vadd.f32 %v4256_v41, %v9736_v37  ;;  %v4258_v53 = vpop.f32.mrb[126].mxu1  ;;  %5399 = vst [vmem:[%s10866_s3 + $0xb60] sm:$0xff] %v5899_v12  ;;  %v5901_v3 = vadd.f32 %v3872_v15, %v9728_v16  ;;  %v3874_v14 = vpop.f32.mrb[127].mxu0 }
 0x382   :  { %5401 = vst [vmem:[%s10866_s3 + $0xb70] sm:$0xff] %v5963_v48  ;;  %v5965_v26 = vadd.f32 %v4258_v53, %v9730_v44  ;;  %v4260_v27 = vpop.f32.mrb[127].mxu1  ;;  %5400 = vst [vmem:[%s10866_s3 + $0xb68] sm:$0xff] %v5900_v13  ;;  %v5902_v4 = vadd.f32 %v3874_v14, %v9734_v11 }
 0x383   :  { %5402 = vst [vmem:[%s10866_s3 + $0xb78] sm:$0xff] %v5964_v20  ;;  %v5966_v43 = vadd.f32 %v4260_v27, %v9736_v37  ;;  %5411 = vst [vmem:[%s10866_s3 + $0xbc0] sm:$0xff] %v5901_v3  ;;  %4589 = vmatmul.mubr.bf16.gmra.mrb[168].mxu0 %v8200_v1 }
 0x384   :  { %5413 = vst [vmem:[%s10866_s3 + $0xbd0] sm:$0xff] %v5965_v26  ;;  %4975 = vmatmul.mubr.bf16.gmra.mrb[168].mxu1 %v8200_v1  ;;  %5412 = vst [vmem:[%s10866_s3 + $0xbc8] sm:$0xff] %v5902_v4  ;;  %4598 = vmatprep.mubr.bf16.mxu0 %v10905_v22  ;;  %v1216_v1 = vld [vmem:[%s10865_s2 + $0x8] sm:$0xf] }
 0x385   :  { %5414 = vst [vmem:[%s10866_s3 + $0xbd8] sm:$0xff] %v5966_v43  ;;  %4984 = vmatprep.mubr.bf16.mxu1 %v10905_v22 }
 0x38b   :  { %4599 = vmatmul.mubr.bf16.gmra.mrb[172].mxu0 %v8242_v10 }
 0x38c   :  { %4985 = vmatmul.mubr.bf16.gmra.mrb[172].mxu1 %v8242_v10  ;;  %4608 = vmatprep.mubr.bf16.mxu0 %v10905_v22  ;;  %v10912_v10 = vsub.s32 0, %v8770_v0 }
 0x38d   :  { %4994 = vmatprep.mubr.bf16.mxu1 %v10905_v22 }
 0x393   :  { %4609 = vmatmul.mubr.bf16.gmra.mrb[176].mxu0 %v8280_v40 }
 0x394   :  { %4995 = vmatmul.mubr.bf16.gmra.mrb[176].mxu1 %v8280_v40  ;;  %4618 = vmatprep.mubr.bf16.mxu0 %v10905_v22  ;;  %v10913_v40 = vsub.s32 2, %v8770_v0 }
 0x395   :  { %5004 = vmatprep.mubr.bf16.mxu1 %v10905_v22 }
 0x396   :  { %v10341_v16 = vrot.slane %v1216_v1, %v10913_v40 }
 0x39b   :  { %4619 = vmatmul.mubr.bf16.gmra.mrb[180].mxu0 %v8302_v5 }
 0x39c   :  { %5005 = vmatmul.mubr.bf16.gmra.mrb[180].mxu1 %v8302_v5  ;;  %4628 = vmatprep.mubr.bf16.mxu0 %v10905_v22  ;;  %v10337_v5 = vrot.slane %v1216_v1, %v10912_v10 }
 0x39d   :  { %5014 = vmatprep.mubr.bf16.mxu1 %v10905_v22 }
 0x3a3   :  { %4629 = vmatmul.mubr.bf16.gmra.mrb[184].mxu0 %v8336_v32 }
 0x3a4   :  { %5015 = vmatmul.mubr.bf16.gmra.mrb[184].mxu1 %v8336_v32  ;;  %4638 = vmatprep.mubr.bf16.mxu0 %v10905_v22  ;;  %v10914_v32 = vsub.s32 1, %v8770_v0 }
 0x3a5   :  { %5024 = vmatprep.mubr.bf16.mxu1 %v10905_v22  ;;  %v10915_v22 = vsub.s32 3, %v8770_v0 }
 0x3a6   :  { %v10345_v44 = vrot.slane %v1216_v1, %v10914_v32 }
 0x3a7   :  { %v10349_v11 = vrot.slane %v1216_v1, %v10915_v22 }
 0x3ab   :  { %4639 = vmatmul.mubr.bf16.gmra.mrb[188].mxu0 %v8370_v62 }
 0x3ac   :  { %5025 = vmatmul.mubr.bf16.gmra.mrb[188].mxu1 %v8370_v62 }
 0x406   :  { %v4490_v62 = vpop.f32.mrb[128].mxu0 }
 0x407   :  { %v4876_v37 = vpop.f32.mrb[128].mxu1  ;;  %v5967_v17 = vadd.f32 %v4490_v62, %v10337_v5  ;;  %v4492_v39 = vpop.f32.mrb[129].mxu0 }
 0x408   :  { %v6031_v60 = vadd.f32 %v4876_v37, %v10341_v16  ;;  %v4878_v63 = vpop.f32.mrb[129].mxu1  ;;  %v5968_v2 = vadd.f32 %v4492_v39, %v10345_v44  ;;  %v4494_v52 = vpop.f32.mrb[130].mxu0 }
 0x409   :  { %v6032_v18 = vadd.f32 %v4878_v63, %v10349_v11  ;;  %v4880_v42 = vpop.f32.mrb[130].mxu1  ;;  %5043 = vst [vmem:[%s10866_s3 + $0x40] sm:$0xff] %v5967_v17  ;;  %v5969_v0 = vadd.f32 %v4494_v52, %v10337_v5  ;;  %v4496_v47 = vpop.f32.mrb[131].mxu0 }
 0x40a   :  { %5045 = vst [vmem:[%s10866_s3 + $0x50] sm:$0xff] %v6031_v60  ;;  %v6033_v33 = vadd.f32 %v4880_v42, %v10341_v16  ;;  %v4882_v59 = vpop.f32.mrb[131].mxu1  ;;  %5044 = vst [vmem:[%s10866_s3 + $0x48] sm:$0xff] %v5968_v2  ;;  %v5970_v30 = vadd.f32 %v4496_v47, %v10345_v44 }
 0x40b   :  { %5046 = vst [vmem:[%s10866_s3 + $0x58] sm:$0xff] %v6032_v18  ;;  %v6034_v28 = vadd.f32 %v4882_v59, %v10349_v11  ;;  %5055 = vst [vmem:[%s10866_s3 + $0xa0] sm:$0xff] %v5969_v0 }
 0x40c   :  { %5057 = vst [vmem:[%s10866_s3 + $0xb0] sm:$0xff] %v6033_v33  ;;  %5056 = vst [vmem:[%s10866_s3 + $0xa8] sm:$0xff] %v5970_v30 }
 0x40d   :  { %5058 = vst [vmem:[%s10866_s3 + $0xb8] sm:$0xff] %v6034_v28 }
 0x40e   :  { %v4500_v9 = vpop.f32.mrb[132].mxu0 }
 0x40f   :  { %v4886_v54 = vpop.f32.mrb[132].mxu1  ;;  %v5971_v38 = vadd.f32 %v4500_v9, %v10337_v5  ;;  %v4502_v34 = vpop.f32.mrb[133].mxu0 }
 0x410   :  { %v6035_v46 = vadd.f32 %v4886_v54, %v10341_v16  ;;  %v4888_v24 = vpop.f32.mrb[133].mxu1  ;;  %v5972_v19 = vadd.f32 %v4502_v34, %v10345_v44  ;;  %v4504_v50 = vpop.f32.mrb[134].mxu0 }
 0x411   :  { %v6036_v21 = vadd.f32 %v4888_v24, %v10349_v11  ;;  %v4890_v23 = vpop.f32.mrb[134].mxu1  ;;  %5067 = vst [vmem:[%s10866_s3 + $0x100] sm:$0xff] %v5971_v38  ;;  %v5973_v31 = vadd.f32 %v4504_v50, %v10337_v5  ;;  %v4506_v55 = vpop.f32.mrb[135].mxu0 }
 0x412   :  { %5069 = vst [vmem:[%s10866_s3 + $0x110] sm:$0xff] %v6035_v46  ;;  %v6037_v8 = vadd.f32 %v4890_v23, %v10341_v16  ;;  %v4892_v45 = vpop.f32.mrb[135].mxu1  ;;  %5068 = vst [vmem:[%s10866_s3 + $0x108] sm:$0xff] %v5972_v19  ;;  %v5974_v6 = vadd.f32 %v4506_v55, %v10345_v44 }
 0x413   :  { %5070 = vst [vmem:[%s10866_s3 + $0x118] sm:$0xff] %v6036_v21  ;;  %v6038_v29 = vadd.f32 %v4892_v45, %v10349_v11  ;;  %5079 = vst [vmem:[%s10866_s3 + $0x160] sm:$0xff] %v5973_v31 }
 0x414   :  { %5081 = vst [vmem:[%s10866_s3 + $0x170] sm:$0xff] %v6037_v8  ;;  %5080 = vst [vmem:[%s10866_s3 + $0x168] sm:$0xff] %v5974_v6 }
 0x415   :  { %5082 = vst [vmem:[%s10866_s3 + $0x178] sm:$0xff] %v6038_v29 }
 0x416   :  { %v4510_v7 = vpop.f32.mrb[136].mxu0 }
 0x417   :  { %v4896_v35 = vpop.f32.mrb[136].mxu1  ;;  %v5975_v57 = vadd.f32 %v4510_v7, %v10337_v5  ;;  %v4512_v61 = vpop.f32.mrb[137].mxu0 }
 0x418   :  { %v6039_v58 = vadd.f32 %v4896_v35, %v10341_v16  ;;  %v4898_v36 = vpop.f32.mrb[137].mxu1  ;;  %v5976_v51 = vadd.f32 %v4512_v61, %v10345_v44  ;;  %v4514_v56 = vpop.f32.mrb[138].mxu0 }
 0x419   :  { %v6040_v25 = vadd.f32 %v4898_v36, %v10349_v11  ;;  %v4900_v12 = vpop.f32.mrb[138].mxu1  ;;  %5091 = vst [vmem:[%s10866_s3 + $0x1c0] sm:$0xff] %v5975_v57  ;;  %v5977_v48 = vadd.f32 %v4514_v56, %v10337_v5  ;;  %v4516_v41 = vpop.f32.mrb[139].mxu0 }
 0x41a   :  { %5093 = vst [vmem:[%s10866_s3 + $0x1d0] sm:$0xff] %v6039_v58  ;;  %v6041_v49 = vadd.f32 %v4900_v12, %v10341_v16  ;;  %v4902_v13 = vpop.f32.mrb[139].mxu1  ;;  %5092 = vst [vmem:[%s10866_s3 + $0x1c8] sm:$0xff] %v5976_v51  ;;  %v5978_v20 = vadd.f32 %v4516_v41, %v10345_v44 }
 0x41b   :  { %5094 = vst [vmem:[%s10866_s3 + $0x1d8] sm:$0xff] %v6040_v25  ;;  %v6042_v15 = vadd.f32 %v4902_v13, %v10349_v11  ;;  %5103 = vst [vmem:[%s10866_s3 + $0x220] sm:$0xff] %v5977_v48 }
 0x41c   :  { %5105 = vst [vmem:[%s10866_s3 + $0x230] sm:$0xff] %v6041_v49  ;;  %5104 = vst [vmem:[%s10866_s3 + $0x228] sm:$0xff] %v5978_v20 }
 0x41d   :  { %5106 = vst [vmem:[%s10866_s3 + $0x238] sm:$0xff] %v6042_v15 }
 0x41e   :  { %v4520_v53 = vpop.f32.mrb[140].mxu0 }
 0x41f   :  { %v4906_v3 = vpop.f32.mrb[140].mxu1  ;;  %v5979_v26 = vadd.f32 %v4520_v53, %v10337_v5  ;;  %v4522_v27 = vpop.f32.mrb[141].mxu0 }
 0x420   :  { %v6043_v14 = vadd.f32 %v4906_v3, %v10341_v16  ;;  %v4908_v4 = vpop.f32.mrb[141].mxu1  ;;  %v5980_v43 = vadd.f32 %v4522_v27, %v10345_v44  ;;  %v4524_v10 = vpop.f32.mrb[142].mxu0 }
 0x421   :  { %v6044_v1 = vadd.f32 %v4908_v4, %v10349_v11  ;;  %v4910_v40 = vpop.f32.mrb[142].mxu1  ;;  %5115 = vst [vmem:[%s10866_s3 + $0x280] sm:$0xff] %v5979_v26  ;;  %v5981_v32 = vadd.f32 %v4524_v10, %v10337_v5  ;;  %v4526_v62 = vpop.f32.mrb[143].mxu0 }
 0x422   :  { %5117 = vst [vmem:[%s10866_s3 + $0x290] sm:$0xff] %v6043_v14  ;;  %v6045_v22 = vadd.f32 %v4910_v40, %v10341_v16  ;;  %v4912_v37 = vpop.f32.mrb[143].mxu1  ;;  %5116 = vst [vmem:[%s10866_s3 + $0x288] sm:$0xff] %v5980_v43  ;;  %v5982_v17 = vadd.f32 %v4526_v62, %v10345_v44 }
 0x423   :  { %5118 = vst [vmem:[%s10866_s3 + $0x298] sm:$0xff] %v6044_v1  ;;  %v6046_v60 = vadd.f32 %v4912_v37, %v10349_v11  ;;  %5127 = vst [vmem:[%s10866_s3 + $0x2e0] sm:$0xff] %v5981_v32 }
 0x424   :  { %5129 = vst [vmem:[%s10866_s3 + $0x2f0] sm:$0xff] %v6045_v22  ;;  %5128 = vst [vmem:[%s10866_s3 + $0x2e8] sm:$0xff] %v5982_v17 }
 0x425   :  { %5130 = vst [vmem:[%s10866_s3 + $0x2f8] sm:$0xff] %v6046_v60 }
 0x426   :  { %v4530_v39 = vpop.f32.mrb[144].mxu0 }
 0x427   :  { %v4916_v63 = vpop.f32.mrb[144].mxu1  ;;  %v5983_v2 = vadd.f32 %v4530_v39, %v10337_v5  ;;  %v4532_v52 = vpop.f32.mrb[145].mxu0 }
 0x428   :  { %v6047_v18 = vadd.f32 %v4916_v63, %v10341_v16  ;;  %v4918_v42 = vpop.f32.mrb[145].mxu1  ;;  %v5984_v0 = vadd.f32 %v4532_v52, %v10345_v44  ;;  %v4534_v47 = vpop.f32.mrb[146].mxu0 }
 0x429   :  { %v6048_v33 = vadd.f32 %v4918_v42, %v10349_v11  ;;  %v4920_v59 = vpop.f32.mrb[146].mxu1  ;;  %5139 = vst [vmem:[%s10866_s3 + $0x340] sm:$0xff] %v5983_v2  ;;  %v5985_v30 = vadd.f32 %v4534_v47, %v10337_v5  ;;  %v4536_v9 = vpop.f32.mrb[147].mxu0 }
 0x42a   :  { %5141 = vst [vmem:[%s10866_s3 + $0x350] sm:$0xff] %v6047_v18  ;;  %v6049_v28 = vadd.f32 %v4920_v59, %v10341_v16  ;;  %v4922_v54 = vpop.f32.mrb[147].mxu1  ;;  %5140 = vst [vmem:[%s10866_s3 + $0x348] sm:$0xff] %v5984_v0  ;;  %v5986_v38 = vadd.f32 %v4536_v9, %v10345_v44 }
 0x42b   :  { %5142 = vst [vmem:[%s10866_s3 + $0x358] sm:$0xff] %v6048_v33  ;;  %v6050_v46 = vadd.f32 %v4922_v54, %v10349_v11  ;;  %5151 = vst [vmem:[%s10866_s3 + $0x3a0] sm:$0xff] %v5985_v30 }
 0x42c   :  { %5153 = vst [vmem:[%s10866_s3 + $0x3b0] sm:$0xff] %v6049_v28  ;;  %5152 = vst [vmem:[%s10866_s3 + $0x3a8] sm:$0xff] %v5986_v38 }
 0x42d   :  { %5154 = vst [vmem:[%s10866_s3 + $0x3b8] sm:$0xff] %v6050_v46 }
 0x42e   :  { %v4540_v34 = vpop.f32.mrb[148].mxu0 }
 0x42f   :  { %v4926_v24 = vpop.f32.mrb[148].mxu1  ;;  %v5987_v19 = vadd.f32 %v4540_v34, %v10337_v5  ;;  %v4542_v50 = vpop.f32.mrb[149].mxu0 }
 0x430   :  { %v6051_v21 = vadd.f32 %v4926_v24, %v10341_v16  ;;  %v4928_v23 = vpop.f32.mrb[149].mxu1  ;;  %v5988_v31 = vadd.f32 %v4542_v50, %v10345_v44  ;;  %v4544_v55 = vpop.f32.mrb[150].mxu0 }
 0x431   :  { %v6052_v8 = vadd.f32 %v4928_v23, %v10349_v11  ;;  %v4930_v45 = vpop.f32.mrb[150].mxu1  ;;  %5163 = vst [vmem:[%s10866_s3 + $0x400] sm:$0xff] %v5987_v19  ;;  %v5989_v6 = vadd.f32 %v4544_v55, %v10337_v5  ;;  %v4546_v7 = vpop.f32.mrb[151].mxu0 }
 0x432   :  { %5165 = vst [vmem:[%s10866_s3 + $0x410] sm:$0xff] %v6051_v21  ;;  %v6053_v29 = vadd.f32 %v4930_v45, %v10341_v16  ;;  %v4932_v35 = vpop.f32.mrb[151].mxu1  ;;  %5164 = vst [vmem:[%s10866_s3 + $0x408] sm:$0xff] %v5988_v31  ;;  %v5990_v57 = vadd.f32 %v4546_v7, %v10345_v44 }
 0x433   :  { %5166 = vst [vmem:[%s10866_s3 + $0x418] sm:$0xff] %v6052_v8  ;;  %v6054_v58 = vadd.f32 %v4932_v35, %v10349_v11  ;;  %5175 = vst [vmem:[%s10866_s3 + $0x460] sm:$0xff] %v5989_v6 }
 0x434   :  { %5177 = vst [vmem:[%s10866_s3 + $0x470] sm:$0xff] %v6053_v29  ;;  %5176 = vst [vmem:[%s10866_s3 + $0x468] sm:$0xff] %v5990_v57 }
 0x435   :  { %5178 = vst [vmem:[%s10866_s3 + $0x478] sm:$0xff] %v6054_v58 }
 0x436   :  { %v4550_v61 = vpop.f32.mrb[152].mxu0 }
 0x437   :  { %v4936_v36 = vpop.f32.mrb[152].mxu1  ;;  %v5991_v51 = vadd.f32 %v4550_v61, %v10337_v5  ;;  %v4552_v56 = vpop.f32.mrb[153].mxu0 }
 0x438   :  { %v6055_v25 = vadd.f32 %v4936_v36, %v10341_v16  ;;  %v4938_v12 = vpop.f32.mrb[153].mxu1  ;;  %v5992_v48 = vadd.f32 %v4552_v56, %v10345_v44  ;;  %v4554_v41 = vpop.f32.mrb[154].mxu0 }
 0x439   :  { %v6056_v49 = vadd.f32 %v4938_v12, %v10349_v11  ;;  %v4940_v13 = vpop.f32.mrb[154].mxu1  ;;  %5187 = vst [vmem:[%s10866_s3 + $0x4c0] sm:$0xff] %v5991_v51  ;;  %v5993_v20 = vadd.f32 %v4554_v41, %v10337_v5  ;;  %v4556_v53 = vpop.f32.mrb[155].mxu0 }
 0x43a   :  { %5189 = vst [vmem:[%s10866_s3 + $0x4d0] sm:$0xff] %v6055_v25  ;;  %v6057_v15 = vadd.f32 %v4940_v13, %v10341_v16  ;;  %v4942_v3 = vpop.f32.mrb[155].mxu1  ;;  %5188 = vst [vmem:[%s10866_s3 + $0x4c8] sm:$0xff] %v5992_v48  ;;  %v5994_v26 = vadd.f32 %v4556_v53, %v10345_v44 }
 0x43b   :  { %5190 = vst [vmem:[%s10866_s3 + $0x4d8] sm:$0xff] %v6056_v49  ;;  %v6058_v14 = vadd.f32 %v4942_v3, %v10349_v11  ;;  %5199 = vst [vmem:[%s10866_s3 + $0x520] sm:$0xff] %v5993_v20 }
 0x43c   :  { %5201 = vst [vmem:[%s10866_s3 + $0x530] sm:$0xff] %v6057_v15  ;;  %5200 = vst [vmem:[%s10866_s3 + $0x528] sm:$0xff] %v5994_v26 }
 0x43d   :  { %5202 = vst [vmem:[%s10866_s3 + $0x538] sm:$0xff] %v6058_v14 }
 0x43e   :  { %v4560_v27 = vpop.f32.mrb[156].mxu0 }
 0x43f   :  { %v4946_v4 = vpop.f32.mrb[156].mxu1  ;;  %v5995_v43 = vadd.f32 %v4560_v27, %v10337_v5  ;;  %v4562_v10 = vpop.f32.mrb[157].mxu0 }
 0x440   :  { %v6059_v1 = vadd.f32 %v4946_v4, %v10341_v16  ;;  %v4948_v40 = vpop.f32.mrb[157].mxu1  ;;  %v5996_v32 = vadd.f32 %v4562_v10, %v10345_v44  ;;  %v4564_v62 = vpop.f32.mrb[158].mxu0 }
 0x441   :  { %v6060_v22 = vadd.f32 %v4948_v40, %v10349_v11  ;;  %v4950_v37 = vpop.f32.mrb[158].mxu1  ;;  %5211 = vst [vmem:[%s10866_s3 + $0x580] sm:$0xff] %v5995_v43  ;;  %v5997_v17 = vadd.f32 %v4564_v62, %v10337_v5  ;;  %v4566_v39 = vpop.f32.mrb[159].mxu0 }
 0x442   :  { %5213 = vst [vmem:[%s10866_s3 + $0x590] sm:$0xff] %v6059_v1  ;;  %v6061_v60 = vadd.f32 %v4950_v37, %v10341_v16  ;;  %v4952_v63 = vpop.f32.mrb[159].mxu1  ;;  %5212 = vst [vmem:[%s10866_s3 + $0x588] sm:$0xff] %v5996_v32  ;;  %v5998_v2 = vadd.f32 %v4566_v39, %v10345_v44 }
 0x443   :  { %5214 = vst [vmem:[%s10866_s3 + $0x598] sm:$0xff] %v6060_v22  ;;  %v6062_v18 = vadd.f32 %v4952_v63, %v10349_v11  ;;  %5223 = vst [vmem:[%s10866_s3 + $0x5e0] sm:$0xff] %v5997_v17 }
 0x444   :  { %5225 = vst [vmem:[%s10866_s3 + $0x5f0] sm:$0xff] %v6061_v60  ;;  %5224 = vst [vmem:[%s10866_s3 + $0x5e8] sm:$0xff] %v5998_v2 }
 0x445   :  { %5226 = vst [vmem:[%s10866_s3 + $0x5f8] sm:$0xff] %v6062_v18 }
 0x446   :  { %v4570_v52 = vpop.f32.mrb[160].mxu0 }
 0x447   :  { %v4956_v42 = vpop.f32.mrb[160].mxu1  ;;  %v5999_v0 = vadd.f32 %v4570_v52, %v10337_v5  ;;  %v4572_v47 = vpop.f32.mrb[161].mxu0 }
 0x448   :  { %v6063_v33 = vadd.f32 %v4956_v42, %v10341_v16  ;;  %v4958_v59 = vpop.f32.mrb[161].mxu1  ;;  %v6000_v30 = vadd.f32 %v4572_v47, %v10345_v44  ;;  %v4574_v9 = vpop.f32.mrb[162].mxu0 }
 0x449   :  { %v6064_v28 = vadd.f32 %v4958_v59, %v10349_v11  ;;  %v4960_v54 = vpop.f32.mrb[162].mxu1  ;;  %5235 = vst [vmem:[%s10866_s3 + $0x640] sm:$0xff] %v5999_v0  ;;  %v6001_v38 = vadd.f32 %v4574_v9, %v10337_v5  ;;  %v4576_v34 = vpop.f32.mrb[163].mxu0 }
 0x44a   :  { %5237 = vst [vmem:[%s10866_s3 + $0x650] sm:$0xff] %v6063_v33  ;;  %v6065_v46 = vadd.f32 %v4960_v54, %v10341_v16  ;;  %v4962_v24 = vpop.f32.mrb[163].mxu1  ;;  %5236 = vst [vmem:[%s10866_s3 + $0x648] sm:$0xff] %v6000_v30  ;;  %v6002_v19 = vadd.f32 %v4576_v34, %v10345_v44 }
 0x44b   :  { %5238 = vst [vmem:[%s10866_s3 + $0x658] sm:$0xff] %v6064_v28  ;;  %v6066_v21 = vadd.f32 %v4962_v24, %v10349_v11  ;;  %5247 = vst [vmem:[%s10866_s3 + $0x6a0] sm:$0xff] %v6001_v38 }
 0x44c   :  { %5249 = vst [vmem:[%s10866_s3 + $0x6b0] sm:$0xff] %v6065_v46  ;;  %5248 = vst [vmem:[%s10866_s3 + $0x6a8] sm:$0xff] %v6002_v19 }
 0x44d   :  { %5250 = vst [vmem:[%s10866_s3 + $0x6b8] sm:$0xff] %v6066_v21 }
 0x44e   :  { %v4580_v50 = vpop.f32.mrb[164].mxu0 }
 0x44f   :  { %v4966_v23 = vpop.f32.mrb[164].mxu1  ;;  %v6003_v31 = vadd.f32 %v4580_v50, %v10337_v5  ;;  %v4582_v55 = vpop.f32.mrb[165].mxu0 }
 0x450   :  { %v6067_v8 = vadd.f32 %v4966_v23, %v10341_v16  ;;  %v4968_v45 = vpop.f32.mrb[165].mxu1  ;;  %v6004_v6 = vadd.f32 %v4582_v55, %v10345_v44  ;;  %v4584_v7 = vpop.f32.mrb[166].mxu0 }
 0x451   :  { %v6068_v29 = vadd.f32 %v4968_v45, %v10349_v11  ;;  %v4970_v35 = vpop.f32.mrb[166].mxu1  ;;  %5259 = vst [vmem:[%s10866_s3 + $0x700] sm:$0xff] %v6003_v31  ;;  %v6005_v57 = vadd.f32 %v4584_v7, %v10337_v5  ;;  %v4586_v61 = vpop.f32.mrb[167].mxu0 }
 0x452   :  { %5261 = vst [vmem:[%s10866_s3 + $0x710] sm:$0xff] %v6067_v8  ;;  %v6069_v58 = vadd.f32 %v4970_v35, %v10341_v16  ;;  %v4972_v36 = vpop.f32.mrb[167].mxu1  ;;  %5260 = vst [vmem:[%s10866_s3 + $0x708] sm:$0xff] %v6004_v6  ;;  %v6006_v51 = vadd.f32 %v4586_v61, %v10345_v44 }
 0x453   :  { %5262 = vst [vmem:[%s10866_s3 + $0x718] sm:$0xff] %v6068_v29  ;;  %v6070_v25 = vadd.f32 %v4972_v36, %v10349_v11  ;;  %5271 = vst [vmem:[%s10866_s3 + $0x760] sm:$0xff] %v6005_v57 }
 0x454   :  { %5273 = vst [vmem:[%s10866_s3 + $0x770] sm:$0xff] %v6069_v58  ;;  %5272 = vst [vmem:[%s10866_s3 + $0x768] sm:$0xff] %v6006_v51 }
 0x455   :  { %5274 = vst [vmem:[%s10866_s3 + $0x778] sm:$0xff] %v6070_v25 }
 0x456   :  { %v4590_v56 = vpop.f32.mrb[168].mxu0 }
 0x457   :  { %v4976_v12 = vpop.f32.mrb[168].mxu1  ;;  %v6007_v48 = vadd.f32 %v4590_v56, %v10337_v5  ;;  %v4592_v41 = vpop.f32.mrb[169].mxu0 }
 0x458   :  { %v6071_v49 = vadd.f32 %v4976_v12, %v10341_v16  ;;  %v4978_v13 = vpop.f32.mrb[169].mxu1  ;;  %v6008_v20 = vadd.f32 %v4592_v41, %v10345_v44  ;;  %v4594_v53 = vpop.f32.mrb[170].mxu0 }
 0x459   :  { %v6072_v15 = vadd.f32 %v4978_v13, %v10349_v11  ;;  %v4980_v3 = vpop.f32.mrb[170].mxu1  ;;  %5283 = vst [vmem:[%s10866_s3 + $0x7c0] sm:$0xff] %v6007_v48  ;;  %v6009_v26 = vadd.f32 %v4594_v53, %v10337_v5  ;;  %v4596_v27 = vpop.f32.mrb[171].mxu0 }
 0x45a   :  { %5285 = vst [vmem:[%s10866_s3 + $0x7d0] sm:$0xff] %v6071_v49  ;;  %v6073_v14 = vadd.f32 %v4980_v3, %v10341_v16  ;;  %v4982_v4 = vpop.f32.mrb[171].mxu1  ;;  %5284 = vst [vmem:[%s10866_s3 + $0x7c8] sm:$0xff] %v6008_v20  ;;  %v6010_v43 = vadd.f32 %v4596_v27, %v10345_v44 }
 0x45b   :  { %5286 = vst [vmem:[%s10866_s3 + $0x7d8] sm:$0xff] %v6072_v15  ;;  %v6074_v1 = vadd.f32 %v4982_v4, %v10349_v11  ;;  %5295 = vst [vmem:[%s10866_s3 + $0x820] sm:$0xff] %v6009_v26 }
 0x45c   :  { %5297 = vst [vmem:[%s10866_s3 + $0x830] sm:$0xff] %v6073_v14  ;;  %5296 = vst [vmem:[%s10866_s3 + $0x828] sm:$0xff] %v6010_v43 }
 0x45d   :  { %5298 = vst [vmem:[%s10866_s3 + $0x838] sm:$0xff] %v6074_v1 }
 0x45e   :  { %v4600_v10 = vpop.f32.mrb[172].mxu0 }
 0x45f   :  { %v4986_v40 = vpop.f32.mrb[172].mxu1  ;;  %v6011_v32 = vadd.f32 %v4600_v10, %v10337_v5  ;;  %v4602_v62 = vpop.f32.mrb[173].mxu0 }
 0x460   :  { %v6075_v22 = vadd.f32 %v4986_v40, %v10341_v16  ;;  %v4988_v37 = vpop.f32.mrb[173].mxu1  ;;  %v6012_v17 = vadd.f32 %v4602_v62, %v10345_v44  ;;  %v4604_v39 = vpop.f32.mrb[174].mxu0 }
 0x461   :  { %v6076_v60 = vadd.f32 %v4988_v37, %v10349_v11  ;;  %v4990_v63 = vpop.f32.mrb[174].mxu1  ;;  %5307 = vst [vmem:[%s10866_s3 + $0x880] sm:$0xff] %v6011_v32  ;;  %v6013_v2 = vadd.f32 %v4604_v39, %v10337_v5  ;;  %v4606_v52 = vpop.f32.mrb[175].mxu0 }
 0x462   :  { %5309 = vst [vmem:[%s10866_s3 + $0x890] sm:$0xff] %v6075_v22  ;;  %v6077_v18 = vadd.f32 %v4990_v63, %v10341_v16  ;;  %v4992_v42 = vpop.f32.mrb[175].mxu1  ;;  %5308 = vst [vmem:[%s10866_s3 + $0x888] sm:$0xff] %v6012_v17  ;;  %v6014_v0 = vadd.f32 %v4606_v52, %v10345_v44 }
 0x463   :  { %5310 = vst [vmem:[%s10866_s3 + $0x898] sm:$0xff] %v6076_v60  ;;  %v6078_v33 = vadd.f32 %v4992_v42, %v10349_v11  ;;  %5319 = vst [vmem:[%s10866_s3 + $0x8e0] sm:$0xff] %v6013_v2 }
 0x464   :  { %5321 = vst [vmem:[%s10866_s3 + $0x8f0] sm:$0xff] %v6077_v18  ;;  %5320 = vst [vmem:[%s10866_s3 + $0x8e8] sm:$0xff] %v6014_v0 }
 0x465   :  { %5322 = vst [vmem:[%s10866_s3 + $0x8f8] sm:$0xff] %v6078_v33 }
 0x466   :  { %v4610_v47 = vpop.f32.mrb[176].mxu0 }
 0x467   :  { %v4996_v59 = vpop.f32.mrb[176].mxu1  ;;  %v6015_v30 = vadd.f32 %v4610_v47, %v10337_v5  ;;  %v4612_v9 = vpop.f32.mrb[177].mxu0 }
 0x468   :  { %v6079_v28 = vadd.f32 %v4996_v59, %v10341_v16  ;;  %v4998_v54 = vpop.f32.mrb[177].mxu1  ;;  %v6016_v38 = vadd.f32 %v4612_v9, %v10345_v44  ;;  %v4614_v34 = vpop.f32.mrb[178].mxu0 }
 0x469   :  { %v6080_v46 = vadd.f32 %v4998_v54, %v10349_v11  ;;  %v5000_v24 = vpop.f32.mrb[178].mxu1  ;;  %5331 = vst [vmem:[%s10866_s3 + $0x940] sm:$0xff] %v6015_v30  ;;  %v6017_v19 = vadd.f32 %v4614_v34, %v10337_v5  ;;  %v4616_v50 = vpop.f32.mrb[179].mxu0 }
 0x46a   :  { %5333 = vst [vmem:[%s10866_s3 + $0x950] sm:$0xff] %v6079_v28  ;;  %v6081_v21 = vadd.f32 %v5000_v24, %v10341_v16  ;;  %v5002_v23 = vpop.f32.mrb[179].mxu1  ;;  %5332 = vst [vmem:[%s10866_s3 + $0x948] sm:$0xff] %v6016_v38  ;;  %v6018_v31 = vadd.f32 %v4616_v50, %v10345_v44 }
 0x46b   :  { %5334 = vst [vmem:[%s10866_s3 + $0x958] sm:$0xff] %v6080_v46  ;;  %v6082_v8 = vadd.f32 %v5002_v23, %v10349_v11  ;;  %5343 = vst [vmem:[%s10866_s3 + $0x9a0] sm:$0xff] %v6017_v19 }
 0x46c   :  { %5345 = vst [vmem:[%s10866_s3 + $0x9b0] sm:$0xff] %v6081_v21  ;;  %5344 = vst [vmem:[%s10866_s3 + $0x9a8] sm:$0xff] %v6018_v31 }
 0x46d   :  { %5346 = vst [vmem:[%s10866_s3 + $0x9b8] sm:$0xff] %v6082_v8 }
 0x46e   :  { %v4620_v55 = vpop.f32.mrb[180].mxu0 }
 0x46f   :  { %v5006_v45 = vpop.f32.mrb[180].mxu1  ;;  %v6019_v6 = vadd.f32 %v4620_v55, %v10337_v5  ;;  %v4622_v7 = vpop.f32.mrb[181].mxu0 }
 0x470   :  { %v6083_v29 = vadd.f32 %v5006_v45, %v10341_v16  ;;  %v5008_v35 = vpop.f32.mrb[181].mxu1  ;;  %v6020_v57 = vadd.f32 %v4622_v7, %v10345_v44  ;;  %v4624_v61 = vpop.f32.mrb[182].mxu0 }
 0x471   :  { %v6084_v58 = vadd.f32 %v5008_v35, %v10349_v11  ;;  %v5010_v36 = vpop.f32.mrb[182].mxu1  ;;  %5355 = vst [vmem:[%s10866_s3 + $0xa00] sm:$0xff] %v6019_v6  ;;  %v6021_v51 = vadd.f32 %v4624_v61, %v10337_v5  ;;  %v4626_v56 = vpop.f32.mrb[183].mxu0 }
 0x472   :  { %5357 = vst [vmem:[%s10866_s3 + $0xa10] sm:$0xff] %v6083_v29  ;;  %v6085_v25 = vadd.f32 %v5010_v36, %v10341_v16  ;;  %v5012_v12 = vpop.f32.mrb[183].mxu1  ;;  %5356 = vst [vmem:[%s10866_s3 + $0xa08] sm:$0xff] %v6020_v57  ;;  %v6022_v48 = vadd.f32 %v4626_v56, %v10345_v44 }
 0x473   :  { %5358 = vst [vmem:[%s10866_s3 + $0xa18] sm:$0xff] %v6084_v58  ;;  %v6086_v49 = vadd.f32 %v5012_v12, %v10349_v11  ;;  %5367 = vst [vmem:[%s10866_s3 + $0xa60] sm:$0xff] %v6021_v51 }
 0x474   :  { %5369 = vst [vmem:[%s10866_s3 + $0xa70] sm:$0xff] %v6085_v25  ;;  %5368 = vst [vmem:[%s10866_s3 + $0xa68] sm:$0xff] %v6022_v48 }
 0x475   :  { %5370 = vst [vmem:[%s10866_s3 + $0xa78] sm:$0xff] %v6086_v49 }
 0x476   :  { %v4630_v41 = vpop.f32.mrb[184].mxu0 }
 0x477   :  { %v5016_v13 = vpop.f32.mrb[184].mxu1  ;;  %v6023_v20 = vadd.f32 %v4630_v41, %v10337_v5  ;;  %v4632_v53 = vpop.f32.mrb[185].mxu0 }
 0x478   :  { %v6087_v15 = vadd.f32 %v5016_v13, %v10341_v16  ;;  %v5018_v3 = vpop.f32.mrb[185].mxu1  ;;  %v6024_v26 = vadd.f32 %v4632_v53, %v10345_v44  ;;  %v4634_v27 = vpop.f32.mrb[186].mxu0 }
 0x479   :  { %v6088_v14 = vadd.f32 %v5018_v3, %v10349_v11  ;;  %v5020_v4 = vpop.f32.mrb[186].mxu1  ;;  %5379 = vst [vmem:[%s10866_s3 + $0xac0] sm:$0xff] %v6023_v20  ;;  %v6025_v43 = vadd.f32 %v4634_v27, %v10337_v5  ;;  %v4636_v10 = vpop.f32.mrb[187].mxu0 }
 0x47a   :  { %5381 = vst [vmem:[%s10866_s3 + $0xad0] sm:$0xff] %v6087_v15  ;;  %v6089_v1 = vadd.f32 %v5020_v4, %v10341_v16  ;;  %v5022_v40 = vpop.f32.mrb[187].mxu1  ;;  %5380 = vst [vmem:[%s10866_s3 + $0xac8] sm:$0xff] %v6024_v26  ;;  %v6026_v32 = vadd.f32 %v4636_v10, %v10345_v44 }
 0x47b   :  { %5382 = vst [vmem:[%s10866_s3 + $0xad8] sm:$0xff] %v6088_v14  ;;  %v6090_v22 = vadd.f32 %v5022_v40, %v10349_v11  ;;  %5391 = vst [vmem:[%s10866_s3 + $0xb20] sm:$0xff] %v6025_v43 }
 0x47c   :  { %5393 = vst [vmem:[%s10866_s3 + $0xb30] sm:$0xff] %v6089_v1  ;;  %5392 = vst [vmem:[%s10866_s3 + $0xb28] sm:$0xff] %v6026_v32 }
 0x47d   :  { %5394 = vst [vmem:[%s10866_s3 + $0xb38] sm:$0xff] %v6090_v22 }
 0x47e   :  { %v4640_v62 = vpop.f32.mrb[188].mxu0 }
 0x47f   :  { %v5026_v37 = vpop.f32.mrb[188].mxu1  ;;  %v6027_v17 = vadd.f32 %v4640_v62, %v10337_v5  ;;  %v4642_v39 = vpop.f32.mrb[189].mxu0 }
 0x480   :  { %v6091_v60 = vadd.f32 %v5026_v37, %v10341_v16  ;;  %v5028_v63 = vpop.f32.mrb[189].mxu1  ;;  %v6028_v2 = vadd.f32 %v4642_v39, %v10345_v44  ;;  %v4644_v52 = vpop.f32.mrb[190].mxu0 }
 0x481   :  { %v6092_v18 = vadd.f32 %v5028_v63, %v10349_v11  ;;  %v5030_v42 = vpop.f32.mrb[190].mxu1  ;;  %5403 = vst [vmem:[%s10866_s3 + $0xb80] sm:$0xff] %v6027_v17  ;;  %v6029_v0 = vadd.f32 %v4644_v52, %v10337_v5  ;;  %v4646_v47 = vpop.f32.mrb[191].mxu0 }
 0x482   :  { %5405 = vst [vmem:[%s10866_s3 + $0xb90] sm:$0xff] %v6091_v60  ;;  %v6093_v33 = vadd.f32 %v5030_v42, %v10341_v16  ;;  %v5032_v59 = vpop.f32.mrb[191].mxu1  ;;  %5404 = vst [vmem:[%s10866_s3 + $0xb88] sm:$0xff] %v6028_v2  ;;  %v6030_v30 = vadd.f32 %v4646_v47, %v10345_v44 }
 0x483   :  { %5406 = vst [vmem:[%s10866_s3 + $0xb98] sm:$0xff] %v6092_v18  ;;  %v6094_v28 = vadd.f32 %v5032_v59, %v10349_v11  ;;  %5415 = vst [vmem:[%s10866_s3 + $0xbe0] sm:$0xff] %v6029_v0 }
 0x484   :  { %5417 = vst [vmem:[%s10866_s3 + $0xbf0] sm:$0xff] %v6093_v33  ;;  %5416 = vst [vmem:[%s10866_s3 + $0xbe8] sm:$0xff] %v6030_v30 }
 0x485   :  { %5418 = vst [vmem:[%s10866_s3 + $0xbf8] sm:$0xff] %v6094_v28 }

</bundles_post_ra>
